<compile_context>
chip_gen: v6e
topology: v6e:2x2x1
jax: 0.10.0
libtpu: 0.0.40
codegen_flags: <defaults>
</compile_context>

<pallas_src>
import math
import functools

import jax
import jax.numpy as jnp
from jax.experimental import pallas as pl
from jax.experimental.pallas import tpu as pltpu


def fused_encoder_kernel(x_ref, wqkv_ref, bqkv_ref, wo_ref, bo_ref,
                         g1_ref, be1_ref, w1_ref, b1_ref,
                         w2_ref, b2_ref, g2_ref, be2_ref,
                         o_ref, acc_ref, *, TB, L, D, H, eps, in_scale):
    """One grid step = one encoder layer applied to a tile of TB sequences."""
    M = TB * L
    Dh = D // H
    layer = pl.program_id(1)

    # Load the input tile (and apply src * sqrt(d_model)) only at layer 0;
    # afterwards the activation carry lives in VMEM scratch.
    @pl.when(layer == 0)
    def _():
        acc_ref[...] = (x_ref[...].astype(jnp.float32) * in_scale).reshape(M, D)

    x = acc_ref[...]                                          # (M, D) f32

    # ---- self attention --------------------------------------------------
    qkv = jnp.dot(x.astype(jnp.bfloat16), wqkv_ref[...],
                  preferred_element_type=jnp.float32) + bqkv_ref[...]   # (M, 3D)

    def split_heads(col0):
        # lane slices per head, batched over (head, sequence): (H*TB, L, Dh)
        parts = [qkv[:, col0 + h * Dh: col0 + (h + 1) * Dh].reshape(TB, L, Dh)
                 for h in range(H)]
        return jnp.concatenate(parts, axis=0)

    qh = split_heads(0)
    kh = split_heads(D)
    vh = split_heads(2 * D)

    # single batched contraction over all heads & sequences (no per-head matmul loop)
    s = jnp.einsum('bqd,bkd->bqk',
                   qh.astype(jnp.bfloat16), kh.astype(jnp.bfloat16),
                   preferred_element_type=jnp.float32) * (1.0 / math.sqrt(Dh))
    s = s - jnp.max(s, axis=-1, keepdims=True)
    p = jnp.exp(s)
    p = p * pl.reciprocal(jnp.sum(p, axis=-1, keepdims=True), approx=True)
    o = jnp.einsum('bqk,bkd->bqd',
                   p.astype(jnp.bfloat16), vh.astype(jnp.bfloat16),
                   preferred_element_type=jnp.float32)        # (H*TB, L, Dh)

    attn = jnp.concatenate(
        [o[h * TB:(h + 1) * TB].reshape(M, Dh) for h in range(H)], axis=-1)  # (M, D)
    attn = jnp.dot(attn.astype(jnp.bfloat16), wo_ref[...],
                   preferred_element_type=jnp.float32) + bo_ref[...]

    # residual + layernorm1 (post-norm), f32
    x = x + attn
    mu = jnp.mean(x, axis=-1, keepdims=True)
    xc = x - mu
    var = jnp.mean(xc * xc, axis=-1, keepdims=True)
    x = xc * jax.lax.rsqrt(var + eps) * g1_ref[...] + be1_ref[...]

    # ---- feed forward ------------------------------------------------------
    h1 = jnp.dot(x.astype(jnp.bfloat16), w1_ref[...],
                 preferred_element_type=jnp.float32) + b1_ref[...]
    h1 = jnp.maximum(h1, 0.0)                                 # ReLU
    ff = jnp.dot(h1.astype(jnp.bfloat16), w2_ref[...],
                 preferred_element_type=jnp.float32) + b2_ref[...]

    # residual + layernorm2
    x = x + ff
    mu = jnp.mean(x, axis=-1, keepdims=True)
    xc = x - mu
    var = jnp.mean(xc * xc, axis=-1, keepdims=True)
    x = xc * jax.lax.rsqrt(var + eps) * g2_ref[...] + be2_ref[...]

    acc_ref[...] = x                                          # carry to next layer

    @pl.when(layer == pl.num_programs(1) - 1)
    def _():
        o_ref[...] = x.reshape(TB, L, D).astype(o_ref.dtype)


def transformer_layers_forward(src, params, *, num_heads=4, tb=None):
    """Equivalent of TransformerLayers.forward. src: (B, N, L, D) float32.

    params: dict of per-layer weights stacked on a leading nlayers axis,
    already transposed for x @ W (weights are (in, out))."""
    B, N, L, D = src.shape
    BN = B * N
    nlayers = params["wqkv"].shape[0]
    Dff = params["w1"].shape[2]

    if tb is None:
        # Aim for ~256 rows (TB*L) per tile; on v7x you may additionally want
        # num_tiles >= 2 so both TensorCores get work.
        tb = max(1, min(BN, pl.cdiv(256, L)))

    x = src.reshape(BN, L, D)
    pad = (-BN) % tb
    if pad:
        x = jnp.concatenate([x, jnp.zeros((pad, L, D), x.dtype)], axis=0)
    num_tiles = (BN + pad) // tb

    # bf16 weights at the pallas_call boundary (doubles MXU rate, halves DMA);
    # biases / LayerNorm params and all element-wise math stay f32.
    to_bf16 = lambda w: w.astype(jnp.bfloat16)
    wqkv, wo, w1, w2 = map(to_bf16,
                           (params["wqkv"], params["wo"], params["w1"], params["w2"]))

    kernel = functools.partial(
        fused_encoder_kernel, TB=tb, L=L, D=D, H=num_heads, eps=1e-5,
        in_scale=float(math.sqrt(D)))

    lay = lambda b, l: (l, 0, 0)          # per-layer weight / bias blocks
    seq = lambda b, l: (b, 0, 0)          # activation tile, resident across layers

    out = pl.pallas_call(
        kernel,
        out_shape=jax.ShapeDtypeStruct((num_tiles * tb, L, D), src.dtype),
        grid_spec=pltpu.PrefetchScalarGridSpec(
            num_scalar_prefetch=0,
            grid=(num_tiles, nlayers),
            in_specs=[
                pl.BlockSpec((tb, L, D), seq),                 # x
                pl.BlockSpec((None, D, 3 * D), lay),           # wqkv (bf16)
                pl.BlockSpec((None, 1, 3 * D), lay),           # bqkv
                pl.BlockSpec((None, D, D), lay),               # wo   (bf16)
                pl.BlockSpec((None, 1, D), lay),               # bo
                pl.BlockSpec((None, 1, D), lay),               # ln1 gamma
                pl.BlockSpec((None, 1, D), lay),               # ln1 beta
                pl.BlockSpec((None, D, Dff), lay),             # w1   (bf16)
                pl.BlockSpec((None, 1, Dff), lay),             # b1
                pl.BlockSpec((None, Dff, D), lay),             # w2   (bf16)
                pl.BlockSpec((None, 1, D), lay),               # b2
                pl.BlockSpec((None, 1, D), lay),               # ln2 gamma
                pl.BlockSpec((None, 1, D), lay),               # ln2 beta
            ],
            out_specs=pl.BlockSpec((tb, L, D), seq),
            scratch_shapes=[pltpu.VMEM((tb * L, D), jnp.float32)],
        ),
        compiler_params=pltpu.CompilerParams(
            dimension_semantics=("parallel", "arbitrary"),
            vmem_limit_bytes=64 * 1024 * 1024),
    )(x, wqkv, params["bqkv"], wo, params["bo"],
      params["g1"], params["be1"], w1, params["b1"], w2, params["b2"],
      params["g2"], params["be2"])

    return out[:BN].reshape(B, N, L, D)


def init_params(key, hidden_dim, nlayers, mlp_ratio):
    """Deterministic synthetic parameters, stacked over layers (x @ W layout)."""
    D, Dff = hidden_dim, hidden_dim * mlp_ratio
    std = 0.02
    wqkv, wo, w1, w2 = [], [], [], []
    for l in range(nlayers):
        k1, k2, k3, k4 = jax.random.split(jax.random.fold_in(key, l), 4)
        wqkv.append(std * jax.random.normal(k1, (D, 3 * D), jnp.float32))
        wo.append(std * jax.random.normal(k2, (D, D), jnp.float32))
        w1.append(std * jax.random.normal(k3, (D, Dff), jnp.float32))
        w2.append(std * jax.random.normal(k4, (Dff, D), jnp.float32))
    z = lambda *s: jnp.zeros((nlayers,) + s, jnp.float32)
    o = lambda *s: jnp.ones((nlayers,) + s, jnp.float32)
    return dict(
        wqkv=jnp.stack(wqkv), bqkv=z(1, 3 * D),
        wo=jnp.stack(wo), bo=z(1, D),
        g1=o(1, D), be1=z(1, D),
        w1=jnp.stack(w1), b1=z(1, Dff),
        w2=jnp.stack(w2), b2=z(1, D),
        g2=o(1, D), be2=z(1, D),
    )


if __name__ == "__main__":
    # Small shapes consistent with the module's forward: src is (B, N, L, D).
    B, N, L, D = 2, 4, 8, 32
    nlayers, mlp_ratio, num_heads = 2, 4, 4

    key = jax.random.PRNGKey(0)
    k_x, k_p = jax.random.split(key)
    src = jax.random.normal(k_x, (B, N, L, D), dtype=jnp.float32)
    params = init_params(k_p, D, nlayers, mlp_ratio)

    out = transformer_layers_forward(src, params, num_heads=num_heads)
    out = jax.block_until_ready(out)

    assert out.shape == (B, N, L, D), out.shape
    assert bool(jnp.all(jnp.isfinite(out)))
    print("KERNEL_OK")
</pallas_src>

<mosaic_0001>
module attributes {stable_mosaic.version = 11 : i64} {
  func.func @fused_encoder_kernel(%arg0: i32, %arg1: i32, %arg2: memref<8x8x32xf32, #tpu.memory_space<vmem>>, %arg3: memref<1x32x96xbf16, #tpu.memory_space<vmem>>, %arg4: memref<1x1x96xf32, #tpu.memory_space<vmem>>, %arg5: memref<1x32x32xbf16, #tpu.memory_space<vmem>>, %arg6: memref<1x1x32xf32, #tpu.memory_space<vmem>>, %arg7: memref<1x1x32xf32, #tpu.memory_space<vmem>>, %arg8: memref<1x1x32xf32, #tpu.memory_space<vmem>>, %arg9: memref<1x32x128xbf16, #tpu.memory_space<vmem>>, %arg10: memref<1x1x128xf32, #tpu.memory_space<vmem>>, %arg11: memref<1x128x32xbf16, #tpu.memory_space<vmem>>, %arg12: memref<1x1x32xf32, #tpu.memory_space<vmem>>, %arg13: memref<1x1x32xf32, #tpu.memory_space<vmem>>, %arg14: memref<1x1x32xf32, #tpu.memory_space<vmem>>, %arg15: memref<8x8x32xf32, #tpu.memory_space<vmem>>, %arg16: memref<64x32xf32, #tpu.memory_space<vmem>>) attributes {dimension_semantics = [#tpu.dimension_semantics<parallel>, #tpu.dimension_semantics<arbitrary>], iteration_bounds = array<i64: 1, 2>, scalar_prefetch = 0 : i64, scratch_operands = 1 : i64, tpu.core_type = #tpu.core_type<tc>, window_params = [{transform_indices = @transform_0, window_bounds = array<i64: 8, 8, 32>}, {transform_indices = @transform_1, window_bounds = array<i64: 1, 32, 96>}, {transform_indices = @transform_2, window_bounds = array<i64: 1, 1, 96>}, {transform_indices = @transform_3, window_bounds = array<i64: 1, 32, 32>}, {transform_indices = @transform_4, window_bounds = array<i64: 1, 1, 32>}, {transform_indices = @transform_5, window_bounds = array<i64: 1, 1, 32>}, {transform_indices = @transform_6, window_bounds = array<i64: 1, 1, 32>}, {transform_indices = @transform_7, window_bounds = array<i64: 1, 32, 128>}, {transform_indices = @transform_8, window_bounds = array<i64: 1, 1, 128>}, {transform_indices = @transform_9, window_bounds = array<i64: 1, 128, 32>}, {transform_indices = @transform_10, window_bounds = array<i64: 1, 1, 32>}, {transform_indices = @transform_11, window_bounds = array<i64: 1, 1, 32>}, {transform_indices = @transform_12, window_bounds = array<i64: 1, 1, 32>}, {transform_indices = @transform_13, window_bounds = array<i64: 8, 8, 32>}]} {
    %c0_i32 = arith.constant 0 : i32
    %0 = arith.cmpi eq, %arg1, %c0_i32 : i32
    %1 = arith.extui %0 : i1 to i32
    %c0_i32_0 = arith.constant 0 : i32
    %2 = arith.cmpi ne, %1, %c0_i32_0 : i32
    scf.if %2 {
      %c0_60 = arith.constant 0 : index
      %c0_61 = arith.constant 0 : index
      %c0_62 = arith.constant 0 : index
      %146 = vector.load %arg2[%c0_60, %c0_61, %c0_62] : memref<8x8x32xf32, #tpu.memory_space<vmem>>, vector<8x8x32xf32>
      %cst_63 = arith.constant 5.65685415 : f32
      %147 = vector.broadcast %cst_63 : f32 to vector<8x8x32xf32>
      %148 = arith.mulf %146, %147 : vector<8x8x32xf32>
      %149 = vector.shape_cast %148 : vector<8x8x32xf32> to vector<64x32xf32>
      %c0_64 = arith.constant 0 : index
      %c0_65 = arith.constant 0 : index
      %150 = vector.load %arg16[%c0_64, %c0_65] : memref<64x32xf32, #tpu.memory_space<vmem>>, vector<64x32xf32>
      tpu.vector_store %arg16[%c0_64, %c0_65], %149 {strides = array<i32>} : memref<64x32xf32, #tpu.memory_space<vmem>>, vector<64x32xf32>,
    } else {
    }
    %c0 = arith.constant 0 : index
    %c0_1 = arith.constant 0 : index
    %3 = vector.load %arg16[%c0, %c0_1] : memref<64x32xf32, #tpu.memory_space<vmem>>, vector<64x32xf32>
    %4 = arith.truncf %3 : vector<64x32xf32> to vector<64x32xbf16>
    %c0_2 = arith.constant 0 : index
    %c0_3 = arith.constant 0 : index
    %c0_4 = arith.constant 0 : index
    %5 = vector.load %arg3[%c0_2, %c0_3, %c0_4] : memref<1x32x96xbf16, #tpu.memory_space<vmem>>, vector<1x32x96xbf16>
    %6 = vector.shape_cast %5 : vector<1x32x96xbf16> to vector<32x96xbf16>
    %cst = arith.constant dense<0.000000e+00> : vector<64x96xf32>
    %7 = tpu.matmul %4, %6, %cst {dimension_numbers = #tpu.dot_dimension_numbers<[1], [0], [0], [1], [0, 0, 1, 1], [], []>} : vector<64x32xbf16>, vector<32x96xbf16>, vector<64x96xf32> -> vector<64x96xf32>
    %c0_5 = arith.constant 0 : index
    %c0_6 = arith.constant 0 : index
    %c0_7 = arith.constant 0 : index
    %8 = vector.load %arg4[%c0_5, %c0_6, %c0_7] : memref<1x1x96xf32, #tpu.memory_space<vmem>>, vector<1x1x96xf32>
    %9 = vector.shape_cast %8 : vector<1x1x96xf32> to vector<1x96xf32>
    %10 = vector.broadcast %9 : vector<1x96xf32> to vector<64x96xf32>
    %11 = arith.addf %7, %10 : vector<64x96xf32>
    %12 = vector.extract_strided_slice %11 {offsets = [0, 0], sizes = [64, 8], strides = [1, 1]} : vector<64x96xf32> to vector<64x8xf32>
    %13 = vector.shape_cast %12 : vector<64x8xf32> to vector<8x8x8xf32>
    %14 = vector.extract_strided_slice %11 {offsets = [0, 8], sizes = [64, 8], strides = [1, 1]} : vector<64x96xf32> to vector<64x8xf32>
    %15 = vector.shape_cast %14 : vector<64x8xf32> to vector<8x8x8xf32>
    %16 = vector.extract_strided_slice %11 {offsets = [0, 16], sizes = [64, 8], strides = [1, 1]} : vector<64x96xf32> to vector<64x8xf32>
    %17 = vector.shape_cast %16 : vector<64x8xf32> to vector<8x8x8xf32>
    %18 = vector.extract_strided_slice %11 {offsets = [0, 24], sizes = [64, 8], strides = [1, 1]} : vector<64x96xf32> to vector<64x8xf32>
    %19 = vector.shape_cast %18 : vector<64x8xf32> to vector<8x8x8xf32>
    %20 = tpu.concatenate %13, %15, %17, %19 in 0 : vector<8x8x8xf32>, vector<8x8x8xf32>, vector<8x8x8xf32>, vector<8x8x8xf32> -> vector<32x8x8xf32>
    %21 = vector.extract_strided_slice %11 {offsets = [0, 32], sizes = [64, 8], strides = [1, 1]} : vector<64x96xf32> to vector<64x8xf32>
    %22 = vector.shape_cast %21 : vector<64x8xf32> to vector<8x8x8xf32>
    %23 = vector.extract_strided_slice %11 {offsets = [0, 40], sizes = [64, 8], strides = [1, 1]} : vector<64x96xf32> to vector<64x8xf32>
    %24 = vector.shape_cast %23 : vector<64x8xf32> to vector<8x8x8xf32>
    %25 = vector.extract_strided_slice %11 {offsets = [0, 48], sizes = [64, 8], strides = [1, 1]} : vector<64x96xf32> to vector<64x8xf32>
    %26 = vector.shape_cast %25 : vector<64x8xf32> to vector<8x8x8xf32>
    %27 = vector.extract_strided_slice %11 {offsets = [0, 56], sizes = [64, 8], strides = [1, 1]} : vector<64x96xf32> to vector<64x8xf32>
    %28 = vector.shape_cast %27 : vector<64x8xf32> to vector<8x8x8xf32>
    %29 = tpu.concatenate %22, %24, %26, %28 in 0 : vector<8x8x8xf32>, vector<8x8x8xf32>, vector<8x8x8xf32>, vector<8x8x8xf32> -> vector<32x8x8xf32>
    %30 = vector.extract_strided_slice %11 {offsets = [0, 64], sizes = [64, 8], strides = [1, 1]} : vector<64x96xf32> to vector<64x8xf32>
    %31 = vector.shape_cast %30 : vector<64x8xf32> to vector<8x8x8xf32>
    %32 = vector.extract_strided_slice %11 {offsets = [0, 72], sizes = [64, 8], strides = [1, 1]} : vector<64x96xf32> to vector<64x8xf32>
    %33 = vector.shape_cast %32 : vector<64x8xf32> to vector<8x8x8xf32>
    %34 = vector.extract_strided_slice %11 {offsets = [0, 80], sizes = [64, 8], strides = [1, 1]} : vector<64x96xf32> to vector<64x8xf32>
    %35 = vector.shape_cast %34 : vector<64x8xf32> to vector<8x8x8xf32>
    %36 = vector.extract_strided_slice %11 {offsets = [0, 88], sizes = [64, 8], strides = [1, 1]} : vector<64x96xf32> to vector<64x8xf32>
    %37 = vector.shape_cast %36 : vector<64x8xf32> to vector<8x8x8xf32>
    %38 = tpu.concatenate %31, %33, %35, %37 in 0 : vector<8x8x8xf32>, vector<8x8x8xf32>, vector<8x8x8xf32>, vector<8x8x8xf32> -> vector<32x8x8xf32>
    %39 = arith.truncf %20 : vector<32x8x8xf32> to vector<32x8x8xbf16>
    %40 = arith.truncf %29 : vector<32x8x8xf32> to vector<32x8x8xbf16>
    "tpu.trace_start"() <{level = 10 : i32, message = "bqd,bkd->bqk"}> : () -> ()
    %cst_8 = arith.constant dense<0.000000e+00> : vector<32x8x8xf32>
    %41 = tpu.matmul %39, %40, %cst_8 {dimension_numbers = #tpu.dot_dimension_numbers<[2], [2], [1], [1], [0, 0, 0, 1, 1, 1], [0], [0]>} : vector<32x8x8xbf16>, vector<32x8x8xbf16>, vector<32x8x8xf32> -> vector<32x8x8xf32>
    "tpu.trace_stop"() : () -> ()
    %cst_9 = arith.constant 0.353553385 : f32
    %42 = vector.broadcast %cst_9 : f32 to vector<32x8x8xf32>
    %43 = arith.mulf %41, %42 : vector<32x8x8xf32>
    %cst_10 = arith.constant dense<0xFF800000> : vector<32x8xf32>
    %44 = vector.multi_reduction <maximumf>, %43, %cst_10 [2] : vector<32x8x8xf32> to vector<32x8xf32>
    %45 = vector.shape_cast %44 : vector<32x8xf32> to vector<32x8x1xf32>
    %46 = vector.broadcast %45 : vector<32x8x1xf32> to vector<32x8x8xf32>
    %47 = arith.subf %43, %46 : vector<32x8x8xf32>
    %48 = math.exp %47 : vector<32x8x8xf32>
    %cst_11 = arith.constant dense<0.000000e+00> : vector<32x8xf32>
    %49 = vector.multi_reduction <add>, %48, %cst_11 [2] : vector<32x8x8xf32> to vector<32x8xf32>
    %50 = vector.shape_cast %49 : vector<32x8xf32> to vector<32x8x1xf32>
    %51 = tpu.reciprocal %50 {approx = true} : vector<32x8x1xf32> -> vector<32x8x1xf32>
    %52 = vector.broadcast %51 : vector<32x8x1xf32> to vector<32x8x8xf32>
    %53 = arith.mulf %48, %52 : vector<32x8x8xf32>
    %54 = arith.truncf %53 : vector<32x8x8xf32> to vector<32x8x8xbf16>
    %55 = arith.truncf %38 : vector<32x8x8xf32> to vector<32x8x8xbf16>
    "tpu.trace_start"() <{level = 10 : i32, message = "bqk,bkd->bqd"}> : () -> ()
    %cst_12 = arith.constant dense<0.000000e+00> : vector<32x8x8xf32>
    %56 = tpu.matmul %54, %55, %cst_12 {dimension_numbers = #tpu.dot_dimension_numbers<[2], [1], [1], [2], [0, 0, 0, 1, 1, 2], [0], [0]>} : vector<32x8x8xbf16>, vector<32x8x8xbf16>, vector<32x8x8xf32> -> vector<32x8x8xf32>
    "tpu.trace_stop"() : () -> ()
    %57 = vector.extract_strided_slice %56 {offsets = [0, 0, 0], sizes = [8, 8, 8], strides = [1, 1, 1]} : vector<32x8x8xf32> to vector<8x8x8xf32>
    %58 = vector.shape_cast %57 : vector<8x8x8xf32> to vector<64x8xf32>
    %59 = vector.extract_strided_slice %56 {offsets = [8, 0, 0], sizes = [8, 8, 8], strides = [1, 1, 1]} : vector<32x8x8xf32> to vector<8x8x8xf32>
    %60 = vector.shape_cast %59 : vector<8x8x8xf32> to vector<64x8xf32>
    %61 = vector.extract_strided_slice %56 {offsets = [16, 0, 0], sizes = [8, 8, 8], strides = [1, 1, 1]} : vector<32x8x8xf32> to vector<8x8x8xf32>
    %62 = vector.shape_cast %61 : vector<8x8x8xf32> to vector<64x8xf32>
    %63 = vector.extract_strided_slice %56 {offsets = [24, 0, 0], sizes = [8, 8, 8], strides = [1, 1, 1]} : vector<32x8x8xf32> to vector<8x8x8xf32>
    %64 = vector.shape_cast %63 : vector<8x8x8xf32> to vector<64x8xf32>
    %65 = tpu.concatenate %58, %60, %62, %64 in 1 : vector<64x8xf32>, vector<64x8xf32>, vector<64x8xf32>, vector<64x8xf32> -> vector<64x32xf32>
    %66 = arith.truncf %65 : vector<64x32xf32> to vector<64x32xbf16>
    %c0_13 = arith.constant 0 : index
    %c0_14 = arith.constant 0 : index
    %c0_15 = arith.constant 0 : index
    %67 = vector.load %arg5[%c0_13, %c0_14, %c0_15] : memref<1x32x32xbf16, #tpu.memory_space<vmem>>, vector<1x32x32xbf16>
    %68 = vector.shape_cast %67 : vector<1x32x32xbf16> to vector<32x32xbf16>
    %cst_16 = arith.constant dense<0.000000e+00> : vector<64x32xf32>
    %69 = tpu.matmul %66, %68, %cst_16 {dimension_numbers = #tpu.dot_dimension_numbers<[1], [0], [0], [1], [0, 0, 1, 1], [], []>} : vector<64x32xbf16>, vector<32x32xbf16>, vector<64x32xf32> -> vector<64x32xf32>
    %c0_17 = arith.constant 0 : index
    %c0_18 = arith.constant 0 : index
    %c0_19 = arith.constant 0 : index
    %70 = vector.load %arg6[%c0_17, %c0_18, %c0_19] : memref<1x1x32xf32, #tpu.memory_space<vmem>>, vector<1x1x32xf32>
    %71 = vector.shape_cast %70 : vector<1x1x32xf32> to vector<1x32xf32>
    %72 = vector.broadcast %71 : vector<1x32xf32> to vector<64x32xf32>
    %73 = arith.addf %69, %72 : vector<64x32xf32>
    %74 = arith.addf %3, %73 : vector<64x32xf32>
    %cst_20 = arith.constant dense<0.000000e+00> : vector<64xf32>
    %75 = vector.multi_reduction <add>, %74, %cst_20 [1] : vector<64x32xf32> to vector<64xf32>
    %76 = vector.shape_cast %75 : vector<64xf32> to vector<64x1xf32>
    %cst_21 = arith.constant 3.200000e+01 : f32
    %77 = vector.broadcast %cst_21 : f32 to vector<64x1xf32>
    %78 = arith.divf %76, %77 : vector<64x1xf32>
    %79 = vector.broadcast %78 : vector<64x1xf32> to vector<64x32xf32>
    %80 = arith.subf %74, %79 : vector<64x32xf32>
    %81 = arith.mulf %80, %80 : vector<64x32xf32>
    %cst_22 = arith.constant dense<0.000000e+00> : vector<64xf32>
    %82 = vector.multi_reduction <add>, %81, %cst_22 [1] : vector<64x32xf32> to vector<64xf32>
    %83 = vector.shape_cast %82 : vector<64xf32> to vector<64x1xf32>
    %cst_23 = arith.constant 3.200000e+01 : f32
    %84 = vector.broadcast %cst_23 : f32 to vector<64x1xf32>
    %85 = arith.divf %83, %84 : vector<64x1xf32>
    %cst_24 = arith.constant 9.99999974E-6 : f32
    %86 = vector.broadcast %cst_24 : f32 to vector<64x1xf32>
    %87 = arith.addf %85, %86 : vector<64x1xf32>
    %88 = math.rsqrt %87 : vector<64x1xf32>
    %89 = vector.broadcast %88 : vector<64x1xf32> to vector<64x32xf32>
    %90 = arith.mulf %80, %89 : vector<64x32xf32>
    %c0_25 = arith.constant 0 : index
    %c0_26 = arith.constant 0 : index
    %c0_27 = arith.constant 0 : index
    %91 = vector.load %arg7[%c0_25, %c0_26, %c0_27] : memref<1x1x32xf32, #tpu.memory_space<vmem>>, vector<1x1x32xf32>
    %92 = vector.shape_cast %91 : vector<1x1x32xf32> to vector<1x32xf32>
    %93 = vector.broadcast %92 : vector<1x32xf32> to vector<64x32xf32>
    %94 = arith.mulf %90, %93 : vector<64x32xf32>
    %c0_28 = arith.constant 0 : index
    %c0_29 = arith.constant 0 : index
    %c0_30 = arith.constant 0 : index
    %95 = vector.load %arg8[%c0_28, %c0_29, %c0_30] : memref<1x1x32xf32, #tpu.memory_space<vmem>>, vector<1x1x32xf32>
    %96 = vector.shape_cast %95 : vector<1x1x32xf32> to vector<1x32xf32>
    %97 = vector.broadcast %96 : vector<1x32xf32> to vector<64x32xf32>
    %98 = arith.addf %94, %97 : vector<64x32xf32>
    %99 = arith.truncf %98 : vector<64x32xf32> to vector<64x32xbf16>
    %c0_31 = arith.constant 0 : index
    %c0_32 = arith.constant 0 : index
    %c0_33 = arith.constant 0 : index
    %100 = vector.load %arg9[%c0_31, %c0_32, %c0_33] : memref<1x32x128xbf16, #tpu.memory_space<vmem>>, vector<1x32x128xbf16>
    %101 = vector.shape_cast %100 : vector<1x32x128xbf16> to vector<32x128xbf16>
    %cst_34 = arith.constant dense<0.000000e+00> : vector<64x128xf32>
    %102 = tpu.matmul %99, %101, %cst_34 {dimension_numbers = #tpu.dot_dimension_numbers<[1], [0], [0], [1], [0, 0, 1, 1], [], []>} : vector<64x32xbf16>, vector<32x128xbf16>, vector<64x128xf32> -> vector<64x128xf32>
    %c0_35 = arith.constant 0 : index
    %c0_36 = arith.constant 0 : index
    %c0_37 = arith.constant 0 : index
    %103 = vector.load %arg10[%c0_35, %c0_36, %c0_37] : memref<1x1x128xf32, #tpu.memory_space<vmem>>, vector<1x1x128xf32>
    %104 = vector.shape_cast %103 : vector<1x1x128xf32> to vector<1x128xf32>
    %105 = vector.broadcast %104 : vector<1x128xf32> to vector<64x128xf32>
    %106 = arith.addf %102, %105 : vector<64x128xf32>
    %cst_38 = arith.constant 0.000000e+00 : f32
    %107 = vector.broadcast %cst_38 : f32 to vector<64x128xf32>
    %108 = arith.maximumf %106, %107 : vector<64x128xf32>
    %109 = arith.truncf %108 : vector<64x128xf32> to vector<64x128xbf16>
    %c0_39 = arith.constant 0 : index
    %c0_40 = arith.constant 0 : index
    %c0_41 = arith.constant 0 : index
    %110 = vector.load %arg11[%c0_39, %c0_40, %c0_41] : memref<1x128x32xbf16, #tpu.memory_space<vmem>>, vector<1x128x32xbf16>
    %111 = vector.shape_cast %110 : vector<1x128x32xbf16> to vector<128x32xbf16>
    %cst_42 = arith.constant dense<0.000000e+00> : vector<64x32xf32>
    %112 = tpu.matmul %109, %111, %cst_42 {dimension_numbers = #tpu.dot_dimension_numbers<[1], [0], [0], [1], [0, 0, 1, 1], [], []>} : vector<64x128xbf16>, vector<128x32xbf16>, vector<64x32xf32> -> vector<64x32xf32>
    %c0_43 = arith.constant 0 : index
    %c0_44 = arith.constant 0 : index
    %c0_45 = arith.constant 0 : index
    %113 = vector.load %arg12[%c0_43, %c0_44, %c0_45] : memref<1x1x32xf32, #tpu.memory_space<vmem>>, vector<1x1x32xf32>
    %114 = vector.shape_cast %113 : vector<1x1x32xf32> to vector<1x32xf32>
    %115 = vector.broadcast %114 : vector<1x32xf32> to vector<64x32xf32>
    %116 = arith.addf %112, %115 : vector<64x32xf32>
    %117 = arith.addf %98, %116 : vector<64x32xf32>
    %cst_46 = arith.constant dense<0.000000e+00> : vector<64xf32>
    %118 = vector.multi_reduction <add>, %117, %cst_46 [1] : vector<64x32xf32> to vector<64xf32>
    %119 = vector.shape_cast %118 : vector<64xf32> to vector<64x1xf32>
    %cst_47 = arith.constant 3.200000e+01 : f32
    %120 = vector.broadcast %cst_47 : f32 to vector<64x1xf32>
    %121 = arith.divf %119, %120 : vector<64x1xf32>
    %122 = vector.broadcast %121 : vector<64x1xf32> to vector<64x32xf32>
    %123 = arith.subf %117, %122 : vector<64x32xf32>
    %124 = arith.mulf %123, %123 : vector<64x32xf32>
    %cst_48 = arith.constant dense<0.000000e+00> : vector<64xf32>
    %125 = vector.multi_reduction <add>, %124, %cst_48 [1] : vector<64x32xf32> to vector<64xf32>
    %126 = vector.shape_cast %125 : vector<64xf32> to vector<64x1xf32>
    %cst_49 = arith.constant 3.200000e+01 : f32
    %127 = vector.broadcast %cst_49 : f32 to vector<64x1xf32>
    %128 = arith.divf %126, %127 : vector<64x1xf32>
    %cst_50 = arith.constant 9.99999974E-6 : f32
    %129 = vector.broadcast %cst_50 : f32 to vector<64x1xf32>
    %130 = arith.addf %128, %129 : vector<64x1xf32>
    %131 = math.rsqrt %130 : vector<64x1xf32>
    %132 = vector.broadcast %131 : vector<64x1xf32> to vector<64x32xf32>
    %133 = arith.mulf %123, %132 : vector<64x32xf32>
    %c0_51 = arith.constant 0 : index
    %c0_52 = arith.constant 0 : index
    %c0_53 = arith.constant 0 : index
    %134 = vector.load %arg13[%c0_51, %c0_52, %c0_53] : memref<1x1x32xf32, #tpu.memory_space<vmem>>, vector<1x1x32xf32>
    %135 = vector.shape_cast %134 : vector<1x1x32xf32> to vector<1x32xf32>
    %136 = vector.broadcast %135 : vector<1x32xf32> to vector<64x32xf32>
    %137 = arith.mulf %133, %136 : vector<64x32xf32>
    %c0_54 = arith.constant 0 : index
    %c0_55 = arith.constant 0 : index
    %c0_56 = arith.constant 0 : index
    %138 = vector.load %arg14[%c0_54, %c0_55, %c0_56] : memref<1x1x32xf32, #tpu.memory_space<vmem>>, vector<1x1x32xf32>
    %139 = vector.shape_cast %138 : vector<1x1x32xf32> to vector<1x32xf32>
    %140 = vector.broadcast %139 : vector<1x32xf32> to vector<64x32xf32>
    %141 = arith.addf %137, %140 : vector<64x32xf32>
    %c0_57 = arith.constant 0 : index
    %c0_58 = arith.constant 0 : index
    %142 = vector.load %arg16[%c0_57, %c0_58] : memref<64x32xf32, #tpu.memory_space<vmem>>, vector<64x32xf32>
    tpu.vector_store %arg16[%c0_57, %c0_58], %141 {strides = array<i32>} : memref<64x32xf32, #tpu.memory_space<vmem>>, vector<64x32xf32>,
    %c1_i32 = arith.constant 1 : i32
    %143 = arith.cmpi eq, %arg1, %c1_i32 : i32
    %144 = arith.extui %143 : i1 to i32
    %c0_i32_59 = arith.constant 0 : i32
    %145 = arith.cmpi ne, %144, %c0_i32_59 : i32
    scf.if %145 {
      %146 = vector.shape_cast %141 : vector<64x32xf32> to vector<8x8x32xf32>
      %c0_60 = arith.constant 0 : index
      %c0_61 = arith.constant 0 : index
      %c0_62 = arith.constant 0 : index
      %147 = vector.load %arg15[%c0_60, %c0_61, %c0_62] : memref<8x8x32xf32, #tpu.memory_space<vmem>>, vector<8x8x32xf32>
      tpu.vector_store %arg15[%c0_60, %c0_61, %c0_62], %146 {strides = array<i32>} : memref<8x8x32xf32, #tpu.memory_space<vmem>>, vector<8x8x32xf32>,
    } else {
    }
    return
  }
  func.func @transform_0(%arg0: i32, %arg1: i32) -> (i32, i32, i32) {
    %c0_i32 = arith.constant 0 : i32
    %c0_i32_0 = arith.constant 0 : i32
    %c0_i32_1 = arith.constant 0 : i32
    return %arg0, %c0_i32, %c0_i32_0 : i32, i32, i32
  }
  func.func @transform_1(%arg0: i32, %arg1: i32) -> (i32, i32, i32) {
    %c0_i32 = arith.constant 0 : i32
    %c0_i32_0 = arith.constant 0 : i32
    %c0_i32_1 = arith.constant 0 : i32
    return %arg1, %c0_i32, %c0_i32_0 : i32, i32, i32
  }
  func.func @transform_2(%arg0: i32, %arg1: i32) -> (i32, i32, i32) {
    %c0_i32 = arith.constant 0 : i32
    %c0_i32_0 = arith.constant 0 : i32
    %c0_i32_1 = arith.constant 0 : i32
    return %arg1, %c0_i32, %c0_i32_0 : i32, i32, i32
  }
  func.func @transform_3(%arg0: i32, %arg1: i32) -> (i32, i32, i32) {
    %c0_i32 = arith.constant 0 : i32
    %c0_i32_0 = arith.constant 0 : i32
    %c0_i32_1 = arith.constant 0 : i32
    return %arg1, %c0_i32, %c0_i32_0 : i32, i32, i32
  }
  func.func @transform_4(%arg0: i32, %arg1: i32) -> (i32, i32, i32) {
    %c0_i32 = arith.constant 0 : i32
    %c0_i32_0 = arith.constant 0 : i32
    %c0_i32_1 = arith.constant 0 : i32
    return %arg1, %c0_i32, %c0_i32_0 : i32, i32, i32
  }
  func.func @transform_5(%arg0: i32, %arg1: i32) -> (i32, i32, i32) {
    %c0_i32 = arith.constant 0 : i32
    %c0_i32_0 = arith.constant 0 : i32
    %c0_i32_1 = arith.constant 0 : i32
    return %arg1, %c0_i32, %c0_i32_0 : i32, i32, i32
  }
  func.func @transform_6(%arg0: i32, %arg1: i32) -> (i32, i32, i32) {
    %c0_i32 = arith.constant 0 : i32
    %c0_i32_0 = arith.constant 0 : i32
    %c0_i32_1 = arith.constant 0 : i32
    return %arg1, %c0_i32, %c0_i32_0 : i32, i32, i32
  }
  func.func @transform_7(%arg0: i32, %arg1: i32) -> (i32, i32, i32) {
    %c0_i32 = arith.constant 0 : i32
    %c0_i32_0 = arith.constant 0 : i32
    %c0_i32_1 = arith.constant 0 : i32
    return %arg1, %c0_i32, %c0_i32_0 : i32, i32, i32
  }
  func.func @transform_8(%arg0: i32, %arg1: i32) -> (i32, i32, i32) {
    %c0_i32 = arith.constant 0 : i32
    %c0_i32_0 = arith.constant 0 : i32
    %c0_i32_1 = arith.constant 0 : i32
    return %arg1, %c0_i32, %c0_i32_0 : i32, i32, i32
  }
  func.func @transform_9(%arg0: i32, %arg1: i32) -> (i32, i32, i32) {
    %c0_i32 = arith.constant 0 : i32
    %c0_i32_0 = arith.constant 0 : i32
    %c0_i32_1 = arith.constant 0 : i32
    return %arg1, %c0_i32, %c0_i32_0 : i32, i32, i32
  }
  func.func @transform_10(%arg0: i32, %arg1: i32) -> (i32, i32, i32) {
    %c0_i32 = arith.constant 0 : i32
    %c0_i32_0 = arith.constant 0 : i32
    %c0_i32_1 = arith.constant 0 : i32
    return %arg1, %c0_i32, %c0_i32_0 : i32, i32, i32
  }
  func.func @transform_11(%arg0: i32, %arg1: i32) -> (i32, i32, i32) {
    %c0_i32 = arith.constant 0 : i32
    %c0_i32_0 = arith.constant 0 : i32
    %c0_i32_1 = arith.constant 0 : i32
    return %arg1, %c0_i32, %c0_i32_0 : i32, i32, i32
  }
  func.func @transform_12(%arg0: i32, %arg1: i32) -> (i32, i32, i32) {
    %c0_i32 = arith.constant 0 : i32
    %c0_i32_0 = arith.constant 0 : i32
    %c0_i32_1 = arith.constant 0 : i32
    return %arg1, %c0_i32, %c0_i32_0 : i32, i32, i32
  }
  func.func @transform_13(%arg0: i32, %arg1: i32) -> (i32, i32, i32) {
    %c0_i32 = arith.constant 0 : i32
    %c0_i32_0 = arith.constant 0 : i32
    %c0_i32_1 = arith.constant 0 : i32
    return %arg0, %c0_i32, %c0_i32_0 : i32, i32, i32
  }
}

</mosaic_0001>

<bundles_post_ra>
// kernel: tpu_custom_call.1
= control target key start
LH: loop header
LB: loop body
LE: loop exit
PB: predicated region body
PF: predicated region fallthrough
CT: control target
= control target key end

     0   :  { %s7973_s0 = inlined_call_operand.vmem [shape: f32[8,8,32], index: 0, kind: input, shape index: {}]   ;;  %s7974_s1 = inlined_call_operand.vmem [shape: bf16[2,32,96], index: 1, kind: input, shape index: {}]   ;;  %s7975_s2 = inlined_call_operand.vmem [shape: f32[2,1,96], index: 2, kind: input, shape index: {}]   ;;  %s7976_s3 = inlined_call_operand.vmem [shape: bf16[2,32,32], index: 3, kind: input, shape index: {}]   ;;  %s7977_s4 = inlined_call_operand.vmem [shape: f32[2,1,32], index: 4, kind: input, shape index: {}]   ;;  %s7978_s5 = inlined_call_operand.vmem [shape: f32[2,1,32], index: 5, kind: input, shape index: {}]   ;;  %s7979_s6 = inlined_call_operand.vmem [shape: f32[2,1,32], index: 6, kind: input, shape index: {}]   ;;  %s7980_s7 = inlined_call_operand.vmem [shape: bf16[2,32,128], index: 7, kind: input, shape index: {}]   ;;  %s7981_s8 = inlined_call_operand.vmem [shape: f32[2,1,128], index: 8, kind: input, shape index: {}]   ;;  %s7982_s9 = inlined_call_operand.vmem [shape: bf16[2,128,32], index: 9, kind: input, shape index: {}]   ;;  %s7983_s10 = inlined_call_operand.vmem [shape: f32[2,1,32], index: 10, kind: input, shape index: {}]   ;;  %s7984_s11 = inlined_call_operand.vmem [shape: f32[2,1,32], index: 11, kind: input, shape index: {}]   ;;  %s7985_s12 = inlined_call_operand.vmem [shape: f32[2,1,32], index: 12, kind: input, shape index: {}]   ;;  %s7986_s13 = inlined_call_operand.hbm [shape: f32[8,8,32], index: 13, kind: output, shape index: {}]  }
   0x1   :  { %7994 = sst [smem:[#allocation22_spill]] %s7974_s1 }
   0x2   :  { %7995 = sst [smem:[#allocation23_spill]] %s7976_s3 }
   0x3   :  { %7996 = sst [smem:[#allocation24_spill]] %s7986_s13 }
   0x4   :  { %18 = vsyncpa [#allocation4], 0  ;;  %s6585_s25 = smov 0   ;;  %s6587_s26 = smov 0  }
   0x5   :  { %s6589_s27 = smov 0  }
   0x6 LB: > { %7997 = sst [smem:[#allocation6_spill]] %s6497_s26  ;;  %s33_s29 = sadd.s32 1, %s6497_s26  ;;  %s6501_s27 = sphi %s6589_s27, %s24_s27   ;;  %s6497_s26 = sphi %s6587_s26, %s8039_s26   ;;  %s6493_s25 = sphi %s6585_s25, %s8038_s25  }
   0x7   : > { %7998 = sst [smem:[#allocation7_spill]] %s6501_s27  ;;  %p34_p0 = scmp.ge.s32.totalorder %s33_s29, 2 }
   0x8   : > { %p5388_p1 = scmp.ge.s32.totalorder %s6501_s27, 1  ;;  %p505_p2 = scmp.lt.s32.totalorder %s6501_s27, 3 }
   0x9   : > { %s8041_s29 = smov (%p34_p0, %s33_s29), 0 }
   0xa   : > { %7999 = sst [smem:[#allocation8_spill]] %s8041_s29  ;;  %p506_p3 = pnand %p5388_p1, %p505_p2 }
   0xc   : > { %509 = sbr.rel (%p506_p3) target bundleno = 2779 (0xadb), region = 72 }
  0x11   : > { %p594_p4 = scmp.lt.s32.totalorder %s6493_s25, 1  ;;  %s8000_s1 = sld [smem:[#allocation22_spill]] }
  0x12   : > { %s8001_s3 = sld [smem:[#allocation23_spill]]  ;;  %p5397_p5 = scmp.ne.s32.totalorder %s6493_s25, 0 }
  0x13   : > { %s6608_s30 = scalar_select %p594_p4, %s6493_s25, 1 }
  0x15   : > { %s5501_s14 = sshll.u32 %s6608_s30, 4  ;;  %s631_s15 = scalar_lea.vmem %s7983_s10, %s6608_s30 }
  0x16   : > { %s634_s18 = scalar_lea.vmem %s7984_s11, %s6608_s30  ;;  %s637_s27 = scalar_lea.vmem %s7985_s12, %s6608_s30 }
  0x17   : > { %s6618_s20 = scalar_lea.vmem %s8000_s1, %s5501_s14  ;;  %s6640_s1 = scalar_lea.vmem %s7980_s7, %s5501_s14 }
  0x18   : > { %s6623_s23 = scalar_lea.vmem %s8001_s3, %s5501_s14  ;;  %s623_s3 = scalar_lea.vmem %s7981_s8, %s6608_s30 }
  0x19   : > { %8002 = sst [smem:[#allocation9_spill]] %s6623_s23  ;;  %s5504_s23 = sshll.u32 %s6608_s30, 6 }
  0x1a   : > { %s6650_s29 = scalar_lea.vmem %s7982_s9, %s5504_s23  ;;  %643 = sbr.rel (%p5397_p5) target bundleno = 39 (0x27), region = 76 }
  0x1f   : > { %v644_v0 = vld [vmem:[%s7973_s0] sm:$0xff]  ;;  %vm660_vm0 = vcmask 261120   ;;  %v645_v1 = vld [vmem:[%s7973_s0 + $0x8] sm:$0xff]  ;;  %v646_v2 = vld [vmem:[%s7973_s0 + $0x10] sm:$0xff] }
  0x20   : > { %v652_v3 = vmul.f32 5.656854, %v644_v0  ;;  %v653_v4 = vmul.f32 5.656854, %v645_v1  ;;  %v654_v5 = vmul.f32 5.656854, %v646_v2 }
  0x21   : > { %v647_v6 = vld [vmem:[%s7973_s0 + $0x18] sm:$0xff]  ;;  %v648_v7 = vld [vmem:[%s7973_s0 + $0x20] sm:$0xff]  ;;  %v649_v8 = vld [vmem:[%s7973_s0 + $0x28] sm:$0xff] }
  0x22   : > { %661 = vst.msk [vmem:[#allocation2] sm:$0xff] %vm660_vm0, %v652_v3  ;;  %662 = vst.msk [vmem:[#allocation2 + $0x8] sm:$0xff] %vm660_vm0, %v653_v4  ;;  %v655_v9 = vmul.f32 5.656854, %v647_v6  ;;  %v656_v10 = vmul.f32 5.656854, %v648_v7 }
  0x23   : > { %663 = vst.msk [vmem:[#allocation2 + $0x10] sm:$0xff] %vm660_vm0, %v654_v5  ;;  %v657_v11 = vmul.f32 5.656854, %v649_v8  ;;  %v650_v12 = vld [vmem:[%s7973_s0 + $0x30] sm:$0xff]  ;;  %v651_v13 = vld [vmem:[%s7973_s0 + $0x38] sm:$0xff] }
  0x24   : > { %664 = vst.msk [vmem:[#allocation2 + $0x18] sm:$0xff] %vm660_vm0, %v655_v9  ;;  %665 = vst.msk [vmem:[#allocation2 + $0x20] sm:$0xff] %vm660_vm0, %v656_v10  ;;  %v658_v14 = vmul.f32 5.656854, %v650_v12  ;;  %v659_v15 = vmul.f32 5.656854, %v651_v13 }
  0x25   : > { %666 = vst.msk [vmem:[#allocation2 + $0x28] sm:$0xff] %vm660_vm0, %v657_v11 }
  0x26   : > { %667 = vst.msk [vmem:[#allocation2 + $0x30] sm:$0xff] %vm660_vm0, %v658_v14  ;;  %668 = vst.msk [vmem:[#allocation2 + $0x38] sm:$0xff] %vm660_vm0, %v659_v15 }
  0x27 PF: > { %v6269_v16 = vld [vmem:[%s6618_s20 + $0x8] sm:$0xff]   ;;  %v6270_v17 = vld [vmem:[%s6618_s20] sm:$0xff]   ;;  %vm704_vm1 = vcmask 261120   ;;  %s8003_s17 = scalar_lea.vmem %s7975_s2, %s6608_s30  ;;  %s6503_s26 = smov 120   ;;  %v7990_v44 = vmov 0.0   ;;  %vm6505_vm2 = vmmov 0  }
  0x28   : > { %5663 = vmatprep.subr.bf16.mxu1 %v6269_v16  ;;  %v5398_v32 = vld [vmem:[%s8003_s17] ss:$0 sm:$0xff]  ;;  %5687 = vmatprep.subr.bf16.mxu0 %v7990_v44  ;;  %s6506_s16 = smov 112   ;;  %s6507_s14 = smov 96   ;;  %vm897_vm3 = vcmask 64512   ;;  %vm2884_vm4 = vcmask 1043456  }
  0x29   : > { %v669_v18 = vld [vmem:[#allocation2] sm:$0xff]  ;;  %v670_v19 = vld [vmem:[#allocation2 + $0x8] sm:$0xff]  ;;  %5664 = vmatpush3.bf16.msra.mxu1 %v6269_v16  ;;  %5689 = vmatprep.mubr.msk.bf16.mxu0 %vm6505_vm2, %v7990_v44  ;;  %s6508_s19 = smov 104   ;;  %s6509_s21 = smov 64   ;;  %vm4520_vm5 = vcmask 130048   ;;  %vm4529_vm6 = vcmask 195584  }
  0x2a   : > { %v677_v20 = vpack.c.bf16 %v670_v19, %v669_v18  ;;  %v671_v21 = vld [vmem:[#allocation2 + $0x10] sm:$0xff]  ;;  %5665 = vmatprep.subr.bf16.mxu1 %v6270_v17  ;;  %s6510_s22 = smov 8   ;;  %s6511_s23 = smov 16  }
  0x2b   : > { %v672_v22 = vld [vmem:[#allocation2 + $0x18] sm:$0xff]  ;;  %v673_v23 = vld [vmem:[#allocation2 + $0x20] sm:$0xff]  ;;  %s8029_s28 = sld [smem:[#allocation9_spill]]  ;;  %s6512_s24 = smov 24  }
  0x2c   : > { %v674_v24 = vld [vmem:[#allocation2 + $0x28] sm:$0xff]  ;;  %5667 = vmatprep.mubr.msk.bf16.mxu1 %vm704_vm1, %v677_v20  ;;  %v678_v25 = vpack.c.bf16 %v672_v22, %v671_v21  ;;  %s8030_s17 = scalar_lea.vmem %s7977_s4, %s6608_s30  ;;  %p5496_p6 = scmp.ne.s32.totalorder %s6493_s25, 1 }
  0x2d   : > { %5666 = vmatpush3.bf16.msra.mxu1 %v6270_v17  ;;  %v679_v26 = vpack.c.bf16 %v674_v24, %v673_v23  ;;  %v675_v27 = vld [vmem:[#allocation2 + $0x30] sm:$0xff]  ;;  %v676_v28 = vld [vmem:[#allocation2 + $0x38] sm:$0xff] }
  0x2e   : > { %v680_v29 = vpack.c.bf16 %v676_v28, %v675_v27  ;;  %5675 = vmatprep.subr.bf16.mxu1 %v7990_v44 }
  0x30   : > { %5668 = vmatmul.mubr.msk.bf16.vlgmr.msra.gmra.mxu1 %vm704_vm1, %v678_v25 }
  0x31   : > { %5671 = vmatprep.mubr.msk.bf16.mxu1 %vm704_vm1, %v679_v26 }
  0x38   : > { %5672 = vmatmul.mubr.msk.bf16.gmra.mxu1 %vm704_vm1, %v680_v29 }
  0x39   : > { %5677 = vmatprep.mubr.msk.bf16.mxu1 %vm6505_vm2, %v7990_v44 }
  0xf0   : > { %v5669_v30 = vpop.f32.mrf.mxu1 }
  0xf1   : > { %v760_v35 = vadd.f32 %v5669_v30, %v5398_v32 }
  0xf2   : > { %v751_v31 = vpop.f32.mrf.mxu1 }
  0xf3   : > { %v752_v37 = vadd.f32 %v5398_v32, %v751_v31  ;;  %v6734_v56 = vpack.c.bf16 %v760_v35, %v760_v35 }
  0xf4   : > { %v5670_v33 = vpop.f32.mrf.mxu1 }
  0xf5   : > { %v763_v34 = vadd.f32 %v5670_v33, %v5398_v32  ;;  %v6720_v52 = vpack.c.bf16 %v752_v37, %v752_v37 }
  0xf6   : > { %v754_v36 = vpop.f32.mrf.mxu1 }
  0xf7   : > { %v755_v38 = vadd.f32 %v5398_v32, %v754_v36  ;;  %v6708_v40 = vpack.i.bf16 %v763_v34, %v760_v35  ;;  %v6724_v53 = vpack.c.bf16 %v763_v34, %v763_v34 }
  0xf8   : > { %v5673_v39 = vpop.f32.mrf.mxu1 }
  0xf9   : > { %v6149_v41 = vpack.i.bf16 %v755_v38, %v752_v37  ;;  %v776_v43 = vadd.f32 %v5673_v39, %v5398_v32  ;;  %v6726_v54 = vpack.c.bf16 %v755_v38, %v755_v38 }
  0xfa   : > { %v767_v42 = vpop.f32.mrf.mxu1 }
  0xfb   : > { %6150 = vrot.lane.b32.xlu0 %v6149_v41, %s6503_s26  ;;  %v768_v46 = vadd.f32 %v5398_v32, %v767_v42  ;;  %v6749_v59 = vpack.c.bf16 %v776_v43, %v776_v43 }
  0xfc   : > { %v5674_v45 = vpop.f32.mrf.mxu1 }
  0xfd   : > { %v779_v47 = vadd.f32 %v5674_v45, %v5398_v32  ;;  %v6732_v55 = vpack.c.bf16 %v768_v46, %v768_v46 }
  0xfe   : > { %v770_v48 = vpop.f32.mrf.mxu1 }
  0xff   : > { %v771_v49 = vadd.f32 %v5398_v32, %v770_v48  ;;  %6155 = vrot.lane.b32.xlu0 %v6708_v40, %s6503_s26  ;;  %v6713_v50 = vpack.i.bf16 %v779_v47, %v776_v43  ;;  %v6741_v57 = vpack.c.bf16 %v779_v47, %v779_v47 }
 0x101   : > { %v6159_v51 = vpack.i.bf16 %v771_v49, %v768_v46  ;;  %v6743_v58 = vpack.c.bf16 %v771_v49, %v771_v49 }
 0x103   : > { %6160 = vrot.lane.b32.xlu1 %v6159_v51, %s6503_s26  ;;  %6165 = vrot.lane.b32.xlu0 %v6713_v50, %s6503_s26 }
 0x107   : > { %6170 = vrot.lane.b32.xlu0 %v6149_v41, %s6506_s16  ;;  %895 = vrot.lane.b32.xlu1 %v6720_v52, %s6507_s14 }
 0x10b   : > { %1043 = vrot.lane.b32.xlu0 %v6724_v53, %s6507_s14  ;;  %945 = vrot.lane.b32.xlu1 %v6726_v54, %s6507_s14 }
 0x10f   : > { %1092 = vrot.lane.b32.xlu0 %v6732_v55, %s6507_s14  ;;  %994 = vrot.lane.b32.xlu1 %v6734_v56, %s6507_s14 }
 0x113   : > { %6180 = vrot.lane.b32.xlu0 %v6159_v51, %s6506_s16  ;;  %6175 = vrot.lane.b32.xlu1 %v6708_v40, %s6506_s16 }
 0x117   : > { %1239 = vrot.lane.b32.xlu0 %v6741_v57, %s6507_s14  ;;  %1141 = vrot.lane.b32.xlu1 %v6743_v58, %s6507_s14 }
 0x11b   : > { %1190 = vrot.lane.b32.xlu1 %v6749_v59, %s6507_s14 }
 0x11f   : > { %6185 = vrot.lane.b32.xlu1 %v6713_v50, %s6506_s16  ;;  %s8031_s16 = scalar_lea.vmem %s7978_s5, %s6608_s30 }
 0x16d   : > { %v6151_v60 = vpop.permute.xlu0 %6150 }
 0x16e   : > { %v6153_v61 = vunpack.i.h.bf16 %v6151_v60  ;;  %v6152_v62 = vunpack.i.l.bf16 %v6151_v60 }
 0x170   : > { %v6754_v63 = vpack.c.bf16 %v6152_v62, %v6152_v62  ;;  %v6756_v0 = vpack.c.bf16 %v6153_v61, %v6153_v61 }
 0x171   : > { %v6156_v1 = vpop.permute.xlu0 %6155 }
 0x172   : > { %v6157_v2 = vunpack.i.l.bf16 %v6156_v1  ;;  %1288 = vrot.lane.b32.xlu0 %v6754_v63, %s6507_s14  ;;  %1337 = vrot.lane.b32.xlu1 %v6756_v0, %s6507_s14  ;;  %v6158_v3 = vunpack.i.h.bf16 %v6156_v1 }
 0x174   : > { %v6762_v4 = vpack.c.bf16 %v6157_v2, %v6157_v2  ;;  %v6767_v9 = vpack.c.bf16 %v6158_v3, %v6158_v3 }
 0x175   : > { %v6161_v5 = vpop.permute.xlu1 %6160  ;;  %v6166_v6 = vpop.permute.xlu0 %6165 }
 0x176   : > { %v6163_v7 = vunpack.i.h.bf16 %v6161_v5  ;;  %v6162_v8 = vunpack.i.l.bf16 %v6161_v5  ;;  %6190 = vrot.lane.b32.xlu0 %v6149_v41, %s6508_s19  ;;  %1386 = vrot.lane.b32.xlu1 %v6762_v4, %s6507_s14  ;;  %v6167_v12 = vunpack.i.l.bf16 %v6166_v6  ;;  %v6168_v18 = vunpack.i.h.bf16 %v6166_v6 }
 0x178   : > { %v6774_v14 = vpack.c.bf16 %v6162_v8, %v6162_v8  ;;  %v6776_v15 = vpack.c.bf16 %v6163_v7, %v6163_v7  ;;  %v6783_v19 = vpack.c.bf16 %v6167_v12, %v6167_v12  ;;  %v6789_v22 = vpack.c.bf16 %v6168_v18, %v6168_v18 }
 0x179   : > { %v6171_v10 = vpop.permute.xlu0 %6170  ;;  %v896_v11 = vpop.permute.xlu1 %895 }
 0x17a   : > { %v902_v13 = vsel %vm897_vm3, %v896_v11, 0  ;;  %1435 = vrot.lane.b32.xlu0 %v6767_v9, %s6507_s14  ;;  %6195 = vrot.lane.b32.xlu1 %v6708_v40, %s6508_s19  ;;  %v6173_v25 = vunpack.i.h.bf16 %v6171_v10  ;;  %v6172_v26 = vunpack.i.l.bf16 %v6171_v10 }
 0x17b   : > { %5676 = vmatpush3.bf16.xpose.msra.mxu1 %v902_v13 }
 0x17c   : > { %5681 = vmatprep.subr.bf16.mxu1 %v7990_v44  ;;  %v6802_v30 = vpack.c.bf16 %v6172_v26, %v6172_v26  ;;  %v6804_v31 = vpack.c.bf16 %v6173_v25, %v6173_v25 }
 0x17d   : > { %v1044_v16 = vpop.permute.xlu0 %1043  ;;  %v946_v17 = vpop.permute.xlu1 %945 }
 0x17e   : > { %1484 = vrot.lane.b32.xlu0 %v6774_v14, %s6507_s14  ;;  %1533 = vrot.lane.b32.xlu1 %v6776_v15, %s6507_s14  ;;  %v951_v23 = vsel %vm897_vm3, %v946_v17, 0  ;;  %v1049_v34 = vsel %vm897_vm3, %v1044_v16, 0 }
 0x181   : > { %v995_v20 = vpop.permute.xlu1 %994  ;;  %v1093_v24 = vpop.permute.xlu0 %1092 }
 0x182   : > { %6200 = vrot.lane.b32.xlu0 %v6159_v51, %s6508_s19  ;;  %1582 = vrot.lane.b32.xlu1 %v6783_v19, %s6507_s14  ;;  %v1000_v21 = vsel %vm897_vm3, %v995_v20, 0  ;;  %v1098_v35 = vsel %vm897_vm3, %v1093_v24, 0 }
 0x183   : > { %5678 = vmatmul.mubr.msk.bf16.vlgmr.msra.gmra.mxu1 %vm897_vm3, %v6720_v52  ;;  %5688 = vmatpush3.bf16.xpose.msra.mxu0 %v1000_v21 }
 0x184   : > { %5682 = vmatpush3.bf16.xpose.msra.mxu1 %v951_v23  ;;  %5683 = vmatprep.mubr.msk.bf16.mxu1 %vm6505_vm2, %v7990_v44 }
 0x185   : > { %v6176_v27 = vpop.permute.xlu1 %6175  ;;  %5693 = vmatprep.subr.bf16.mxu1 %v7990_v44  ;;  %5699 = vmatprep.subr.bf16.mxu0 %v7990_v44  ;;  %v6181_v32 = vpop.permute.xlu0 %6180 }
 0x186   : > { %1631 = vrot.lane.b32.xlu0 %v6789_v22, %s6507_s14  ;;  %6205 = vrot.lane.b32.xlu1 %v6713_v50, %s6508_s19  ;;  %v6178_v28 = vunpack.i.h.bf16 %v6176_v27  ;;  %v6177_v29 = vunpack.i.l.bf16 %v6176_v27  ;;  %v6183_v36 = vunpack.i.h.bf16 %v6181_v32  ;;  %v6182_v37 = vunpack.i.l.bf16 %v6181_v32 }
 0x188   : > { %v6816_v38 = vpack.c.bf16 %v6178_v28, %v6178_v28  ;;  %v6818_v39 = vpack.c.bf16 %v6177_v29, %v6177_v29  ;;  %v6830_v41 = vpack.c.bf16 %v6183_v36, %v6183_v36  ;;  %v6832_v42 = vpack.c.bf16 %v6182_v37, %v6182_v37 }
 0x189   : > { %v1142_v33 = vpop.permute.xlu1 %1141  ;;  %v1240_v51 = vpop.permute.xlu0 %1239 }
 0x18a   : > { %1680 = vrot.lane.b32.xlu0 %v6802_v30, %s6507_s14  ;;  %1729 = vrot.lane.b32.xlu1 %v6804_v31, %s6507_s14  ;;  %v1147_v47 = vsel %vm897_vm3, %v1142_v33, 0  ;;  %v1245_v60 = vsel %vm897_vm3, %v1240_v51, 0 }
 0x18b   : > { %5684 = vmatmul.mubr.msk.bf16.vlgmr.msra.gmra.mxu1 %vm897_vm3, %v6726_v54  ;;  %5690 = vmatmul.mubr.msk.bf16.vlgmr.msra.gmra.mxu0 %vm897_vm3, %v6734_v56 }
 0x18c   : > { %5694 = vmatpush3.bf16.xpose.msra.mxu1 %v1049_v34  ;;  %5700 = vmatpush3.bf16.xpose.msra.mxu0 %v1098_v35 }
 0x18d   : > { %v1191_v40 = vpop.permute.xlu1 %1190  ;;  %5695 = vmatprep.mubr.msk.bf16.mxu1 %vm6505_vm2, %v7990_v44  ;;  %5701 = vmatprep.mubr.msk.bf16.mxu0 %vm6505_vm2, %v7990_v44 }
 0x18e   : > { %1827 = vrot.lane.b32.xlu1 %v6816_v38, %s6507_s14  ;;  %1778 = vrot.lane.b32.xlu0 %v6818_v39, %s6507_s14  ;;  %v1196_v48 = vsel %vm897_vm3, %v1191_v40, 0 }
 0x18f   : > { %5705 = vmatprep.subr.bf16.mxu1 %v7990_v44  ;;  %5711 = vmatprep.subr.bf16.mxu0 %v7990_v44 }
 0x191   : > { %v6186_v43 = vpop.permute.xlu1 %6185 }
 0x192   : > { %v6188_v45 = vunpack.i.h.bf16 %v6186_v43  ;;  %v6187_v46 = vunpack.i.l.bf16 %v6186_v43  ;;  %1925 = vrot.lane.b32.xlu1 %v6830_v41, %s6507_s14  ;;  %1876 = vrot.lane.b32.xlu0 %v6832_v42, %s6507_s14 }
 0x193   : > { %5696 = vmatmul.mubr.msk.bf16.vlgmr.msra.gmra.mxu1 %vm897_vm3, %v6724_v53  ;;  %5702 = vmatmul.mubr.msk.bf16.vlgmr.msra.gmra.mxu0 %vm897_vm3, %v6732_v55 }
 0x194   : > { %5706 = vmatpush3.bf16.xpose.msra.mxu1 %v1147_v47  ;;  %5712 = vmatpush3.bf16.xpose.msra.mxu0 %v1196_v48  ;;  %v6844_v49 = vpack.c.bf16 %v6188_v45, %v6188_v45  ;;  %v6846_v50 = vpack.c.bf16 %v6187_v46, %v6187_v46 }
 0x195   : > { %5707 = vmatprep.mubr.msk.bf16.mxu1 %vm6505_vm2, %v7990_v44  ;;  %5713 = vmatprep.mubr.msk.bf16.mxu0 %vm6505_vm2, %v7990_v44 }
 0x196   : > { %2023 = vrot.lane.b32.xlu1 %v6844_v49, %s6507_s14  ;;  %1974 = vrot.lane.b32.xlu0 %v6846_v50, %s6507_s14 }
 0x197   : > { %5717 = vmatprep.subr.bf16.mxu1 %v7990_v44  ;;  %5723 = vmatprep.subr.bf16.mxu0 %v7990_v44 }
 0x19b   : > { %5708 = vmatmul.mubr.msk.bf16.vlgmr.msra.gmra.mxu1 %vm897_vm3, %v6743_v58  ;;  %5714 = vmatmul.mubr.msk.bf16.vlgmr.msra.gmra.mxu0 %vm897_vm3, %v6749_v59 }
 0x19c   : > { %5718 = vmatpush3.bf16.xpose.msra.mxu1 %v1245_v60  ;;  %5719 = vmatprep.mubr.msk.bf16.mxu1 %vm6505_vm2, %v7990_v44 }
 0x19d   : > { %5729 = vmatprep.subr.bf16.mxu1 %v7990_v44  ;;  %5725 = vmatprep.mubr.msk.bf16.mxu0 %vm6505_vm2, %v7990_v44 }
 0x1a3   : > { %5720 = vmatmul.mubr.msk.bf16.vlgmr.msra.gmra.mxu1 %vm897_vm3, %v6741_v57 }
 0x1a4   : > { %5731 = vmatprep.mubr.msk.bf16.mxu1 %vm6505_vm2, %v7990_v44 }
 0x1e4   : > { %v1289_v61 = vpop.permute.xlu0 %1288  ;;  %v1338_v62 = vpop.permute.xlu1 %1337 }
 0x1e5   : > { %v1294_v1 = vsel %vm897_vm3, %v1289_v61, 0  ;;  %v1343_v2 = vsel %vm897_vm3, %v1338_v62, 0 }
 0x1e6   : > { %5724 = vmatpush3.bf16.xpose.msra.mxu0 %v1294_v1  ;;  %5730 = vmatpush3.bf16.xpose.msra.mxu1 %v1343_v2 }
 0x1e7   : > { %5735 = vmatprep.subr.bf16.mxu0 %v7990_v44  ;;  %5741 = vmatprep.subr.bf16.mxu1 %v7990_v44 }
 0x1e8   : > { %v6191_v3 = vpop.permute.xlu0 %6190  ;;  %v1387_v5 = vpop.permute.xlu1 %1386 }
 0x1e9   : > { %v6193_v6 = vunpack.i.h.bf16 %v6191_v3  ;;  %v6192_v7 = vunpack.i.l.bf16 %v6191_v3  ;;  %v1392_v18 = vsel %vm897_vm3, %v1387_v5, 0 }
 0x1eb   : > { %v6876_v8 = vpack.c.bf16 %v6193_v6, %v6193_v6  ;;  %v6878_v10 = vpack.c.bf16 %v6192_v7, %v6192_v7 }
 0x1ec   : > { %v1436_v11 = vpop.permute.xlu0 %1435  ;;  %v6196_v12 = vpop.permute.xlu1 %6195 }
 0x1ed   : > { %v1441_v13 = vsel %vm897_vm3, %v1436_v11, 0  ;;  %v6198_v16 = vunpack.i.h.bf16 %v6196_v12  ;;  %v6197_v17 = vunpack.i.l.bf16 %v6196_v12  ;;  %5726 = vmatmul.mubr.msk.bf16.vlgmr.msra.gmra.mxu0 %vm897_vm3, %v6754_v63  ;;  %5732 = vmatmul.mubr.msk.bf16.vlgmr.msra.gmra.mxu1 %vm897_vm3, %v6756_v0 }
 0x1ee   : > { %2121 = vrot.lane.b32.xlu1 %v6876_v8, %s6507_s14  ;;  %2072 = vrot.lane.b32.xlu0 %v6878_v10, %s6507_s14 }
 0x1ef   : > { %5736 = vmatpush3.bf16.xpose.msra.mxu0 %v1392_v18  ;;  %5742 = vmatpush3.bf16.xpose.msra.mxu1 %v1441_v13  ;;  %v6890_v20 = vpack.c.bf16 %v6198_v16, %v6198_v16  ;;  %v6892_v21 = vpack.c.bf16 %v6197_v17, %v6197_v17 }
 0x1f0   : > { %v1485_v23 = vpop.permute.xlu0 %1484  ;;  %v1534_v24 = vpop.permute.xlu1 %1533  ;;  %5737 = vmatprep.mubr.msk.bf16.mxu0 %vm6505_vm2, %v7990_v44  ;;  %5743 = vmatprep.mubr.msk.bf16.mxu1 %vm6505_vm2, %v7990_v44 }
 0x1f1   : > { %5747 = vmatprep.subr.bf16.mxu0 %v7990_v44  ;;  %5753 = vmatprep.subr.bf16.mxu1 %v7990_v44  ;;  %v1490_v25 = vsel %vm897_vm3, %v1485_v23, 0  ;;  %v1539_v26 = vsel %vm897_vm3, %v1534_v24, 0 }
 0x1f2   : > { %2219 = vrot.lane.b32.xlu1 %v6890_v20, %s6507_s14  ;;  %2170 = vrot.lane.b32.xlu0 %v6892_v21, %s6507_s14 }
 0x1f4   : > { %v6201_v27 = vpop.permute.xlu0 %6200  ;;  %v1583_v28 = vpop.permute.xlu1 %1582 }
 0x1f5   : > { %v6203_v29 = vunpack.i.h.bf16 %v6201_v27  ;;  %v6202_v32 = vunpack.i.l.bf16 %v6201_v27  ;;  %v1588_v46 = vsel %vm897_vm3, %v1583_v28, 0 }
 0x1f6   : > { %5738 = vmatmul.mubr.msk.bf16.vlgmr.msra.gmra.mxu0 %vm897_vm3, %v6762_v4  ;;  %5744 = vmatmul.mubr.msk.bf16.vlgmr.msra.gmra.mxu1 %vm897_vm3, %v6767_v9 }
 0x1f7   : > { %5748 = vmatpush3.bf16.xpose.msra.mxu0 %v1490_v25  ;;  %5754 = vmatpush3.bf16.xpose.msra.mxu1 %v1539_v26  ;;  %v6910_v33 = vpack.c.bf16 %v6203_v29, %v6203_v29  ;;  %v6912_v34 = vpack.c.bf16 %v6202_v32, %v6202_v32 }
 0x1f8   : > { %v6206_v35 = vpop.permute.xlu1 %6205  ;;  %5749 = vmatprep.mubr.msk.bf16.mxu0 %vm6505_vm2, %v7990_v44  ;;  %5755 = vmatprep.mubr.msk.bf16.mxu1 %vm6505_vm2, %v7990_v44  ;;  %v1632_v40 = vpop.permute.xlu0 %1631 }
 0x1f9   : > { %v6208_v36 = vunpack.i.h.bf16 %v6206_v35  ;;  %v6207_v37 = vunpack.i.l.bf16 %v6206_v35  ;;  %2317 = vrot.lane.b32.xlu1 %v6910_v33, %s6507_s14  ;;  %2268 = vrot.lane.b32.xlu0 %v6912_v34, %s6507_s14  ;;  %v1637_v47 = vsel %vm897_vm3, %v1632_v40, 0 }
 0x1fa   : > { %5759 = vmatprep.subr.bf16.mxu0 %v7990_v44  ;;  %5765 = vmatprep.subr.bf16.mxu1 %v7990_v44 }
 0x1fb   : > { %v6924_v43 = vpack.c.bf16 %v6208_v36, %v6208_v36  ;;  %v6926_v45 = vpack.c.bf16 %v6207_v37, %v6207_v37 }
 0x1fc   : > { %v1681_v48 = vpop.permute.xlu0 %1680  ;;  %v1730_v51 = vpop.permute.xlu1 %1729 }
 0x1fd   : > { %8004 = vst [vmem:[#allocation10_spill] sm:$0xff] %v6924_v43  ;;  %8005 = vst [vmem:[#allocation11_spill] sm:$0xff] %v6926_v45  ;;  %2415 = vrot.lane.b32.xlu1 %v6924_v43, %s6507_s14  ;;  %2366 = vrot.lane.b32.xlu0 %v6926_v45, %s6507_s14  ;;  %v1686_v60 = vsel %vm897_vm3, %v1681_v48, 0  ;;  %v1735_v61 = vsel %vm897_vm3, %v1730_v51, 0 }
 0x1fe   : > { %5750 = vmatmul.mubr.msk.bf16.vlgmr.msra.gmra.mxu0 %vm897_vm3, %v6774_v14  ;;  %5756 = vmatmul.mubr.msk.bf16.vlgmr.msra.gmra.mxu1 %vm897_vm3, %v6776_v15 }
 0x1ff   : > { %5760 = vmatpush3.bf16.xpose.msra.mxu0 %v1588_v46  ;;  %5766 = vmatpush3.bf16.xpose.msra.mxu1 %v1637_v47 }
 0x200   : > { %5761 = vmatprep.mubr.msk.bf16.mxu0 %vm6505_vm2, %v7990_v44  ;;  %5767 = vmatprep.mubr.msk.bf16.mxu1 %vm6505_vm2, %v7990_v44 }
 0x201   : > { %2879 = vrot.lane.b32.xlu1 %v6720_v52, %s6509_s21  ;;  %2928 = vrot.lane.b32.xlu0 %v6726_v54, %s6509_s21  ;;  %v1828_v52 = vpop.permute.xlu1 %1827 }
 0x202   : > { %5771 = vmatprep.subr.bf16.mxu0 %v7990_v44  ;;  %5777 = vmatprep.subr.bf16.mxu1 %v7990_v44  ;;  %v1833_v54 = vsel %vm897_vm3, %v1828_v52, 0 }
 0x205   : > { %2976 = vrot.lane.b32.xlu1 %v6734_v56, %s6509_s21  ;;  %3024 = vrot.lane.b32.xlu0 %v6724_v53, %s6509_s21  ;;  %v1779_v53 = vpop.permute.xlu0 %1778 }
 0x206   : > { %5762 = vmatmul.mubr.msk.bf16.vlgmr.msra.gmra.mxu0 %vm897_vm3, %v6783_v19  ;;  %5768 = vmatmul.mubr.msk.bf16.vlgmr.msra.gmra.mxu1 %vm897_vm3, %v6789_v22  ;;  %v1784_v56 = vsel %vm897_vm3, %v1779_v53, 0 }
 0x207   : > { %5772 = vmatpush3.bf16.xpose.msra.mxu0 %v1686_v60  ;;  %5778 = vmatpush3.bf16.xpose.msra.mxu1 %v1735_v61 }
 0x208   : > { %5773 = vmatprep.mubr.msk.bf16.mxu0 %vm6505_vm2, %v7990_v44  ;;  %5779 = vmatprep.mubr.msk.bf16.mxu1 %vm6505_vm2, %v7990_v44 }
 0x209   : > { %3072 = vrot.lane.b32.xlu1 %v6732_v55, %s6509_s21  ;;  %3120 = vrot.lane.b32.xlu0 %v6743_v58, %s6509_s21  ;;  %v1926_v55 = vpop.permute.xlu1 %1925 }
 0x20a   : > { %5783 = vmatprep.subr.bf16.mxu0 %v7990_v44  ;;  %5789 = vmatprep.subr.bf16.mxu1 %v7990_v44  ;;  %v1931_v58 = vsel %vm897_vm3, %v1926_v55, 0 }
 0x20d   : > { %3168 = vrot.lane.b32.xlu1 %v6749_v59, %s6509_s21  ;;  %3216 = vrot.lane.b32.xlu0 %v6741_v57, %s6509_s21  ;;  %v1877_v57 = vpop.permute.xlu0 %1876 }
 0x20e   : > { %5774 = vmatmul.mubr.msk.bf16.vlgmr.msra.gmra.mxu0 %vm897_vm3, %v6802_v30  ;;  %5780 = vmatmul.mubr.msk.bf16.vlgmr.msra.gmra.mxu1 %vm897_vm3, %v6804_v31  ;;  %v1882_v59 = vsel %vm897_vm3, %v1877_v57, 0 }
 0x20f   : > { %5784 = vmatpush3.bf16.xpose.msra.mxu0 %v1784_v56  ;;  %5790 = vmatpush3.bf16.xpose.msra.mxu1 %v1833_v54 }
 0x210   : > { %5785 = vmatprep.mubr.msk.bf16.mxu0 %vm6505_vm2, %v7990_v44  ;;  %5791 = vmatprep.mubr.msk.bf16.mxu1 %vm6505_vm2, %v7990_v44 }
 0x211   : > { %3264 = vrot.lane.b32.xlu1 %v6754_v63, %s6509_s21  ;;  %3312 = vrot.lane.b32.xlu0 %v6756_v0, %s6509_s21  ;;  %v2024_v63 = vpop.permute.xlu1 %2023  ;;  %v1975_v0 = vpop.permute.xlu0 %1974 }
 0x212   : > { %5801 = vmatprep.subr.bf16.mxu1 %v7990_v44  ;;  %5795 = vmatprep.subr.bf16.mxu0 %v7990_v44 }
 0x215   : > { %3360 = vrot.lane.b32.xlu1 %v6762_v4, %s6509_s21  ;;  %3408 = vrot.lane.b32.xlu0 %v6767_v9, %s6509_s21  ;;  %v2029_v4 = vsel %vm897_vm3, %v2024_v63, 0  ;;  %v1980_v9 = vsel %vm897_vm3, %v1975_v0, 0 }
 0x216   : > { %5792 = vmatmul.mubr.msk.bf16.vlgmr.msra.gmra.mxu1 %vm897_vm3, %v6816_v38  ;;  %5786 = vmatmul.mubr.msk.bf16.vlgmr.msra.gmra.mxu0 %vm897_vm3, %v6818_v39 }
 0x217   : > { %5796 = vmatpush3.bf16.xpose.msra.mxu0 %v1882_v59  ;;  %5802 = vmatpush3.bf16.xpose.msra.mxu1 %v1931_v58 }
 0x218   : > { %5797 = vmatprep.mubr.msk.bf16.mxu0 %vm6505_vm2, %v7990_v44  ;;  %5803 = vmatprep.mubr.msk.bf16.mxu1 %vm6505_vm2, %v7990_v44 }
 0x219   : > { %3456 = vrot.lane.b32.xlu1 %v6774_v14, %s6509_s21  ;;  %3600 = vrot.lane.b32.xlu0 %v6789_v22, %s6509_s21 }
 0x21a   : > { %5813 = vmatprep.subr.bf16.mxu1 %v7990_v44  ;;  %5807 = vmatprep.subr.bf16.mxu0 %v7990_v44 }
 0x21d   : > { %3552 = vrot.lane.b32.xlu1 %v6783_v19, %s6509_s21  ;;  %3696 = vrot.lane.b32.xlu0 %v6804_v31, %s6509_s21 }
 0x21e   : > { %5804 = vmatmul.mubr.msk.bf16.vlgmr.msra.gmra.mxu1 %vm897_vm3, %v6830_v41  ;;  %5798 = vmatmul.mubr.msk.bf16.vlgmr.msra.gmra.mxu0 %vm897_vm3, %v6832_v42 }
 0x21f   : > { %5808 = vmatpush3.bf16.xpose.msra.mxu0 %v1980_v9  ;;  %5814 = vmatpush3.bf16.xpose.msra.mxu1 %v2029_v4 }
 0x220   : > { %5809 = vmatprep.mubr.msk.bf16.mxu0 %vm6505_vm2, %v7990_v44  ;;  %5815 = vmatprep.mubr.msk.bf16.mxu1 %vm6505_vm2, %v7990_v44 }
 0x221   : > { %3648 = vrot.lane.b32.xlu1 %v6802_v30, %s6509_s21  ;;  %3792 = vrot.lane.b32.xlu0 %v6816_v38, %s6509_s21 }
 0x222   : > { %5819 = vmatprep.subr.bf16.mxu0 %v7990_v44  ;;  %5825 = vmatprep.subr.bf16.mxu1 %v7990_v44 }
 0x225   : > { %3744 = vrot.lane.b32.xlu1 %v6818_v39, %s6509_s21  ;;  %3504 = vrot.lane.b32.xlu0 %v6776_v15, %s6509_s21 }
 0x226   : > { %5816 = vmatmul.mubr.msk.bf16.vlgmr.msra.gmra.mxu1 %vm897_vm3, %v6844_v49  ;;  %5810 = vmatmul.mubr.msk.bf16.vlgmr.msra.gmra.mxu0 %vm897_vm3, %v6846_v50 }
 0x227   : > { %5821 = vmatprep.mubr.msk.bf16.mxu0 %vm6505_vm2, %v7990_v44  ;;  %5827 = vmatprep.mubr.msk.bf16.mxu1 %vm6505_vm2, %v7990_v44 }
 0x229   : > { %3840 = vrot.lane.b32.xlu1 %v6832_v42, %s6509_s21  ;;  %3888 = vrot.lane.b32.xlu0 %v6830_v41, %s6509_s21 }
 0x22d   : > { %3936 = vrot.lane.b32.xlu1 %v6846_v50, %s6509_s21  ;;  %3984 = vrot.lane.b32.xlu0 %v6844_v49, %s6509_s21 }
 0x231   : > { %4032 = vrot.lane.b32.xlu1 %v6878_v10, %s6509_s21 }
 0x243   : > { %v938_v14 = vpop.f32.mrf.mxu1 }
 0x244   : > { %v7052_v41 = vmul.f32 0.35355338, %v938_v14 }
 0x245   : > { %v5679_v15 = vpop.f32.mrf.mxu1 }
 0x246   : > { %v2495_v5 = vsel %vm897_vm3, %v7052_v41, -inf }
 0x247   : > { %v941_v19 = vpop.f32.mrf.mxu1 }
 0x249   : > { %v5680_v22 = vpop.f32.mrf.mxu1 }
 0x24b   : > { %v987_v30 = vpop.f32.mrf.mxu1  ;;  %v1036_v31 = vpop.f32.mrf.mxu0 }
 0x24c   : > { %v7050_v38 = vmul.f32 0.35355338, %v1036_v31  ;;  %v7056_v1 = vmul.f32 0.35355338, %v987_v30 }
 0x24d   : > { %v5685_v39 = vpop.f32.mrf.mxu1  ;;  %v5691_v42 = vpop.f32.mrf.mxu0 }
 0x24e   : > { %v2501_v50 = vsel %vm897_vm3, %v7050_v38, -inf  ;;  %v2498_v13 = vsel %vm897_vm3, %v7056_v1, -inf }
 0x24f   : > { %v990_v62 = vpop.f32.mrf.mxu1  ;;  %v1039_v49 = vpop.f32.mrf.mxu0  ;;  %2502 = vmax.xlane.f32.xlu0 %v2501_v50 }
 0x251   : > { %v5686_v2 = vpop.f32.mrf.mxu1  ;;  %v5692_v3 = vpop.f32.mrf.mxu0 }
 0x253   : > { %v1085_v6 = vpop.f32.mrf.mxu1  ;;  %v1134_v7 = vpop.f32.mrf.mxu0  ;;  %2496 = vmax.xlane.f32.xlu0 %v2495_v5 }
 0x254   : > { %v7060_v11 = vmul.f32 0.35355338, %v1085_v6  ;;  %v7062_v12 = vmul.f32 0.35355338, %v1134_v7 }
 0x255   : > { %v5697_v16 = vpop.f32.mrf.mxu1  ;;  %v5703_v17 = vpop.f32.mrf.mxu0  ;;  %2499 = vmax.xlane.f32.xlu1 %v2498_v13 }
 0x256   : > { %v2504_v18 = vsel %vm897_vm3, %v7060_v11, -inf  ;;  %v2507_v25 = vsel %vm897_vm3, %v7062_v12, -inf }
 0x257   : > { %v1088_v23 = vpop.f32.mrf.mxu1  ;;  %v1137_v24 = vpop.f32.mrf.mxu0  ;;  %2505 = vmax.xlane.f32.xlu0 %v2504_v18 }
 0x259   : > { %v5698_v26 = vpop.f32.mrf.mxu1  ;;  %v5704_v27 = vpop.f32.mrf.mxu0  ;;  %2508 = vmax.xlane.f32.xlu1 %v2507_v25 }
 0x25b   : > { %v1183_v28 = vpop.f32.mrf.mxu1  ;;  %v1232_v29 = vpop.f32.mrf.mxu0 }
 0x25c   : > { %v7070_v32 = vmul.f32 0.35355338, %v1183_v28  ;;  %v7072_v35 = vmul.f32 0.35355338, %v1232_v29 }
 0x25d   : > { %v5709_v36 = vpop.f32.mrf.mxu1  ;;  %v5715_v37 = vpop.f32.mrf.mxu0 }
 0x25e   : > { %v2513_v40 = vsel %vm897_vm3, %v7072_v35, -inf  ;;  %v2510_v46 = vsel %vm897_vm3, %v7070_v32, -inf }
 0x25f   : > { %v1186_v47 = vpop.f32.mrf.mxu1  ;;  %v1235_v48 = vpop.f32.mrf.mxu0  ;;  %2514 = vmax.xlane.f32.xlu1 %v2513_v40  ;;  %2511 = vmax.xlane.f32.xlu0 %v2510_v46 }
 0x260   : > { %v2122_v51 = vpop.permute.xlu1 %2121  ;;  %v2073_v60 = vpop.permute.xlu0 %2072 }
 0x261   : > { %v2127_v61 = vsel %vm897_vm3, %v2122_v51, 0  ;;  %v2078_v52 = vsel %vm897_vm3, %v2073_v60, 0  ;;  %v5710_v53 = vpop.f32.mrf.mxu1  ;;  %v5716_v54 = vpop.f32.mrf.mxu0 }
 0x262   : > { %5820 = vmatpush3.bf16.xpose.msra.mxu0 %v2078_v52  ;;  %5826 = vmatpush3.bf16.xpose.msra.mxu1 %v2127_v61 }
 0x263   : > { %v1281_v56 = vpop.f32.mrf.mxu1  ;;  %5831 = vmatprep.subr.bf16.mxu0 %v7990_v44  ;;  %5837 = vmatprep.subr.bf16.mxu1 %v7990_v44 }
 0x264   : > { %v7082_v55 = vmul.f32 0.35355338, %v1281_v56  ;;  %v2220_v58 = vpop.permute.xlu1 %2219  ;;  %v2171_v59 = vpop.permute.xlu0 %2170 }
 0x265   : > { %v5721_v57 = vpop.f32.mrf.mxu1  ;;  %v2225_v4 = vsel %vm897_vm3, %v2220_v58, 0  ;;  %v2176_v9 = vsel %vm897_vm3, %v2171_v59, 0 }
 0x266   : > { %v2516_v63 = vsel %vm897_vm3, %v7082_v55, -inf }
 0x267   : > { %v1284_v0 = vpop.f32.mrf.mxu1  ;;  %2517 = vmax.xlane.f32.xlu0 %v2516_v63 }
 0x269   : > { %v5722_v14 = vpop.f32.mrf.mxu1  ;;  %5822 = vmatmul.mubr.msk.bf16.vlgmr.msra.gmra.mxu0 %vm897_vm3, %v6878_v10  ;;  %5828 = vmatmul.mubr.msk.bf16.vlgmr.msra.gmra.mxu1 %vm897_vm3, %v6876_v8 }
 0x26a   : > { %5832 = vmatpush3.bf16.xpose.msra.mxu0 %v2176_v9  ;;  %5838 = vmatpush3.bf16.xpose.msra.mxu1 %v2225_v4 }
 0x26b   : > { %5839 = vmatprep.mubr.msk.bf16.mxu1 %vm6505_vm2, %v7990_v44  ;;  %5833 = vmatprep.mubr.msk.bf16.mxu0 %vm6505_vm2, %v7990_v44  ;;  %v2318_v15 = vpop.permute.xlu1 %2317  ;;  %v2269_v19 = vpop.permute.xlu0 %2268 }
 0x26c   : > { %5843 = vmatprep.subr.bf16.mxu0 %v7990_v44  ;;  %5849 = vmatprep.subr.bf16.mxu1 %v7990_v44  ;;  %v2323_v22 = vsel %vm897_vm3, %v2318_v15, 0  ;;  %v2274_v10 = vsel %vm897_vm3, %v2269_v19, 0 }
 0x26f   : > { %v2416_v30 = vpop.permute.xlu1 %2415  ;;  %v2367_v31 = vpop.permute.xlu0 %2366 }
 0x270   : > { %v2421_v39 = vsel %vm897_vm3, %v2416_v30, 0  ;;  %v2372_v42 = vsel %vm897_vm3, %v2367_v31, 0 }
 0x271   : > { %5834 = vmatmul.mubr.msk.bf16.vlgmr.msra.gmra.mxu0 %vm897_vm3, %v6892_v21  ;;  %5840 = vmatmul.mubr.msk.bf16.vlgmr.msra.gmra.mxu1 %vm897_vm3, %v6890_v20 }
 0x272   : > { %5844 = vmatpush3.bf16.xpose.msra.mxu0 %v2274_v10  ;;  %5850 = vmatpush3.bf16.xpose.msra.mxu1 %v2323_v22 }
 0x273   : > { %5851 = vmatprep.mubr.msk.bf16.mxu1 %vm6505_vm2, %v7990_v44  ;;  %5845 = vmatprep.mubr.msk.bf16.mxu0 %vm6505_vm2, %v7990_v44  ;;  %v2880_v50 = vpop.permute.xlu1 %2879  ;;  %v2929_v62 = vpop.permute.xlu0 %2928 }
 0x274   : > { %5855 = vmatprep.subr.bf16.mxu0 %v7990_v44  ;;  %5861 = vmatprep.subr.bf16.mxu1 %v7990_v44  ;;  %v2886_v49 = vsel %vm2884_vm4, %v2880_v50, 0  ;;  %v2934_v2 = vsel %vm2884_vm4, %v2929_v62, 0 }
 0x277   : > { %v7134_v3 = vpop.permute.xlu1 %2976  ;;  %v7136_v5 = vpop.permute.xlu0 %3024 }
 0x279   : > { %5846 = vmatmul.mubr.msk.bf16.vlgmr.msra.gmra.mxu0 %vm897_vm3, %v6912_v34  ;;  %5852 = vmatmul.mubr.msk.bf16.vlgmr.msra.gmra.mxu1 %vm897_vm3, %v6910_v33 }
 0x27a   : > { %5856 = vmatpush3.bf16.xpose.msra.mxu0 %v2372_v42  ;;  %5862 = vmatpush3.bf16.xpose.msra.mxu1 %v2421_v39 }
 0x27b   : > { %5863 = vmatprep.mubr.msk.bf16.mxu1 %vm6505_vm2, %v7990_v44  ;;  %5857 = vmatprep.mubr.msk.bf16.mxu0 %vm6505_vm2, %v7990_v44  ;;  %v7138_v6 = vpop.permute.xlu1 %3072  ;;  %v7140_v7 = vpop.permute.xlu0 %3120 }
 0x27c   : > { %5867 = vmatprep.subr.bf16.mxu0 %v7990_v44  ;;  %5873 = vmatprep.subr.bf16.mxu1 %v7990_v44 }
 0x27f   : > { %v7146_v25 = vpop.permute.xlu1 %3168  ;;  %v7152_v36 = vpop.permute.xlu0 %3216 }
 0x281   : > { %5858 = vmatmul.mubr.msk.bf16.vlgmr.msra.gmra.mxu0 %vm897_vm3, %v6926_v45  ;;  %5864 = vmatmul.mubr.msk.bf16.vlgmr.msra.gmra.mxu1 %vm897_vm3, %v6924_v43 }
 0x282   : > { %5868 = vmatpush3.bf16.msra.mxu0 %v2886_v49  ;;  %5874 = vmatpush3.bf16.msra.mxu1 %v2934_v2 }
 0x283   : > { %5875 = vmatprep.mubr.msk.bf16.mxu1 %vm6505_vm2, %v7990_v44  ;;  %5885 = vmatprep.subr.bf16.mxu1 %v7990_v44  ;;  %v7154_v48 = vpop.permute.xlu1 %3264  ;;  %v7160_v53 = vpop.permute.xlu0 %3312 }
 0x284   : > { %5869 = vmatprep.mubr.msk.bf16.mxu0 %vm6505_vm2, %v7990_v44  ;;  %5879 = vmatprep.subr.bf16.mxu0 %v7990_v44 }
 0x287   : > { %v7166_v0 = vpop.permute.xlu1 %3360  ;;  %v7168_v14 = vpop.permute.xlu0 %3408 }
 0x28b   : > { %v7178_v50 = vpop.permute.xlu1 %3456  ;;  %v7180_v2 = vpop.permute.xlu0 %3600 }
 0x2ad   : > { %v1330_v13 = vpop.f32.mrf.mxu0  ;;  %v1379_v16 = vpop.f32.mrf.mxu1 }
 0x2ae   : > { %v7142_v17 = vmul.f32 0.35355338, %v1330_v13  ;;  %v7144_v18 = vmul.f32 0.35355338, %v1379_v16 }
 0x2af   : > { %v5727_v23 = vpop.f32.mrf.mxu0  ;;  %v5733_v24 = vpop.f32.mrf.mxu1 }
 0x2b0   : > { %v2519_v26 = vsel %vm897_vm3, %v7142_v17, -inf  ;;  %v2522_v27 = vsel %vm897_vm3, %v7144_v18, -inf }
 0x2b1   : > { %v1333_v28 = vpop.f32.mrf.mxu0  ;;  %v1382_v29 = vpop.f32.mrf.mxu1  ;;  %2520 = vmax.xlane.f32.xlu1 %v2519_v26  ;;  %2523 = vmax.xlane.f32.xlu0 %v2522_v27 }
 0x2b2   : > { %v7186_v28 = vpop.permute.xlu1 %3552 }
 0x2b3   : > { %v5728_v37 = vpop.f32.mrf.mxu0  ;;  %v5734_v40 = vpop.f32.mrf.mxu1 }
 0x2b6   : > { %v1428_v46 = vpop.f32.mrf.mxu0  ;;  %v1477_v47 = vpop.f32.mrf.mxu1 }
 0x2b7   : > { %v7156_v51 = vmul.f32 0.35355338, %v1428_v46  ;;  %v7158_v60 = vmul.f32 0.35355338, %v1477_v47  ;;  %v7192_v47 = vpop.permute.xlu0 %3696 }
 0x2b8   : > { %v5739_v61 = vpop.f32.mrf.mxu0  ;;  %v5745_v52 = vpop.f32.mrf.mxu1 }
 0x2b9   : > { %v2525_v54 = vsel %vm897_vm3, %v7156_v51, -inf  ;;  %v2528_v56 = vsel %vm897_vm3, %v7158_v60, -inf }
 0x2ba   : > { %v1431_v57 = vpop.f32.mrf.mxu0  ;;  %v1480_v58 = vpop.f32.mrf.mxu1  ;;  %2526 = vmax.xlane.f32.xlu1 %v2525_v54  ;;  %2529 = vmax.xlane.f32.xlu0 %v2528_v56 }
 0x2bb   : > { %v7194_v57 = vpop.permute.xlu1 %3648 }
 0x2bc   : > { %v5740_v59 = vpop.f32.mrf.mxu0  ;;  %v5746_v63 = vpop.f32.mrf.mxu1 }
 0x2bd   : > { %v7196_v63 = vpop.permute.xlu0 %3792 }
 0x2be   : > { %v1526_v4 = vpop.f32.mrf.mxu0  ;;  %v1575_v9 = vpop.f32.mrf.mxu1  ;;  %8006 = vst [vmem:[#allocation12_spill] sm:$0xff] %v7196_v63 }
 0x2bf   : > { %v7170_v15 = vmul.f32 0.35355338, %v1526_v4  ;;  %v7172_v19 = vmul.f32 0.35355338, %v1575_v9 }
 0x2c0   : > { %v5751_v22 = vpop.f32.mrf.mxu0  ;;  %v5757_v10 = vpop.f32.mrf.mxu1 }
 0x2c1   : > { %v2531_v30 = vsel %vm897_vm3, %v7170_v15, -inf  ;;  %v2534_v31 = vsel %vm897_vm3, %v7172_v19, -inf }
 0x2c2   : > { %v1529_v39 = vpop.f32.mrf.mxu0  ;;  %v1578_v42 = vpop.f32.mrf.mxu1  ;;  %2532 = vmax.xlane.f32.xlu1 %v2531_v30  ;;  %2535 = vmax.xlane.f32.xlu0 %v2534_v31 }
 0x2c3   : > { %v7198_v30 = vpop.permute.xlu1 %3744  ;;  %v7200_v42 = vpop.permute.xlu0 %3504 }
 0x2c4   : > { %v5752_v62 = vpop.f32.mrf.mxu0  ;;  %v5758_v49 = vpop.f32.mrf.mxu1  ;;  %8007 = vst [vmem:[#allocation13_spill] sm:$0xff] %v7198_v30 }
 0x2c6   : > { %v1624_v13 = vpop.f32.mrf.mxu0  ;;  %v1673_v16 = vpop.f32.mrf.mxu1 }
 0x2c7   : > { %v7182_v23 = vmul.f32 0.35355338, %v1624_v13  ;;  %v7184_v24 = vmul.f32 0.35355338, %v1673_v16 }
 0x2c8   : > { %v5763_v26 = vpop.f32.mrf.mxu0  ;;  %v5769_v27 = vpop.f32.mrf.mxu1 }
 0x2c9   : > { %v2537_v29 = vsel %vm897_vm3, %v7182_v23, -inf  ;;  %v2540_v37 = vsel %vm897_vm3, %v7184_v24, -inf  ;;  %v7202_v26 = vpop.permute.xlu1 %3840 }
 0x2ca   : > { %v1627_v40 = vpop.f32.mrf.mxu0  ;;  %v1676_v46 = vpop.f32.mrf.mxu1  ;;  %2538 = vmax.xlane.f32.xlu1 %v2537_v29  ;;  %2541 = vmax.xlane.f32.xlu0 %v2540_v37  ;;  %8008 = vst [vmem:[#allocation14_spill] sm:$0xff] %v7202_v26 }
 0x2cb   : > { %v7206_v37 = vpop.permute.xlu0 %3888 }
 0x2cc   : > { %v5764_v61 = vpop.f32.mrf.mxu0  ;;  %v5770_v52 = vpop.f32.mrf.mxu1  ;;  %8009 = vst [vmem:[#allocation15_spill] sm:$0xff] %v7206_v37 }
 0x2ce   : > { %v1722_v54 = vpop.f32.mrf.mxu0  ;;  %v1771_v56 = vpop.f32.mrf.mxu1 }
 0x2d0   : > { %v5775_v58 = vpop.f32.mrf.mxu0  ;;  %v5781_v59 = vpop.f32.mrf.mxu1 }
 0x2d1   : > { %v7214_v58 = vpop.permute.xlu1 %3936 }
 0x2d2   : > { %v1725_v4 = vpop.f32.mrf.mxu0  ;;  %v1774_v9 = vpop.f32.mrf.mxu1  ;;  %8010 = vst [vmem:[#allocation16_spill] sm:$0xff] %v7214_v58 }
 0x2d4   : > { %v5776_v22 = vpop.f32.mrf.mxu0  ;;  %v5782_v10 = vpop.f32.mrf.mxu1 }
 0x2d6   : > { %v1820_v31 = vpop.f32.mrf.mxu0  ;;  %v1869_v39 = vpop.f32.mrf.mxu1 }
 0x2d8   : > { %v5787_v62 = vpop.f32.mrf.mxu0  ;;  %v5793_v49 = vpop.f32.mrf.mxu1 }
 0x2d9   : > { %v7220_v49 = vpop.permute.xlu1 %4032 }
 0x2da   : > { %v1823_v13 = vpop.f32.mrf.mxu0  ;;  %v1872_v16 = vpop.f32.mrf.mxu1  ;;  %8012 = vst [vmem:[#allocation18_spill] sm:$0xff] %v7220_v49 }
 0x2db   : > { %4128 = vrot.lane.b32.xlu1 %v6892_v21, %s6509_s21  ;;  %v7216_v21 = vpop.permute.xlu0 %3984 }
 0x2dc   : > { %v5788_v27 = vpop.f32.mrf.mxu0  ;;  %v5794_v29 = vpop.f32.mrf.mxu1  ;;  %8011 = vst [vmem:[#allocation17_spill] sm:$0xff] %v7216_v21 }
 0x2de   : > { %v7208_v40 = vpop.f32.mrf.mxu0  ;;  %v1967_v46 = vpop.f32.mrf.mxu1 }
 0x2df   : > { %4176 = vrot.lane.b32.xlu1 %v6890_v20, %s6509_s21  ;;  %v2503_v13 = vpop.xlane.xlu0 %2502  ;;  %v2500_v29 = vpop.xlane.xlu1 %2499 }
 0x2e0   : > { %v5805_v61 = vpop.f32.mrf.mxu1  ;;  %4080 = vrot.lane.b32.xlu0 %v6876_v8, %s6509_s21  ;;  %v5799_v52 = vpop.f32.mrf.mxu0 }
 0x2e2   : > { %v1921_v59 = vpop.f32.mrf.mxu0  ;;  %v1970_v4 = vpop.f32.mrf.mxu1 }
 0x2e3   : > { %v2497_v52 = vpop.xlane.xlu0 %2496  ;;  %v2592_v59 = vsub.f32 %v7056_v1, %v2500_v29  ;;  %v2593_v4 = vsub.f32 %v7050_v38, %v2503_v13  ;;  %v7231_v1 = vmul.f32 0.35355338, %v1869_v39  ;;  %v7246_v13 = vmul.f32 0.35355338, %v1967_v46 }
 0x2e4   : > { %v5800_v9 = vpop.f32.mrf.mxu0  ;;  %v5806_v22 = vpop.f32.mrf.mxu1  ;;  %v2591_v58 = vsub.f32 %v7052_v41, %v2497_v52 }
 0x2e5   : > { %v2625_v9 = vmul.f32 1.442695, %v2592_v59  ;;  %v2627_v21 = vmul.f32 1.442695, %v2593_v4 }
 0x2e6   : > { %v7218_v10 = vpop.f32.mrf.mxu0  ;;  %v2065_v62 = vpop.f32.mrf.mxu1 }
 0x2e7   : > { %v2506_v22 = vpop.xlane.xlu0 %2505  ;;  %6283 = vpow2.f32 %v2625_v9  ;;  %v2558_v9 = vsel %vm897_vm3, %v7246_v13, -inf }
 0x2e8   : > { %v5817_v20 = vpop.f32.mrf.mxu1  ;;  %v5811_v16 = vpop.f32.mrf.mxu0  ;;  %v2594_v49 = vsub.f32 %v7060_v11, %v2506_v22  ;;  %6285 = vpow2.f32 %v2627_v21 }
 0x2e9   : > { %v2623_v20 = vmul.f32 1.442695, %v2591_v58  ;;  %v7226_v16 = vmul.f32 0.35355338, %v1771_v56  ;;  %v7236_v56 = vmul.f32 0.35355338, %v1820_v31 }
 0x2ea   : > { %v2068_v27 = vpop.f32.mrf.mxu1  ;;  %v2019_v8 = vpop.f32.mrf.mxu0 }
 0x2eb   : > { %v2629_v27 = vmul.f32 1.442695, %v2594_v49  ;;  %v2509_v8 = vpop.xlane.xlu1 %2508  ;;  %6287 = vpow2.f32 %v2623_v20  ;;  %v2546_v11 = vsel %vm897_vm3, %v7226_v16, -inf  ;;  %v2552_v49 = vsel %vm897_vm3, %v7231_v1, -inf }
 0x2ec   : > { %v5818_v61 = vpop.f32.mrf.mxu1  ;;  %v5812_v44 = vpop.f32.mrf.mxu0  ;;  %v2595_v38 = vsub.f32 %v7062_v12, %v2509_v8  ;;  %v7264_v20 = vmul.f32 0.35355338, %v2065_v62 }
 0x2ed   : > { %v2512_v61 = vpop.xlane.xlu0 %2511  ;;  %v7228_v44 = vmul.f32 0.35355338, %v1722_v54  ;;  %6289 = vpow2.f32 %v2629_v27 }
 0x2ee   : > { %v2596_v41 = vsub.f32 %v7070_v32, %v2512_v61  ;;  %v2631_v58 = vmul.f32 1.442695, %v2595_v38  ;;  %v2549_v32 = vsel %vm897_vm3, %v7236_v56, -inf }
 0x2ef   : > { %v2543_v54 = vsel %vm897_vm3, %v7228_v44, -inf  ;;  %v2515_v39 = vpop.xlane.xlu1 %2514 }
 0x2f0   : > { %v2633_v21 = vmul.f32 1.442695, %v2596_v41  ;;  %6291 = vpow2.f32 %v2631_v58  ;;  %v2597_v31 = vsub.f32 %v7072_v35, %v2515_v39  ;;  %v7262_v35 = vmul.f32 0.35355338, %v7208_v40 }
 0x2f1   : > { %v2564_v40 = vsel %vm897_vm3, %v7264_v20, -inf  ;;  %v2518_v62 = vpop.xlane.xlu0 %2517 }
 0x2f2   : > { %6293 = vpow2.f32 %v2633_v21  ;;  %v2635_v4 = vmul.f32 1.442695, %v2597_v31  ;;  %v2555_v38 = vsel %vm897_vm3, %v7262_v35, -inf }
 0x2f4   : > { %v7242_v12 = vpop.eup %6283  ;;  %6295 = vpow2.f32 %v2635_v4 }
 0x2f5   : > { %v2690_v29 = vsel %vm897_vm3, %v7242_v12, 0.0  ;;  %v7251_v52 = vpop.eup %6285 }
 0x2f6   : > { %v2693_v46 = vsel %vm897_vm3, %v7251_v52, 0.0 }
 0x2f8   : > { %v7253_v59 = vpop.eup %6287 }
 0x2f9   : > { %v2687_v27 = vsel %vm897_vm3, %v7253_v59, 0.0 }
 0x2fa   : > { %v7259_v22 = vpop.eup %6289 }
 0x2fb   : > { %v2696_v8 = vsel %vm897_vm3, %v7259_v22, 0.0 }
 0x2fd   : > { %v7270_v61 = vpop.eup %6291 }
 0x2fe   : > { %v2699_v58 = vsel %vm897_vm3, %v7270_v61, 0.0 }
 0x2ff   : > { %2547 = vmax.xlane.f32.xlu0 %v2546_v11  ;;  %v7276_v41 = vpop.eup %6293  ;;  %v7279_v11 = vmul.f32 0.35355338, %v7218_v10 }
 0x300   : > { %v2702_v21 = vsel %vm897_vm3, %v7276_v41, 0.0 }
 0x301   : > { %v7288_v39 = vpop.eup %6295 }
 0x302   : > { %v2705_v10 = vsel %vm897_vm3, %v7288_v39, 0.0 }
 0x303   : > { %2544 = vmax.xlane.f32.xlu1 %v2543_v54  ;;  %2553 = vmax.xlane.f32.xlu0 %v2552_v49  ;;  %v2598_v54 = vsub.f32 %v7082_v55, %v2518_v62  ;;  %v2561_v49 = vsel %vm897_vm3, %v7279_v11, -inf }
 0x307   : > { %2691 = vadd.xlane.f32.xlu0 %v2690_v29  ;;  %2550 = vmax.xlane.f32.xlu1 %v2549_v32  ;;  %v2637_v32 = vmul.f32 1.442695, %v2598_v54 }
 0x309   : > { %6297 = vpow2.f32 %v2637_v32 }
 0x30b   : > { %2559 = vmax.xlane.f32.xlu0 %v2558_v9  ;;  %2694 = vadd.xlane.f32.xlu1 %v2693_v46 }
 0x30f   : > { %2688 = vadd.xlane.f32.xlu1 %v2687_v27  ;;  %2697 = vadd.xlane.f32.xlu0 %v2696_v8 }
 0x313   : > { %2556 = vmax.xlane.f32.xlu1 %v2555_v38  ;;  %2565 = vmax.xlane.f32.xlu0 %v2564_v40 }
 0x316   : > { %v7300_v38 = vpop.eup %6297 }
 0x317   : > { %2700 = vadd.xlane.f32.xlu1 %v2699_v58  ;;  %2703 = vadd.xlane.f32.xlu0 %v2702_v21  ;;  %v2708_v54 = vsel %vm897_vm3, %v7300_v38, 0.0 }
 0x31b   : > { %2562 = vmax.xlane.f32.xlu1 %v2561_v49 }
 0x31f   : > { %2706 = vadd.xlane.f32.xlu1 %v2705_v10 }
 0x329   : > { %v2114_v31 = vpop.f32.mrf.mxu0  ;;  %v2163_v29 = vpop.f32.mrf.mxu1 }
 0x32a   : > { %v7292_v4 = vmul.f32 0.35355338, %v2114_v31  ;;  %v7294_v9 = vmul.f32 0.35355338, %v2163_v29 }
 0x32b   : > { %v5823_v46 = vpop.f32.mrf.mxu0  ;;  %v5829_v55 = vpop.f32.mrf.mxu1 }
 0x32c   : > { %v2567_v27 = vsel %vm897_vm3, %v7292_v4, -inf  ;;  %v2570_v8 = vsel %vm897_vm3, %v7294_v9, -inf }
 0x32d   : > { %v2117_v40 = vpop.f32.mrf.mxu0  ;;  %v2166_v62 = vpop.f32.mrf.mxu1  ;;  %2568 = vmax.xlane.f32.xlu1 %v2567_v27  ;;  %2571 = vmax.xlane.f32.xlu0 %v2570_v8 }
 0x32f   : > { %v5824_v58 = vpop.f32.mrf.mxu0  ;;  %v5830_v21 = vpop.f32.mrf.mxu1 }
 0x331   : > { %v2212_v49 = vpop.f32.mrf.mxu0  ;;  %v2261_v32 = vpop.f32.mrf.mxu1  ;;  %2709 = vadd.xlane.f32.xlu0 %v2708_v54 }
 0x332   : > { %v7304_v10 = vmul.f32 0.35355338, %v2212_v49  ;;  %v7306_v31 = vmul.f32 0.35355338, %v2261_v32 }
 0x333   : > { %v5835_v29 = vpop.f32.mrf.mxu0  ;;  %v5841_v46 = vpop.f32.mrf.mxu1 }
 0x334   : > { %v2573_v55 = vsel %vm897_vm3, %v7304_v10, -inf  ;;  %v2576_v27 = vsel %vm897_vm3, %v7306_v31, -inf }
 0x335   : > { %v2215_v8 = vpop.f32.mrf.mxu0  ;;  %v2264_v40 = vpop.f32.mrf.mxu1  ;;  %2574 = vmax.xlane.f32.xlu1 %v2573_v55  ;;  %2577 = vmax.xlane.f32.xlu0 %v2576_v27 }
 0x337   : > { %v5836_v62 = vpop.f32.mrf.mxu0  ;;  %v5842_v58 = vpop.f32.mrf.mxu1 }
 0x339   : > { %v2310_v21 = vpop.f32.mrf.mxu0  ;;  %v2359_v54 = vpop.f32.mrf.mxu1 }
 0x33a   : > { %v7312_v49 = vmul.f32 0.35355338, %v2310_v21  ;;  %v7314_v32 = vmul.f32 0.35355338, %v2359_v54  ;;  %v2521_v29 = vpop.xlane.xlu1 %2520  ;;  %v2524_v46 = vpop.xlane.xlu0 %2523 }
 0x33b   : > { %v5853_v26 = vpop.f32.mrf.mxu1  ;;  %v2599_v37 = vsub.f32 %v7142_v17, %v2521_v29  ;;  %v5847_v30 = vpop.f32.mrf.mxu0  ;;  %v2600_v63 = vsub.f32 %v7144_v18, %v2524_v46 }
 0x33c   : > { %v2579_v55 = vsel %vm897_vm3, %v7312_v49, -inf  ;;  %v2582_v27 = vsel %vm897_vm3, %v7314_v32, -inf }
 0x33d   : > { %v2639_v8 = vmul.f32 1.442695, %v2599_v37  ;;  %v2641_v40 = vmul.f32 1.442695, %v2600_v63  ;;  %v2313_v62 = vpop.f32.mrf.mxu0  ;;  %v2362_v58 = vpop.f32.mrf.mxu1  ;;  %2580 = vmax.xlane.f32.xlu1 %v2579_v55  ;;  %2583 = vmax.xlane.f32.xlu0 %v2582_v27 }
 0x33f   : > { %6299 = vpow2.f32 %v2639_v8  ;;  %v5848_v21 = vpop.f32.mrf.mxu0  ;;  %v5854_v26 = vpop.f32.mrf.mxu1 }
 0x340   : > { %6301 = vpow2.f32 %v2641_v40 }
 0x341   : > { %v2408_v17 = vpop.f32.mrf.mxu0  ;;  %v2457_v30 = vpop.f32.mrf.mxu1 }
 0x342   : > { %v7322_v54 = vmul.f32 0.35355338, %v2408_v17  ;;  %v7324_v18 = vmul.f32 0.35355338, %v2457_v30 }
 0x343   : > { %v5865_v29 = vpop.f32.mrf.mxu1  ;;  %v2527_v46 = vpop.xlane.xlu1 %2526 }
 0x344   : > { %v2601_v45 = vsub.f32 %v7156_v51, %v2527_v46  ;;  %v5859_v37 = vpop.f32.mrf.mxu0  ;;  %v2530_v63 = vpop.xlane.xlu0 %2529  ;;  %v2585_v55 = vsel %vm897_vm3, %v7322_v54, -inf  ;;  %v2588_v27 = vsel %vm897_vm3, %v7324_v18, -inf }
 0x345   : > { %v2602_v8 = vsub.f32 %v7158_v60, %v2530_v63  ;;  %v2460_v40 = vpop.f32.mrf.mxu1  ;;  %2586 = vmax.xlane.f32.xlu1 %v2585_v55  ;;  %2589 = vmax.xlane.f32.xlu0 %v2588_v27 }
 0x346   : > { %v2643_v62 = vmul.f32 1.442695, %v2601_v45  ;;  %v2411_v58 = vpop.f32.mrf.mxu0 }
 0x347   : > { %v2645_v21 = vmul.f32 1.442695, %v2602_v8  ;;  %v5866_v26 = vpop.f32.mrf.mxu1 }
 0x348   : > { %6303 = vpow2.f32 %v2643_v62  ;;  %v5860_v17 = vpop.f32.mrf.mxu0 }
 0x349   : > { %6305 = vpow2.f32 %v2645_v21 }
 0x34b   : > { %v2533_v51 = vpop.xlane.xlu1 %2532  ;;  %v2536_v30 = vpop.xlane.xlu0 %2535 }
 0x34c   : > { %v7332_v29 = vpop.eup %6299  ;;  %v2603_v46 = vsub.f32 %v7170_v15, %v2533_v51  ;;  %v2604_v37 = vsub.f32 %v7172_v19, %v2536_v30 }
 0x34d   : > { %v7336_v43 = vpop.eup %6301  ;;  %v2711_v60 = vsel %vm897_vm3, %v7332_v29, 0.0 }
 0x34e   : > { %v2647_v45 = vmul.f32 1.442695, %v2603_v46  ;;  %v2649_v63 = vmul.f32 1.442695, %v2604_v37  ;;  %2712 = vadd.xlane.f32.xlu1 %v2711_v60  ;;  %v2714_v55 = vsel %vm897_vm3, %v7336_v43, 0.0 }
 0x34f   : > { %2715 = vadd.xlane.f32.xlu0 %v2714_v55 }
 0x350   : > { %6307 = vpow2.f32 %v2647_v45 }
 0x351   : > { %6309 = vpow2.f32 %v2649_v63 }
 0x353   : > { %v2539_v27 = vpop.xlane.xlu1 %2538  ;;  %v2542_v8 = vpop.xlane.xlu0 %2541 }
 0x354   : > { %v2605_v15 = vsub.f32 %v7182_v23, %v2539_v27  ;;  %v2606_v19 = vsub.f32 %v7184_v24, %v2542_v8 }
 0x355   : > { %v7344_v40 = vpop.eup %6303 }
 0x356   : > { %v7346_v62 = vpop.eup %6305  ;;  %v2651_v58 = vmul.f32 1.442695, %v2605_v15  ;;  %v2653_v21 = vmul.f32 1.442695, %v2606_v19  ;;  %v2717_v26 = vsel %vm897_vm3, %v7344_v40, 0.0 }
 0x357   : > { %2718 = vadd.xlane.f32.xlu1 %v2717_v26  ;;  %v2720_v17 = vsel %vm897_vm3, %v7346_v62, 0.0  ;;  %v7368_v63 = vpop.permute.xlu1 %4128  ;;  %v7370_v55 = vpop.permute.xlu0 %4080 }
 0x358   : > { %6311 = vpow2.f32 %v2651_v58  ;;  %2721 = vadd.xlane.f32.xlu0 %v2720_v17  ;;  %8013 = vst [vmem:[#allocation19_spill] sm:$0xff] %v7368_v63  ;;  %8014 = vst [vmem:[#allocation20_spill] sm:$0xff] %v7370_v55 }
 0x359   : > { %6313 = vpow2.f32 %v2653_v21 }
 0x35b   : > { %v7372_v27 = vpop.permute.xlu1 %4176 }
 0x35c   : > { %8015 = vst [vmem:[#allocation21_spill] sm:$0xff] %v7372_v27 }
 0x35d   : > { %v7352_v51 = vpop.eup %6307 }
 0x35e   : > { %v7354_v23 = vpop.eup %6309  ;;  %v2723_v24 = vsel %vm897_vm3, %v7352_v51, 0.0 }
 0x35f   : > { %2724 = vadd.xlane.f32.xlu1 %v2723_v24  ;;  %v2726_v30 = vsel %vm897_vm3, %v7354_v23, 0.0 }
 0x360   : > { %2727 = vadd.xlane.f32.xlu0 %v2726_v30 }
 0x365   : > { %v7360_v46 = vpop.eup %6311 }
 0x366   : > { %v7362_v37 = vpop.eup %6313  ;;  %v2729_v60 = vsel %vm897_vm3, %v7360_v46, 0.0 }
 0x367   : > { %2730 = vadd.xlane.f32.xlu1 %v2729_v60  ;;  %v2732_v45 = vsel %vm897_vm3, %v7362_v37, 0.0 }
 0x368   : > { %2733 = vadd.xlane.f32.xlu0 %v2732_v45 }
 0x388   : > { %v2548_v8 = vpop.xlane.xlu0 %2547 }
 0x389   : > { %v2608_v15 = vsub.f32 %v7226_v16, %v2548_v8 }
 0x38b   : > { %v2657_v19 = vmul.f32 1.442695, %v2608_v15 }
 0x38c   : > { %v2545_v58 = vpop.xlane.xlu1 %2544  ;;  %v2554_v21 = vpop.xlane.xlu0 %2553 }
 0x38d   : > { %6315 = vpow2.f32 %v2657_v19  ;;  %v2607_v26 = vsub.f32 %v7228_v44, %v2545_v58  ;;  %v2610_v17 = vsub.f32 %v7231_v1, %v2554_v21 }
 0x38f   : > { %v2655_v24 = vmul.f32 1.442695, %v2607_v26  ;;  %v2661_v30 = vmul.f32 1.442695, %v2610_v17 }
 0x390   : > { %v2551_v60 = vpop.xlane.xlu1 %2550  ;;  %v2692_v45 = vpop.xlane.xlu0 %2691 }
 0x391   : > { %6317 = vpow2.f32 %v2655_v24  ;;  %v2609_v63 = vsub.f32 %v7236_v56, %v2551_v60 }
 0x392   : > { %6319 = vpow2.f32 %v2661_v30 }
 0x393   : > { %v2659_v27 = vmul.f32 1.442695, %v2609_v63  ;;  %6321 = vrcp.f32 %v2692_v45 }
 0x394   : > { %v2695_v55 = vpop.xlane.xlu1 %2694  ;;  %v2560_v16 = vpop.xlane.xlu0 %2559 }
 0x395   : > { %6323 = vpow2.f32 %v2659_v27  ;;  %v2612_v8 = vsub.f32 %v7246_v13, %v2560_v16 }
 0x397   : > { %v2665_v15 = vmul.f32 1.442695, %v2612_v8 }
 0x398   : > { %v2689_v19 = vpop.xlane.xlu1 %2688  ;;  %v2698_v44 = vpop.xlane.xlu0 %2697 }
 0x399   : > { %6325 = vpow2.f32 %v2665_v15 }
 0x39a   : > { %v7379_v1 = vpop.eup %6315  ;;  %6327 = vrcp.f32 %v2689_v19 }
 0x39b   : > { %6329 = vrcp.f32 %v2698_v44  ;;  %v2738_v58 = vsel %vm897_vm3, %v7379_v1, 0.0  ;;  %v3030_v44 = vsel %vm2884_vm4, %v7136_v5, 0 }
 0x39c   : > { %v2557_v56 = vpop.xlane.xlu1 %2556  ;;  %2739 = vadd.xlane.f32.xlu0 %v2738_v58  ;;  %v2566_v63 = vpop.xlane.xlu0 %2565  ;;  %6331 = vrcp.f32 %v2695_v55 }
 0x39d   : > { %v2611_v21 = vsub.f32 %v7262_v35, %v2557_v56  ;;  %v2614_v27 = vsub.f32 %v7264_v20, %v2566_v63 }
 0x39e   : > { %v7385_v26 = vpop.eup %6317 }
 0x39f   : > { %v7387_v13 = vpop.eup %6319  ;;  %v2663_v17 = vmul.f32 1.442695, %v2611_v21  ;;  %v2669_v24 = vmul.f32 1.442695, %v2614_v27  ;;  %v2735_v30 = vsel %vm897_vm3, %v7385_v26, 0.0 }
 0x3a0   : > { %v6322_v60 = vpop.eup %6321  ;;  %2736 = vadd.xlane.f32.xlu1 %v2735_v30  ;;  %v2701_v45 = vpop.xlane.xlu1 %2700  ;;  %v2744_v16 = vsel %vm897_vm3, %v7387_v13, 0.0 }
 0x3a1   : > { %6333 = vpow2.f32 %v2663_v17  ;;  %2745 = vadd.xlane.f32.xlu0 %v2744_v16  ;;  %v2704_v35 = vpop.xlane.xlu0 %2703  ;;  %v2816_v20 = vmul.f32 %v6322_v60, %v7242_v12  ;;  %v8016_v12 = vmov 0.0   ;;  %v2982_v16 = vsel %vm2884_vm4, %v7134_v3, 0 }
 0x3a2   : > { %v7394_v8 = vpop.eup %6323  ;;  %6335 = vpow2.f32 %v2669_v24 }
 0x3a3   : > { %v2848_v55 = vpack.c.bf16 %v2816_v20, %v2816_v20  ;;  %v2741_v15 = vsel %vm897_vm3, %v7394_v8, 0.0  ;;  %6337 = vrcp.f32 %v2704_v35  ;;  %v3126_v35 = vsel %vm2884_vm4, %v7140_v7, 0 }
 0x3a4   : > { %2742 = vadd.xlane.f32.xlu1 %v2741_v15  ;;  %v2563_v19 = vpop.xlane.xlu1 %2562  ;;  %6339 = vrcp.f32 %v2701_v45 }
 0x3a5   : > { %5876 = vmatmul.mubr.msk.bf16.vlgmr.msra.gmra.mxu1 %vm897_vm3, %v2848_v55  ;;  %v2613_v58 = vsub.f32 %v7279_v11, %v2563_v19 }
 0x3a6   : > { %v7402_v56 = vpop.eup %6325  ;;  %5886 = vmatpush3.bf16.msra.mxu1 %v3030_v44  ;;  %5887 = vmatprep.mubr.msk.bf16.mxu1 %vm6505_vm2, %v8016_v12  ;;  %v3078_v44 = vsel %vm2884_vm4, %v7138_v6, 0 }
 0x3a7   : > { %v6328_v63 = vpop.eup %6327  ;;  %v2667_v21 = vmul.f32 1.442695, %v2613_v58  ;;  %v2750_v27 = vsel %vm897_vm3, %v7402_v56, 0.0  ;;  %5897 = vmatprep.subr.bf16.mxu1 %v8016_v12 }
 0x3a8   : > { %v6330_v17 = vpop.eup %6329  ;;  %2751 = vadd.xlane.f32.xlu0 %v2750_v27  ;;  %v2815_v5 = vmul.f32 %v6328_v63, %v7253_v59  ;;  %v2707_v60 = vpop.xlane.xlu1 %2706 }
 0x3a9   : > { %6341 = vpow2.f32 %v2667_v21  ;;  %v2818_v11 = vmul.f32 %v6330_v17, %v7259_v22  ;;  %v6332_v30 = vpop.eup %6331  ;;  %v3222_v21 = vsel %vm2884_vm4, %v7152_v36, 0 }
 0x3aa   : > { %v2847_v24 = vpack.c.bf16 %v2815_v5, %v2815_v5  ;;  %6343 = vrcp.f32 %v2707_v60  ;;  %v2817_v59 = vmul.f32 %v6332_v30, %v7251_v52 }
 0x3ab   : > { %v2850_v45 = vpack.c.bf16 %v2818_v11, %v2818_v11 }
 0x3ac   : > { %5870 = vmatmul.mubr.msk.bf16.vlgmr.msra.gmra.mxu0 %vm897_vm3, %v2847_v24  ;;  %v2849_v15 = vpack.c.bf16 %v2817_v59, %v2817_v59 }
 0x3ad   : > { %5880 = vmatpush3.bf16.msra.mxu0 %v2982_v16  ;;  %5888 = vmatmul.mubr.msk.bf16.vlgmr.msra.gmra.mxu1 %vm897_vm3, %v2850_v45 }
 0x3ae   : > { %v7417_v20 = vpop.eup %6333  ;;  %5898 = vmatpush3.bf16.msra.mxu1 %v3126_v35  ;;  %5881 = vmatprep.mubr.msk.bf16.mxu0 %vm6505_vm2, %v8016_v12 }
 0x3af   : > { %v7422_v22 = vpop.eup %6335  ;;  %v2747_v3 = vsel %vm897_vm3, %v7417_v20, 0.0  ;;  %5891 = vmatprep.subr.bf16.mxu0 %v8016_v12  ;;  %5899 = vmatprep.mubr.msk.bf16.mxu1 %vm6505_vm2, %v8016_v12 }
 0x3b0   : > { %2748 = vadd.xlane.f32.xlu1 %v2747_v3  ;;  %v2756_v7 = vsel %vm897_vm3, %v7422_v22, 0.0  ;;  %5909 = vmatprep.subr.bf16.mxu1 %v8016_v12  ;;  %v6338_v55 = vpop.eup %6337 }
 0x3b1   : > { %2757 = vadd.xlane.f32.xlu0 %v2756_v7  ;;  %v2820_v52 = vmul.f32 %v6338_v55, %v7276_v41  ;;  %v6340_v19 = vpop.eup %6339  ;;  %v3270_v55 = vsel %vm2884_vm4, %v7154_v48, 0 }
 0x3b2   : > { %v2819_v6 = vmul.f32 %v6340_v19, %v7270_v61  ;;  %v3174_v61 = vsel %vm2884_vm4, %v7146_v25, 0 }
 0x3b3   : > { %v2852_v58 = vpack.c.bf16 %v2820_v52, %v2820_v52 }
 0x3b4   : > { %5882 = vmatmul.mubr.msk.bf16.vlgmr.msra.gmra.mxu0 %vm897_vm3, %v2849_v15  ;;  %v2851_v60 = vpack.c.bf16 %v2819_v6, %v2819_v6 }
 0x3b5   : > { %5892 = vmatpush3.bf16.msra.mxu0 %v3078_v44  ;;  %5893 = vmatprep.mubr.msk.bf16.mxu0 %vm6505_vm2, %v8016_v12  ;;  %v3318_v44 = vsel %vm2884_vm4, %v7160_v53, 0 }
 0x3b6   : > { %v7438_v63 = vpop.eup %6341  ;;  %5900 = vmatmul.mubr.msk.bf16.vlgmr.msra.gmra.mxu1 %vm897_vm3, %v2852_v58  ;;  %v2569_v27 = vpop.xlane.xlu1 %2568  ;;  %5903 = vmatprep.subr.bf16.mxu0 %v8016_v12 }
 0x3b7   : > { %v2572_v41 = vpop.xlane.xlu0 %2571  ;;  %5910 = vmatpush3.bf16.msra.mxu1 %v3222_v21  ;;  %v2615_v17 = vsub.f32 %v7292_v4, %v2569_v27  ;;  %v2753_v11 = vsel %vm897_vm3, %v7438_v63, 0.0  ;;  %5911 = vmatprep.mubr.msk.bf16.mxu1 %vm6505_vm2, %v8016_v12  ;;  %v6344_v45 = vpop.eup %6343 }
 0x3b8   : > { %v2616_v5 = vsub.f32 %v7294_v9, %v2572_v41  ;;  %2754 = vadd.xlane.f32.xlu1 %v2753_v11  ;;  %5921 = vmatprep.subr.bf16.mxu1 %v8016_v12  ;;  %v2821_v16 = vmul.f32 %v6344_v45, %v7288_v39 }
 0x3b9   : > { %v2671_v36 = vmul.f32 1.442695, %v2615_v17 }
 0x3ba   : > { %v2673_v24 = vmul.f32 1.442695, %v2616_v5  ;;  %v2853_v7 = vpack.c.bf16 %v2821_v16, %v2821_v16 }
 0x3bb   : > { %v2710_v30 = vpop.xlane.xlu0 %2709  ;;  %6345 = vpow2.f32 %v2671_v36 }
 0x3bc   : > { %6347 = vpow2.f32 %v2673_v24  ;;  %5894 = vmatmul.mubr.msk.bf16.vlgmr.msra.gmra.mxu0 %vm897_vm3, %v2851_v60 }
 0x3bd   : > { %6349 = vrcp.f32 %v2710_v30  ;;  %5904 = vmatpush3.bf16.msra.mxu0 %v3174_v61  ;;  %5905 = vmatprep.mubr.msk.bf16.mxu0 %vm6505_vm2, %v8016_v12 }
 0x3be   : > { %v2575_v4 = vpop.xlane.xlu1 %2574  ;;  %5915 = vmatprep.subr.bf16.mxu0 %v8016_v12 }
 0x3bf   : > { %v2578_v9 = vpop.xlane.xlu0 %2577  ;;  %v2617_v35 = vsub.f32 %v7304_v10, %v2575_v4 }
 0x3c0   : > { %v2618_v59 = vsub.f32 %v7306_v31, %v2578_v9 }
 0x3c1   : > { %v2675_v3 = vmul.f32 1.442695, %v2617_v35 }
 0x3c2   : > { %v2677_v25 = vmul.f32 1.442695, %v2618_v59  ;;  %v3366_v59 = vsel %vm2884_vm4, %v7166_v0, 0 }
 0x3c3   : > { %6351 = vpow2.f32 %v2675_v3 }
 0x3c4   : > { %6353 = vpow2.f32 %v2677_v25  ;;  %5906 = vmatmul.mubr.msk.bf16.vlgmr.msra.gmra.mxu0 %vm897_vm3, %v2853_v7 }
 0x3c5   : > { %5916 = vmatpush3.bf16.msra.mxu0 %v3270_v55  ;;  %5917 = vmatprep.mubr.msk.bf16.mxu0 %vm6505_vm2, %v8016_v12 }
 0x3c6   : > { %5927 = vmatprep.subr.bf16.mxu0 %v8016_v12  ;;  %v2581_v58 = vpop.xlane.xlu1 %2580  ;;  %v2584_v27 = vpop.xlane.xlu0 %2583 }
 0x3c8   : > { %v7467_v39 = vpop.eup %6345 }
 0x3c9   : > { %v7469_v10 = vpop.eup %6347  ;;  %v2759_v31 = vsel %vm897_vm3, %v7467_v39, 0.0 }
 0x3ca   : > { %v6350_v15 = vpop.eup %6349  ;;  %2760 = vadd.xlane.f32.xlu1 %v2759_v31  ;;  %v2762_v48 = vsel %vm897_vm3, %v7469_v10, 0.0 }
 0x3cb   : > { %2763 = vadd.xlane.f32.xlu0 %v2762_v48  ;;  %v2822_v52 = vmul.f32 %v6350_v15, %v7300_v38 }
 0x3cd   : > { %v2854_v19 = vpack.c.bf16 %v2822_v52, %v2822_v52 }
 0x3ce   : > { %v2587_v38 = vpop.xlane.xlu1 %2586  ;;  %v2590_v17 = vpop.xlane.xlu0 %2589 }
 0x3cf   : > { %5912 = vmatmul.mubr.msk.bf16.vlgmr.msra.gmra.mxu1 %vm897_vm3, %v2854_v19  ;;  %v2621_v15 = vsub.f32 %v7322_v54, %v2587_v38  ;;  %v2622_v19 = vsub.f32 %v7324_v18, %v2590_v17 }
 0x3d0   : > { %v7479_v21 = vpop.eup %6351  ;;  %5922 = vmatpush3.bf16.msra.mxu1 %v3318_v44  ;;  %5923 = vmatprep.mubr.msk.bf16.mxu1 %vm6505_vm2, %v8016_v12 }
 0x3d1   : > { %v7483_v41 = vpop.eup %6353  ;;  %v2765_v6 = vsel %vm897_vm3, %v7479_v21, 0.0  ;;  %5933 = vmatprep.subr.bf16.mxu1 %v8016_v12  ;;  %v2685_v18 = vmul.f32 1.442695, %v2622_v19 }
 0x3d2   : > { %2766 = vadd.xlane.f32.xlu1 %v2765_v6  ;;  %v2768_v53 = vsel %vm897_vm3, %v7483_v41, 0.0  ;;  %v3606_v6 = vsel %vm2884_vm4, %v7180_v2, 0 }
 0x3d3   : > { %2769 = vadd.xlane.f32.xlu0 %v2768_v53 }
 0x3d7   : > { %v2713_v5 = vpop.xlane.xlu1 %2712 }
 0x3d8   : > { %6355 = vrcp.f32 %v2713_v5  ;;  %v2716_v11 = vpop.xlane.xlu0 %2715  ;;  %v3654_v5 = vsel %vm2884_vm4, %v7194_v57, 0 }
 0x3d9   : > { %6357 = vrcp.f32 %v2716_v11 }
 0x3e0   : > { %v2719_v36 = vpop.xlane.xlu1 %2718 }
 0x3e1   : > { %6359 = vrcp.f32 %v2719_v36  ;;  %v2722_v24 = vpop.xlane.xlu0 %2721  ;;  %v3702_v36 = vsel %vm2884_vm4, %v7192_v47, 0 }
 0x3e2   : > { %6361 = vrcp.f32 %v2722_v24 }
 0x3e3   : > { %4272 = vrot.lane.b32.xlu1 %v6910_v33, %s6509_s21  ;;  %v3414_v33 = vsel %vm2884_vm4, %v7168_v14, 0  ;;  %v2620_v14 = vsub.f32 %v7314_v32, %v2584_v27  ;;  %v3510_v32 = vsel %vm2884_vm4, %v7200_v42, 0  ;;  %v3558_v27 = vsel %vm2884_vm4, %v7186_v28, 0 }
 0x3e5   : > { %v6356_v30 = vpop.eup %6355  ;;  %v2681_v52 = vmul.f32 1.442695, %v2620_v14  ;;  %v8019_v14 = vld [vmem:[#allocation12_spill] sm:$0xff] }
 0x3e6   : > { %v6358_v60 = vpop.eup %6357  ;;  %v2823_v45 = vmul.f32 %v6356_v30, %v7332_v29 }
 0x3e7   : > { %v2824_v61 = vmul.f32 %v6358_v60, %v7336_v43  ;;  %v2619_v43 = vsub.f32 %v7312_v49, %v2581_v58  ;;  %v3462_v49 = vsel %vm2884_vm4, %v7178_v50, 0  ;;  %v8017_v60 = vld [vmem:[#allocation10_spill] sm:$0xff] }
 0x3e8   : > { %v2725_v4 = vpop.xlane.xlu1 %2724  ;;  %v2855_v9 = vpack.c.bf16 %v2823_v45, %v2823_v45  ;;  %v8018_v45 = vld [vmem:[#allocation11_spill] sm:$0xff] }
 0x3e9   : > { %6363 = vrcp.f32 %v2725_v4  ;;  %4224 = vrot.lane.b32.xlu0 %v6912_v34, %s6509_s21  ;;  %v2728_v16 = vpop.xlane.xlu0 %2727  ;;  %v2856_v35 = vpack.c.bf16 %v2824_v61, %v2824_v61  ;;  %v2679_v31 = vmul.f32 1.442695, %v2619_v43 }
 0x3ea   : > { %6365 = vrcp.f32 %v2728_v16  ;;  %5918 = vmatmul.mubr.msk.bf16.vlgmr.msra.gmra.mxu0 %vm897_vm3, %v2855_v9 }
 0x3eb   : > { %5924 = vmatmul.mubr.msk.bf16.vlgmr.msra.gmra.mxu1 %vm897_vm3, %v2856_v35  ;;  %5928 = vmatpush3.bf16.msra.mxu0 %v3366_v59 }
 0x3ec   : > { %5934 = vmatpush3.bf16.msra.mxu1 %v3414_v33  ;;  %5929 = vmatprep.mubr.msk.bf16.mxu0 %vm6505_vm2, %v8016_v12 }
 0x3ed   : > { %5935 = vmatprep.mubr.msk.bf16.mxu1 %vm6505_vm2, %v8016_v12  ;;  %5939 = vmatprep.subr.bf16.mxu0 %v8016_v12 }
 0x3ee   : > { %v6360_v34 = vpop.eup %6359  ;;  %5945 = vmatprep.subr.bf16.mxu1 %v8016_v12 }
 0x3ef   : > { %v6362_v0 = vpop.eup %6361  ;;  %v2825_v29 = vmul.f32 %v6360_v34, %v7344_v40  ;;  %v2683_v40 = vmul.f32 1.442695, %v2621_v15  ;;  %v8020_v15 = vld [vmem:[#allocation13_spill] sm:$0xff] }
 0x3f0   : > { %v2731_v3 = vpop.xlane.xlu1 %2730  ;;  %v2826_v25 = vmul.f32 %v6362_v0, %v7346_v62 }
 0x3f1   : > { %6367 = vrcp.f32 %v2731_v3  ;;  %v2734_v7 = vpop.xlane.xlu0 %2733  ;;  %v2857_v55 = vpack.c.bf16 %v2825_v29, %v2825_v29  ;;  %v3798_v29 = vsel %vm2884_vm4, %v8019_v14, 0 }
 0x3f2   : > { %6369 = vrcp.f32 %v2734_v7  ;;  %v2858_v48 = vpack.c.bf16 %v2826_v25, %v2826_v25 }
 0x3f3   : > { %5930 = vmatmul.mubr.msk.bf16.vlgmr.msra.gmra.mxu0 %vm897_vm3, %v2857_v55  ;;  %6371 = vpow2.f32 %v2679_v31 }
 0x3f4   : > { %5936 = vmatmul.mubr.msk.bf16.vlgmr.msra.gmra.mxu1 %vm897_vm3, %v2858_v48  ;;  %5940 = vmatpush3.bf16.msra.mxu0 %v3462_v49  ;;  %6373 = vpow2.f32 %v2681_v52  ;;  %v3750_v48 = vsel %vm2884_vm4, %v8020_v15, 0  ;;  %v8021_v52 = vld [vmem:[#allocation15_spill] sm:$0xff] }
 0x3f5   : > { %5946 = vmatpush3.bf16.msra.mxu1 %v3510_v32  ;;  %5941 = vmatprep.mubr.msk.bf16.mxu0 %vm6505_vm2, %v8016_v12  ;;  %6375 = vpow2.f32 %v2683_v40  ;;  %v3894_v19 = vsel %vm2884_vm4, %v8021_v52, 0 }
 0x3f6   : > { %v6364_v54 = vpop.eup %6363  ;;  %5947 = vmatprep.mubr.msk.bf16.mxu1 %vm6505_vm2, %v8016_v12  ;;  %5951 = vmatprep.subr.bf16.mxu0 %v8016_v12  ;;  %6377 = vpow2.f32 %v2685_v18 }
 0x3f7   : > { %v6366_v50 = vpop.eup %6365  ;;  %5957 = vmatprep.subr.bf16.mxu1 %v8016_v12  ;;  %v2827_v42 = vmul.f32 %v6364_v54, %v7352_v51 }
 0x3f8   : > { %v2828_v62 = vmul.f32 %v6366_v50, %v7354_v23  ;;  %v8022_v50 = vld [vmem:[#allocation14_spill] sm:$0xff] }
 0x3f9   : > { %v2859_v44 = vpack.c.bf16 %v2827_v42, %v2827_v42 }
 0x3fa   : > { %v2860_v58 = vpack.c.bf16 %v2828_v62, %v2828_v62 }
 0x3fb   : > { %5942 = vmatmul.mubr.msk.bf16.vlgmr.msra.gmra.mxu0 %vm897_vm3, %v2859_v44  ;;  %v8023_v44 = vld [vmem:[#allocation17_spill] sm:$0xff] }
 0x3fc   : > { %5948 = vmatmul.mubr.msk.bf16.vlgmr.msra.gmra.mxu1 %vm897_vm3, %v2860_v58  ;;  %5952 = vmatpush3.bf16.msra.mxu0 %v3558_v27 }
 0x3fd   : > { %5958 = vmatpush3.bf16.msra.mxu1 %v3606_v6  ;;  %5953 = vmatprep.mubr.msk.bf16.mxu0 %vm6505_vm2, %v8016_v12 }
 0x3fe   : > { %v6368_v51 = vpop.eup %6367  ;;  %5959 = vmatprep.mubr.msk.bf16.mxu1 %vm6505_vm2, %v8016_v12  ;;  %5963 = vmatprep.subr.bf16.mxu0 %v8016_v12 }
 0x3ff   : > { %v6370_v28 = vpop.eup %6369  ;;  %5969 = vmatprep.subr.bf16.mxu1 %v8016_v12  ;;  %v2829_v23 = vmul.f32 %v6368_v51, %v7360_v46  ;;  %v8024_v51 = vld [vmem:[#allocation16_spill] sm:$0xff] }
 0x400   : > { %v2830_v2 = vmul.f32 %v6370_v28, %v7362_v37  ;;  %v7542_v17 = vpop.eup %6371  ;;  %v3942_v28 = vsel %vm2884_vm4, %v8024_v51, 0 }
 0x401   : > { %v2861_v53 = vpack.c.bf16 %v2829_v23, %v2829_v23  ;;  %v7547_v11 = vpop.eup %6373  ;;  %v2771_v46 = vsel %vm897_vm3, %v7542_v17, 0.0 }
 0x402   : > { %v2862_v38 = vpack.c.bf16 %v2830_v2, %v2830_v2  ;;  %v7559_v57 = vpop.eup %6375  ;;  %v2774_v47 = vsel %vm897_vm3, %v7547_v11, 0.0  ;;  %v8025_v2 = vld [vmem:[#allocation20_spill] sm:$0xff] }
 0x403   : > { %5954 = vmatmul.mubr.msk.bf16.vlgmr.msra.gmra.mxu0 %vm897_vm3, %v2861_v53  ;;  %v7564_v37 = vpop.eup %6377  ;;  %v2777_v24 = vsel %vm897_vm3, %v7559_v57, 0.0  ;;  %v4086_v53 = vsel %vm2884_vm4, %v8025_v2, 0 }
 0x404   : > { %5960 = vmatmul.mubr.msk.bf16.vlgmr.msra.gmra.mxu1 %vm897_vm3, %v2862_v38  ;;  %5964 = vmatpush3.bf16.msra.mxu0 %v3654_v5  ;;  %v2780_v30 = vsel %vm897_vm3, %v7564_v37, 0.0 }
 0x405   : > { %5970 = vmatpush3.bf16.msra.mxu1 %v3702_v36  ;;  %5971 = vmatprep.mubr.msk.bf16.mxu1 %vm6505_vm2, %v8016_v12  ;;  %v8026_v36 = vld [vmem:[#allocation18_spill] sm:$0xff] }
 0x406   : > { %5981 = vmatprep.subr.bf16.mxu1 %v8016_v12  ;;  %5965 = vmatprep.mubr.msk.bf16.mxu0 %vm6505_vm2, %v8016_v12 }
 0x407   : > { %2772 = vadd.xlane.f32.xlu1 %v2771_v46  ;;  %5975 = vmatprep.subr.bf16.mxu0 %v8016_v12  ;;  %v4038_v46 = vsel %vm2884_vm4, %v8026_v36, 0 }
 0x408   : > { %2775 = vadd.xlane.f32.xlu0 %v2774_v47 }
 0x40b   : > { %2778 = vadd.xlane.f32.xlu1 %v2777_v24 }
 0x40c   : > { %2781 = vadd.xlane.f32.xlu0 %v2780_v30 }
 0x41c   : > { %4368 = vrot.lane.b32.xlu1 %v8017_v60, %s6509_s21 }
 0x422   : > { %4320 = vrot.lane.b32.xlu0 %v8018_v45, %s6509_s21  ;;  %s8032_s21 = scalar_lea.vmem %s7979_s6, %s6608_s30 }
 0x425   : > { %v2740_v61 = vpop.xlane.xlu0 %2739 }
 0x426   : > { %6379 = vrcp.f32 %v2740_v61 }
 0x429   : > { %v2737_v4 = vpop.xlane.xlu1 %2736 }
 0x42a   : > { %6381 = vrcp.f32 %v2737_v4  ;;  %v2746_v9 = vpop.xlane.xlu0 %2745 }
 0x42b   : > { %6383 = vrcp.f32 %v2746_v9 }
 0x42d   : > { %v2743_v16 = vpop.xlane.xlu1 %2742 }
 0x42e   : > { %6385 = vrcp.f32 %v2743_v16 }
 0x431   : > { %v2752_v35 = vpop.xlane.xlu0 %2751 }
 0x432   : > { %6387 = vrcp.f32 %v2752_v35  ;;  %v8027_v35 = vld [vmem:[#allocation19_spill] sm:$0xff] }
 0x433   : > { %v6380_v59 = vpop.eup %6379 }
 0x434   : > { %v2832_v33 = vmul.f32 %v6380_v59, %v7379_v1  ;;  %v4134_v59 = vsel %vm2884_vm4, %v8027_v35, 0 }
 0x436   : > { %v2864_v34 = vpack.c.bf16 %v2832_v33, %v2832_v33  ;;  %v8028_v33 = vld [vmem:[#allocation21_spill] sm:$0xff] }
 0x437   : > { %v6382_v43 = vpop.eup %6381 }
 0x438   : > { %v6384_v0 = vpop.eup %6383  ;;  %5972 = vmatmul.mubr.msk.bf16.vlgmr.msra.gmra.mxu1 %vm897_vm3, %v2864_v34  ;;  %v2831_v3 = vmul.f32 %v6382_v43, %v7385_v26  ;;  %v4182_v34 = vsel %vm2884_vm4, %v8028_v33, 0 }
 0x439   : > { %5982 = vmatpush3.bf16.msra.mxu1 %v3798_v29  ;;  %v2749_v25 = vpop.xlane.xlu1 %2748  ;;  %5983 = vmatprep.mubr.msk.bf16.mxu1 %vm6505_vm2, %v8016_v12  ;;  %v2834_v7 = vmul.f32 %v6384_v0, %v7387_v13 }
 0x43a   : > { %6389 = vrcp.f32 %v2749_v25  ;;  %v2758_v55 = vpop.xlane.xlu0 %2757  ;;  %v2863_v1 = vpack.c.bf16 %v2831_v3, %v2831_v3  ;;  %5993 = vmatprep.subr.bf16.mxu1 %v8016_v12 }
 0x43b   : > { %v6386_v31 = vpop.eup %6385  ;;  %6391 = vrcp.f32 %v2758_v55  ;;  %v2866_v26 = vpack.c.bf16 %v2834_v7, %v2834_v7 }
 0x43c   : > { %5966 = vmatmul.mubr.msk.bf16.vlgmr.msra.gmra.mxu0 %vm897_vm3, %v2863_v1  ;;  %v2833_v13 = vmul.f32 %v6386_v31, %v7394_v8  ;;  %v3846_v8 = vsel %vm2884_vm4, %v8022_v50, 0 }
 0x43d   : > { %5976 = vmatpush3.bf16.msra.mxu0 %v3750_v48  ;;  %5977 = vmatprep.mubr.msk.bf16.mxu0 %vm6505_vm2, %v8016_v12 }
 0x43e   : > { %5987 = vmatprep.subr.bf16.mxu0 %v8016_v12  ;;  %v2865_v40 = vpack.c.bf16 %v2833_v13, %v2833_v13 }
 0x43f   : > { %v6388_v49 = vpop.eup %6387 }
 0x440   : > { %5984 = vmatmul.mubr.msk.bf16.vlgmr.msra.gmra.mxu1 %vm897_vm3, %v2866_v26  ;;  %v2836_v54 = vmul.f32 %v6388_v49, %v7402_v56  ;;  %v3990_v56 = vsel %vm2884_vm4, %v8023_v44, 0 }
 0x441   : > { %5994 = vmatpush3.bf16.msra.mxu1 %v3894_v19  ;;  %v2755_v32 = vpop.xlane.xlu1 %2754  ;;  %5995 = vmatprep.mubr.msk.bf16.mxu1 %vm6505_vm2, %v8016_v12 }
 0x442   : > { %6393 = vrcp.f32 %v2755_v32  ;;  %6005 = vmatprep.subr.bf16.mxu1 %v8016_v12  ;;  %v2868_v18 = vpack.c.bf16 %v2836_v54, %v2836_v54 }
 0x444   : > { %5978 = vmatmul.mubr.msk.bf16.vlgmr.msra.gmra.mxu0 %vm897_vm3, %v2865_v40 }
 0x445   : > { %5988 = vmatpush3.bf16.msra.mxu0 %v3846_v8  ;;  %5989 = vmatprep.mubr.msk.bf16.mxu0 %vm6505_vm2, %v8016_v12 }
 0x446   : > { %5999 = vmatprep.subr.bf16.mxu0 %v8016_v12 }
 0x447   : > { %v6390_v42 = vpop.eup %6389 }
 0x448   : > { %v6392_v62 = vpop.eup %6391  ;;  %5996 = vmatmul.mubr.msk.bf16.vlgmr.msra.gmra.mxu1 %vm897_vm3, %v2868_v18  ;;  %v2835_v58 = vmul.f32 %v6390_v42, %v7417_v20 }
 0x449   : > { %6006 = vmatpush3.bf16.msra.mxu1 %v3990_v56  ;;  %6007 = vmatprep.mubr.msk.bf16.mxu1 %vm6505_vm2, %v8016_v12  ;;  %v2838_v27 = vmul.f32 %v6392_v62, %v7422_v22 }
 0x44a   : > { %v2867_v6 = vpack.c.bf16 %v2835_v58, %v2835_v58  ;;  %6017 = vmatprep.subr.bf16.mxu1 %v8016_v12 }
 0x44b   : > { %v2870_v23 = vpack.c.bf16 %v2838_v27, %v2838_v27 }
 0x44c   : > { %5990 = vmatmul.mubr.msk.bf16.vlgmr.msra.gmra.mxu0 %vm897_vm3, %v2867_v6 }
 0x44d   : > { %6000 = vmatpush3.bf16.msra.mxu0 %v3942_v28  ;;  %6001 = vmatprep.mubr.msk.bf16.mxu0 %vm6505_vm2, %v8016_v12 }
 0x44e   : > { %6011 = vmatprep.subr.bf16.mxu0 %v8016_v12 }
 0x44f   : > { %v6394_v20 = vpop.eup %6393 }
 0x450   : > { %6008 = vmatmul.mubr.msk.bf16.vlgmr.msra.gmra.mxu1 %vm897_vm3, %v2870_v23  ;;  %v2837_v22 = vmul.f32 %v6394_v20, %v7438_v63 }
 0x451   : > { %6018 = vmatpush3.bf16.msra.mxu1 %v4086_v53  ;;  %6019 = vmatprep.mubr.msk.bf16.mxu1 %vm6505_vm2, %v8016_v12 }
 0x452   : > { %v2869_v38 = vpack.c.bf16 %v2837_v22, %v2837_v22  ;;  %6029 = vmatprep.subr.bf16.mxu1 %v8016_v12 }
 0x453   : > { %v2761_v5 = vpop.xlane.xlu1 %2760 }
 0x454   : > { %6395 = vrcp.f32 %v2761_v5  ;;  %v2764_v47 = vpop.xlane.xlu0 %2763  ;;  %6002 = vmatmul.mubr.msk.bf16.vlgmr.msra.gmra.mxu0 %vm897_vm3, %v2869_v38 }
 0x455   : > { %6397 = vrcp.f32 %v2764_v47  ;;  %6012 = vmatpush3.bf16.msra.mxu0 %v4038_v46  ;;  %6013 = vmatprep.mubr.msk.bf16.mxu0 %vm6505_vm2, %v8016_v12 }
 0x456   : > { %6023 = vmatprep.subr.bf16.mxu0 %v8016_v12 }
 0x45b   : > { %v2767_v63 = vpop.xlane.xlu1 %2766 }
 0x45c   : > { %6399 = vrcp.f32 %v2767_v63  ;;  %v2770_v24 = vpop.xlane.xlu0 %2769 }
 0x45d   : > { %6401 = vrcp.f32 %v2770_v24 }
 0x45f   : > { %v4273_v55 = vpop.permute.xlu1 %4272 }
 0x460   : > { %v4225_v3 = vpop.permute.xlu0 %4224 }
 0x461   : > { %v6396_v30 = vpop.eup %6395  ;;  %v4230_v48 = vsel %vm2884_vm4, %v4225_v3, 0 }
 0x462   : > { %v6398_v60 = vpop.eup %6397  ;;  %v2839_v45 = vmul.f32 %v6396_v30, %v7467_v39 }
 0x463   : > { %v2840_v61 = vmul.f32 %v6398_v60, %v7469_v10 }
 0x464   : > { %v2871_v4 = vpack.c.bf16 %v2839_v45, %v2839_v45 }
 0x465   : > { %v2872_v9 = vpack.c.bf16 %v2840_v61, %v2840_v61  ;;  %v7632_v16 = vpop.f32.mrf.mxu1 }
 0x466   : > { %6014 = vmatmul.mubr.msk.bf16.vlgmr.msra.gmra.mxu0 %vm897_vm3, %v2871_v4 }
 0x467   : > { %v5877_v43 = vpop.f32.mrf.mxu1  ;;  %6020 = vmatmul.mubr.msk.bf16.vlgmr.msra.gmra.mxu1 %vm897_vm3, %v2872_v9  ;;  %6024 = vmatpush3.bf16.msra.mxu0 %v4134_v59 }
 0x468   : > { %6030 = vmatpush3.bf16.msra.mxu1 %v4182_v34  ;;  %6025 = vmatprep.mubr.msk.bf16.mxu0 %vm6505_vm2, %v8016_v12 }
 0x469   : > { %v6400_v39 = vpop.eup %6399  ;;  %v2973_v10 = vpop.f32.mrf.mxu1  ;;  %6031 = vmatprep.mubr.msk.bf16.mxu1 %vm6505_vm2, %v8016_v12  ;;  %6035 = vmatprep.subr.bf16.mxu0 %v8016_v12 }
 0x46a   : > { %v6402_v0 = vpop.eup %6401  ;;  %v2841_v14 = vmul.f32 %v6400_v39, %v7479_v21  ;;  %6041 = vmatprep.subr.bf16.mxu1 %v8016_v12  ;;  %v4278_v21 = vsel %vm2884_vm4, %v4273_v55, 0 }
 0x46b   : > { %v2842_v29 = vmul.f32 %v6402_v0, %v7483_v41  ;;  %v5878_v25 = vpop.f32.mrf.mxu1 }
 0x46c   : > { %v2873_v7 = vpack.c.bf16 %v2841_v14, %v2841_v14  ;;  %v7648_v1 = vpop.f32.mrf.mxu0 }
 0x46d   : > { %v2874_v31 = vpack.c.bf16 %v2842_v29, %v2842_v29  ;;  %v7650_v15 = vpop.f32.mrf.mxu1 }
 0x46e   : > { %v5871_v26 = vpop.f32.mrf.mxu0  ;;  %6026 = vmatmul.mubr.msk.bf16.vlgmr.msra.gmra.mxu0 %vm897_vm3, %v2873_v7 }
 0x46f   : > { %v5889_v13 = vpop.f32.mrf.mxu1  ;;  %6032 = vmatmul.mubr.msk.bf16.vlgmr.msra.gmra.mxu1 %vm897_vm3, %v2874_v31  ;;  %6036 = vmatpush3.bf16.msra.mxu0 %v4230_v48 }
 0x470   : > { %6042 = vmatpush3.bf16.msra.mxu1 %v4278_v21  ;;  %v2925_v41 = vpop.f32.mrf.mxu0  ;;  %6037 = vmatprep.mubr.msk.bf16.mxu0 %vm6505_vm2, %v8016_v12 }
 0x471   : > { %v3069_v49 = vpop.f32.mrf.mxu1  ;;  %6043 = vmatprep.mubr.msk.bf16.mxu1 %vm6505_vm2, %v8016_v12  ;;  %6047 = vmatprep.subr.bf16.mxu0 %v8016_v12 }
 0x472   : > { %v5872_v52 = vpop.f32.mrf.mxu0  ;;  %6053 = vmatprep.subr.bf16.mxu1 %v8016_v12 }
 0x473   : > { %v5890_v19 = vpop.f32.mrf.mxu1 }
 0x474   : > { %v7662_v32 = vpop.f32.mrf.mxu0 }
 0x476   : > { %v7664_v54 = vpop.f32.mrf.mxu1  ;;  %v5883_v40 = vpop.f32.mrf.mxu0 }
 0x478   : > { %v5901_v50 = vpop.f32.mrf.mxu1  ;;  %v3021_v8 = vpop.f32.mrf.mxu0 }
 0x47a   : > { %v3165_v18 = vpop.f32.mrf.mxu1  ;;  %v5884_v42 = vpop.f32.mrf.mxu0 }
 0x47c   : > { %v5902_v62 = vpop.f32.mrf.mxu1  ;;  %v7666_v44 = vpop.f32.mrf.mxu0 }
 0x47e   : > { %v5895_v56 = vpop.f32.mrf.mxu0 }
 0x480   : > { %v3117_v58 = vpop.f32.mrf.mxu0 }
 0x482   : > { %v5896_v27 = vpop.f32.mrf.mxu0 }
 0x484   : > { %v7668_v6 = vpop.f32.mrf.mxu0 }
 0x486   : > { %v5907_v51 = vpop.f32.mrf.mxu0 }
 0x488   : > { %v3213_v28 = vpop.f32.mrf.mxu0 }
 0x48a   : > { %v5908_v23 = vpop.f32.mrf.mxu0 }
 0x48f   : > { %v7670_v20 = vpop.f32.mrf.mxu1 }
 0x490   : > { %v2773_v2 = vpop.xlane.xlu1 %2772 }
 0x491   : > { %v5913_v53 = vpop.f32.mrf.mxu1  ;;  %6403 = vrcp.f32 %v2773_v2  ;;  %v2776_v22 = vpop.xlane.xlu0 %2775 }
 0x492   : > { %6405 = vrcp.f32 %v2776_v22 }
 0x493   : > { %v3261_v38 = vpop.f32.mrf.mxu1 }
 0x494   : > { %v2779_v5 = vpop.xlane.xlu1 %2778 }
 0x495   : > { %v5914_v36 = vpop.f32.mrf.mxu1  ;;  %6407 = vrcp.f32 %v2779_v5  ;;  %v2782_v46 = vpop.xlane.xlu0 %2781 }
 0x496   : > { %6409 = vrcp.f32 %v2782_v46 }
 0x498   : > { %v4369_v61 = vpop.permute.xlu1 %4368 }
 0x499   : > { %v4321_v60 = vpop.permute.xlu0 %4320  ;;  %v4374_v33 = vsel %vm2884_vm4, %v4369_v61, 0 }
 0x49a   : > { %v4326_v59 = vsel %vm2884_vm4, %v4321_v60, 0 }
 0x49e   : > { %v6404_v47 = vpop.eup %6403 }
 0x49f   : > { %v6406_v63 = vpop.eup %6405  ;;  %v2843_v24 = vmul.f32 %v6404_v47, %v7542_v17 }
 0x4a0   : > { %v2844_v30 = vmul.f32 %v6406_v63, %v7547_v11 }
 0x4a1   : > { %v2875_v45 = vpack.c.bf16 %v2843_v24, %v2843_v24 }
 0x4a2   : > { %v6408_v4 = vpop.eup %6407  ;;  %v2876_v9 = vpack.c.bf16 %v2844_v30, %v2844_v30 }
 0x4a3   : > { %v6410_v35 = vpop.eup %6409  ;;  %6038 = vmatmul.mubr.msk.bf16.vlgmr.msra.gmra.mxu0 %vm897_vm3, %v2875_v45  ;;  %v2845_v34 = vmul.f32 %v6408_v4, %v7559_v57 }
 0x4a4   : > { %6044 = vmatmul.mubr.msk.bf16.vlgmr.msra.gmra.mxu1 %vm897_vm3, %v2876_v9  ;;  %6048 = vmatpush3.bf16.msra.mxu0 %v4326_v59  ;;  %v2846_v17 = vmul.f32 %v6410_v35, %v7564_v37 }
 0x4a5   : > { %6054 = vmatpush3.bf16.msra.mxu1 %v4374_v33  ;;  %6049 = vmatprep.mubr.msk.bf16.mxu0 %vm6505_vm2, %v8016_v12  ;;  %v2877_v11 = vpack.c.bf16 %v2845_v34, %v2845_v34 }
 0x4a6   : > { %6055 = vmatprep.mubr.msk.bf16.mxu1 %vm6505_vm2, %v8016_v12  ;;  %v2878_v43 = vpack.c.bf16 %v2846_v17, %v2846_v17 }
 0x4aa   : > { %v3306_v39 = vpop.f32.mrf.mxu0 }
 0x4ab   : > { %v3354_v10 = vpop.f32.mrf.mxu1  ;;  %6050 = vmatmul.mubr.msk.bf16.vlgmr.msra.gmra.mxu0 %vm897_vm3, %v2877_v11 }
 0x4ac   : > { %v6209_v0 = vpack.i.bf16 %v3354_v10, %v3306_v39  ;;  %6056 = vmatmul.mubr.msk.bf16.vlgmr.msra.gmra.mxu1 %vm897_vm3, %v2878_v43  ;;  %v5919_v14 = vpop.f32.mrf.mxu0 }
 0x4ad   : > { %v5925_v57 = vpop.f32.mrf.mxu1 }
 0x4ae   : > { %6210 = vrot.lane.b32.xlu0 %v6209_v0, %s6510_s22  ;;  %v3309_v29 = vpop.f32.mrf.mxu0 }
 0x4af   : > { %v3357_v3 = vpop.f32.mrf.mxu1 }
 0x4b0   : > { %v5920_v37 = vpop.f32.mrf.mxu0 }
 0x4b1   : > { %v5926_v25 = vpop.f32.mrf.mxu1 }
 0x4b3   : > { %v3402_v7 = vpop.f32.mrf.mxu0 }
 0x4b4   : > { %v3450_v12 = vpop.f32.mrf.mxu1 }
 0x4b5   : > { %v6214_v55 = vpack.i.bf16 %v3450_v12, %v3402_v7  ;;  %v5931_v31 = vpop.f32.mrf.mxu0 }
 0x4b6   : > { %v5937_v48 = vpop.f32.mrf.mxu1 }
 0x4b7   : > { %6215 = vrot.lane.b32.xlu1 %v6214_v55, %s6510_s22  ;;  %v3405_v26 = vpop.f32.mrf.mxu0 }
 0x4b8   : > { %v3453_v21 = vpop.f32.mrf.mxu1  ;;  %v6271_v26 = vld [vmem:[%s8029_s28 + $0x8] sm:$0xff]  }
 0x4b9   : > { %v5932_v13 = vpop.f32.mrf.mxu0  ;;  %6059 = vmatprep.subr.bf16.mxu0 %v6271_v26 }
 0x4ba   : > { %v5938_v41 = vpop.f32.mrf.mxu1  ;;  %6060 = vmatpush3.bf16.msra.mxu0 %v6271_v26 }
 0x4bb   : > { %v3498_v49 = vpop.f32.mrf.mxu0  ;;  %v6272_v41 = vld [vmem:[%s8029_s28] sm:$0xff]  }
 0x4bc   : > { %v3546_v52 = vpop.f32.mrf.mxu1  ;;  %6061 = vmatprep.subr.bf16.mxu0 %v6272_v41 }
 0x4bd   : > { %v6219_v19 = vpack.i.bf16 %v3546_v52, %v3498_v49  ;;  %v5943_v40 = vpop.f32.mrf.mxu0 }
 0x4be   : > { %v5949_v50 = vpop.f32.mrf.mxu1  ;;  %6062 = vmatpush3.bf16.msra.mxu0 %v6272_v41 }
 0x4bf   : > { %6220 = vrot.lane.b32.xlu0 %v6219_v19, %s6510_s22  ;;  %v3501_v8 = vpop.f32.mrf.mxu0 }
 0x4c0   : > { %v3549_v18 = vpop.f32.mrf.mxu1 }
 0x4c1   : > { %v5944_v42 = vpop.f32.mrf.mxu0 }
 0x4c2   : > { %v5950_v62 = vpop.f32.mrf.mxu1 }
 0x4c3   : > { %v3594_v56 = vpop.f32.mrf.mxu0 }
 0x4c4   : > { %v3642_v58 = vpop.f32.mrf.mxu1 }
 0x4c5   : > { %v6224_v27 = vpack.i.bf16 %v3642_v58, %v3594_v56  ;;  %v5955_v51 = vpop.f32.mrf.mxu0 }
 0x4c6   : > { %v5961_v28 = vpop.f32.mrf.mxu1 }
 0x4c7   : > { %6225 = vrot.lane.b32.xlu1 %v6224_v27, %s6510_s22  ;;  %v3597_v23 = vpop.f32.mrf.mxu0 }
 0x4c8   : > { %v3645_v2 = vpop.f32.mrf.mxu1 }
 0x4c9   : > { %v5956_v53 = vpop.f32.mrf.mxu0 }
 0x4ca   : > { %v5962_v22 = vpop.f32.mrf.mxu1 }
 0x4f8   : > { %v3738_v38 = vpop.f32.mrf.mxu1 }
 0x4fa   : > { %v5973_v5 = vpop.f32.mrf.mxu1 }
 0x4fc   : > { %v3690_v36 = vpop.f32.mrf.mxu0  ;;  %v3741_v46 = vpop.f32.mrf.mxu1 }
 0x4fd   : > { %v6229_v47 = vpack.i.bf16 %v3738_v38, %v3690_v36 }
 0x4fe   : > { %v5967_v63 = vpop.f32.mrf.mxu0  ;;  %v5974_v24 = vpop.f32.mrf.mxu1 }
 0x4ff   : > { %6230 = vrot.lane.b32.xlu0 %v6229_v47, %s6511_s23 }
 0x500   : > { %v3693_v30 = vpop.f32.mrf.mxu0  ;;  %v3834_v60 = vpop.f32.mrf.mxu1 }
 0x502   : > { %v5968_v45 = vpop.f32.mrf.mxu0  ;;  %v5985_v61 = vpop.f32.mrf.mxu1 }
 0x504   : > { %v3786_v4 = vpop.f32.mrf.mxu0  ;;  %v3837_v9 = vpop.f32.mrf.mxu1 }
 0x505   : > { %v6234_v35 = vpack.i.bf16 %v3834_v60, %v3786_v4 }
 0x506   : > { %v5979_v59 = vpop.f32.mrf.mxu0  ;;  %v5986_v33 = vpop.f32.mrf.mxu1 }
 0x507   : > { %6235 = vrot.lane.b32.xlu1 %v6234_v35, %s6511_s23 }
 0x508   : > { %v3789_v34 = vpop.f32.mrf.mxu0  ;;  %v3930_v17 = vpop.f32.mrf.mxu1 }
 0x50a   : > { %v5980_v11 = vpop.f32.mrf.mxu0  ;;  %v5997_v43 = vpop.f32.mrf.mxu1 }
 0x50c   : > { %v3882_v39 = vpop.f32.mrf.mxu0  ;;  %v3933_v10 = vpop.f32.mrf.mxu1 }
 0x50d   : > { %v6244_v8 = vpack.i.bf16 %v3930_v17, %v3882_v39 }
 0x50e   : > { %v5991_v0 = vpop.f32.mrf.mxu0  ;;  %v5998_v14 = vpop.f32.mrf.mxu1 }
 0x510   : > { %v3885_v57 = vpop.f32.mrf.mxu0  ;;  %v4026_v29 = vpop.f32.mrf.mxu1 }
 0x512   : > { %v5992_v3 = vpop.f32.mrf.mxu0  ;;  %v6009_v37 = vpop.f32.mrf.mxu1 }
 0x514   : > { %v3978_v25 = vpop.f32.mrf.mxu0  ;;  %v4029_v7 = vpop.f32.mrf.mxu1 }
 0x515   : > { %v6254_v2 = vpack.i.bf16 %v4026_v29, %v3978_v25 }
 0x516   : > { %v6003_v12 = vpop.f32.mrf.mxu0  ;;  %v6010_v55 = vpop.f32.mrf.mxu1 }
 0x518   : > { %v3981_v31 = vpop.f32.mrf.mxu0 }
 0x51a   : > { %v6004_v48 = vpop.f32.mrf.mxu0 }
 0x520   : > { %v6211_v11 = vpop.permute.xlu0 %6210 }
 0x521   : > { %v6213_v0 = vunpack.i.h.bf16 %v6211_v11  ;;  %v6212_v14 = vunpack.i.l.bf16 %v6211_v11 }
 0x523   : > { %v4513_v25 = vsel %vm897_vm3, %v7632_v16, %v6213_v0  ;;  %v4512_v7 = vsel %vm897_vm3, %v7648_v1, %v6212_v14 }
 0x526   : > { %v4074_v21 = vpop.f32.mrf.mxu0 }
 0x527   : > { %v4122_v13 = vpop.f32.mrf.mxu1 }
 0x528   : > { %v6239_v49 = vpack.i.bf16 %v4122_v13, %v4074_v21  ;;  %v6015_v52 = vpop.f32.mrf.mxu0 }
 0x529   : > { %v6021_v19 = vpop.f32.mrf.mxu1  ;;  %v6216_v39 = vpop.permute.xlu1 %6215 }
 0x52a   : > { %6240 = vrot.lane.b32.xlu0 %v6239_v49, %s6512_s24  ;;  %v4077_v40 = vpop.f32.mrf.mxu0  ;;  %v6218_v49 = vunpack.i.h.bf16 %v6216_v39  ;;  %v6217_v52 = vunpack.i.l.bf16 %v6216_v39 }
 0x52b   : > { %v4125_v50 = vpop.f32.mrf.mxu1 }
 0x52c   : > { %v6016_v18 = vpop.f32.mrf.mxu0  ;;  %v4515_v1 = vsel %vm897_vm3, %v7650_v15, %v6218_v49  ;;  %v4514_v50 = vsel %vm897_vm3, %v7662_v32, %v6217_v52 }
 0x52d   : > { %v6022_v42 = vpop.f32.mrf.mxu1 }
 0x52e   : > { %6245 = vrot.lane.b32.xlu0 %v6244_v8, %s6511_s23  ;;  %v4170_v62 = vpop.f32.mrf.mxu0 }
 0x52f   : > { %v4218_v56 = vpop.f32.mrf.mxu1 }
 0x530   : > { %v6249_v58 = vpack.i.bf16 %v4218_v56, %v4170_v62  ;;  %v6027_v27 = vpop.f32.mrf.mxu0 }
 0x531   : > { %v6033_v51 = vpop.f32.mrf.mxu1  ;;  %v6221_v43 = vpop.permute.xlu0 %6220 }
 0x532   : > { %6250 = vrot.lane.b32.xlu1 %v6249_v58, %s6512_s24  ;;  %v4173_v28 = vpop.f32.mrf.mxu0 }
 0x533   : > { %v4221_v23 = vpop.f32.mrf.mxu1 }
 0x534   : > { %v6028_v53 = vpop.f32.mrf.mxu0 }
 0x535   : > { %v6034_v22 = vpop.f32.mrf.mxu1 }
 0x536   : > { %6255 = vrot.lane.b32.xlu1 %v6254_v2, %s6511_s23 }
 0x539   : > { %v6226_v3 = vpop.permute.xlu1 %6225 }
 0x53a   : > { %v6228_v42 = vunpack.i.h.bf16 %v6226_v3  ;;  %v6227_v62 = vunpack.i.l.bf16 %v6226_v3 }
 0x53c   : > { %v4519_v15 = vsel %vm897_vm3, %v7670_v20, %v6228_v42  ;;  %v4518_v32 = vsel %vm897_vm3, %v7668_v6, %v6227_v62  ;;  %v6448_v42 = vld [vmem:[#allocation2 + $0x30] sm:$0xff] }
 0x563   : > { %v4266_v38 = vpop.f32.mrf.mxu0 }
 0x564   : > { %v4314_v5 = vpop.f32.mrf.mxu1 }
 0x565   : > { %v6259_v36 = vpack.i.bf16 %v4314_v5, %v4266_v38  ;;  %v6039_v46 = vpop.f32.mrf.mxu0 }
 0x566   : > { %v6045_v47 = vpop.f32.mrf.mxu1  ;;  %v6222_v46 = vunpack.i.l.bf16 %v6221_v43 }
 0x567   : > { %6260 = vrot.lane.b32.xlu0 %v6259_v36, %s6512_s24  ;;  %v4269_v63 = vpop.f32.mrf.mxu0  ;;  %v6223_v36 = vunpack.i.h.bf16 %v6221_v43  ;;  %v5469_v43 = vld [vmem:[%s8030_s17] ss:$0 sm:$0xff] }
 0x568   : > { %v4317_v24 = vpop.f32.mrf.mxu1  ;;  %v4516_v20 = vsel %vm897_vm3, %v7666_v44, %v6222_v46 }
 0x569   : > { %v6040_v30 = vpop.f32.mrf.mxu0 }
 0x56a   : > { %v6046_v60 = vpop.f32.mrf.mxu1  ;;  %v4517_v30 = vsel %vm897_vm3, %v7664_v54, %v6223_v36 }
 0x56b   : > { %v4362_v45 = vpop.f32.mrf.mxu0 }
 0x56c   : > { %v4410_v61 = vpop.f32.mrf.mxu1 }
 0x56d   : > { %v6264_v4 = vpack.i.bf16 %v4410_v61, %v4362_v45  ;;  %v6051_v9 = vpop.f32.mrf.mxu0 }
 0x56e   : > { %v6057_v35 = vpop.f32.mrf.mxu1 }
 0x56f   : > { %6265 = vrot.lane.b32.xlu1 %v6264_v4, %s6512_s24  ;;  %v4365_v59 = vpop.f32.mrf.mxu0 }
 0x570   : > { %v4413_v33 = vpop.f32.mrf.mxu1 }
 0x571   : > { %v6052_v34 = vpop.f32.mrf.mxu0  ;;  %v6231_v10 = vpop.permute.xlu0 %6230 }
 0x572   : > { %v6058_v17 = vpop.f32.mrf.mxu1  ;;  %v6233_v57 = vunpack.i.h.bf16 %v6231_v10  ;;  %v6232_v29 = vunpack.i.l.bf16 %v6231_v10 }
 0x574   : > { %v4521_v31 = vsel %vm4520_vm5, %v4512_v7, %v6232_v29  ;;  %v4522_v48 = vsel %vm4520_vm5, %v4513_v25, %v6233_v57  ;;  %v6443_v57 = vld [vmem:[#allocation2] sm:$0xff] }
 0x579   : > { %v6236_v26 = vpop.permute.xlu1 %6235 }
 0x57a   : > { %v6238_v19 = vunpack.i.h.bf16 %v6236_v26  ;;  %v6237_v40 = vunpack.i.l.bf16 %v6236_v26  ;;  %v6446_v26 = vld [vmem:[#allocation2 + $0x18] sm:$0xff] }
 0x57c   : > { %v4524_v56 = vsel %vm4520_vm5, %v4515_v1, %v6238_v19  ;;  %v4523_v58 = vsel %vm4520_vm5, %v4514_v50, %v6237_v40  ;;  %v6447_v50 = vld [vmem:[#allocation2 + $0x20] sm:$0xff] }
 0x59c   : > { %v6241_v37 = vpop.permute.xlu0 %6240 }
 0x59d   : > { %v6243_v12 = vunpack.i.h.bf16 %v6241_v37  ;;  %v6242_v55 = vunpack.i.l.bf16 %v6241_v37  ;;  %v6444_v37 = vld [vmem:[#allocation2 + $0x10] sm:$0xff] }
 0x59f   : > { %v4530_v21 = vsel %vm4529_vm6, %v4521_v31, %v6242_v55  ;;  %v4531_v13 = vsel %vm4529_vm6, %v4522_v48, %v6243_v12  ;;  %v6445_v31 = vld [vmem:[#allocation2 + $0x8] sm:$0xff] }
 0x5a0   : > { %v4538_v41 = vpack.c.bf16 %v4531_v13, %v4530_v21  ;;  %v6246_v5 = vpop.permute.xlu0 %6245 }
 0x5a1   : > { %v6248_v47 = vunpack.i.h.bf16 %v6246_v5  ;;  %v6247_v63 = vunpack.i.l.bf16 %v6246_v5 }
 0x5a2   : > { %6063 = vmatprep.mubr.msk.bf16.mxu0 %vm704_vm1, %v4538_v41 }
 0x5a3   : > { %v4525_v45 = vsel %vm4520_vm5, %v4516_v20, %v6247_v63  ;;  %v4526_v61 = vsel %vm4520_vm5, %v4517_v30, %v6248_v47 }
 0x5a4   : > { %v6251_v16 = vpop.permute.xlu1 %6250 }
 0x5a5   : > { %v6253_v8 = vunpack.i.h.bf16 %v6251_v16  ;;  %v6252_v18 = vunpack.i.l.bf16 %v6251_v16 }
 0x5a7   : > { %v4533_v27 = vsel %vm4529_vm6, %v4524_v56, %v6253_v8  ;;  %v4532_v51 = vsel %vm4529_vm6, %v4523_v58, %v6252_v18 }
 0x5a8   : > { %v4539_v28 = vpack.c.bf16 %v4533_v27, %v4532_v51  ;;  %v6256_v23 = vpop.permute.xlu1 %6255  ;;  %v6449_v51 = vld [vmem:[#allocation2 + $0x28] sm:$0xff] }
 0x5a9   : > { %v6258_v2 = vunpack.i.h.bf16 %v6256_v23  ;;  %v6257_v53 = vunpack.i.l.bf16 %v6256_v23  ;;  %v6450_v23 = vld [vmem:[#allocation2 + $0x38] sm:$0xff] }
 0x5aa   : > { %6064 = vmatmul.mubr.msk.bf16.vlgmr.msra.gmra.mxu0 %vm704_vm1, %v4539_v28 }
 0x5ab   : > { %v4528_v22 = vsel %vm4520_vm5, %v4519_v15, %v6258_v2  ;;  %v4527_v38 = vsel %vm4520_vm5, %v4518_v32, %v6257_v53 }
 0x5d9   : > { %v6261_v24 = vpop.permute.xlu0 %6260 }
 0x5da   : > { %v6263_v60 = vunpack.i.h.bf16 %v6261_v24  ;;  %v6262_v6 = vunpack.i.l.bf16 %v6261_v24 }
 0x5dc   : > { %v4534_v4 = vsel %vm4529_vm6, %v4525_v45, %v6262_v6  ;;  %v4535_v9 = vsel %vm4529_vm6, %v4526_v61, %v6263_v60 }
 0x5dd   : > { %v4540_v35 = vpack.c.bf16 %v4535_v9, %v4534_v4 }
 0x5df   : > { %6067 = vmatprep.mubr.msk.bf16.mxu0 %vm704_vm1, %v4540_v35 }
 0x5e1   : > { %v6266_v59 = vpop.permute.xlu1 %6265 }
 0x5e2   : > { %v6268_v33 = vunpack.i.h.bf16 %v6266_v59  ;;  %v6267_v54 = vunpack.i.l.bf16 %v6266_v59 }
 0x5e4   : > { %v4537_v34 = vsel %vm4529_vm6, %v4528_v22, %v6268_v33  ;;  %v4536_v44 = vsel %vm4529_vm6, %v4527_v38, %v6267_v54 }
 0x5e5   : > { %v4541_v17 = vpack.c.bf16 %v4537_v34, %v4536_v44  ;;  %v6273_v34 = vld [vmem:[%s6640_s1 + $0x8] sm:$0xff]   ;;  %v6274_v44 = vld [vmem:[%s6640_s1] sm:$0xff]  }
 0x5e6   : > { %6071 = vmatprep.subr.bf16.mxu1 %v6273_v34 }
 0x5e7   : > { %6068 = vmatmul.mubr.msk.bf16.gmra.mxu0 %vm704_vm1, %v4541_v17  ;;  %6072 = vmatpush3.bf16.msra.mxu1 %v6273_v34 }
 0x5e8   : > { %6073 = vmatprep.subr.bf16.mxu1 %v6274_v44 }
 0x5eb   : > { %6074 = vmatpush3.bf16.msra.mxu1 %v6274_v44 }
 0x66a   : > { %v6065_v11 = vpop.f32.mrf.mxu0 }
 0x66b   : > { %v4620_v10 = vadd.f32 %v6065_v11, %v5469_v43 }
 0x66c   : > { %v4611_v39 = vpop.f32.mrf.mxu0 }
 0x66d   : > { %v4612_v0 = vadd.f32 %v5469_v43, %v4611_v39  ;;  %v4644_v25 = vadd.f32 %v6444_v37, %v4620_v10 }
 0x66e   : > { %v6066_v14 = vpop.f32.mrf.mxu0 }
 0x66f   : > { %v4642_v29 = vadd.f32 %v6443_v57, %v4612_v0  ;;  %v4623_v7 = vadd.f32 %v6066_v14, %v5469_v43  ;;  %v4656_v41 = vsel %vm704_vm1, %v4644_v25, 0.0 }
 0x670   : > { %v4614_v3 = vpop.f32.mrf.mxu0 }
 0x671   : > { %v4615_v12 = vadd.f32 %v5469_v43, %v4614_v3  ;;  %v4650_v55 = vsel %vm704_vm1, %v4642_v29, 0.0  ;;  %v4645_v21 = vadd.f32 %v6446_v26, %v4623_v7 }
 0x672   : > { %4651 = vadd.xlane.f32.xlu0 %v4650_v55 }
 0x673   : > { %v4643_v48 = vadd.f32 %v6445_v31, %v4615_v12  ;;  %v4659_v49 = vsel %vm704_vm1, %v4645_v21, 0.0 }
 0x675   : > { %v4653_v13 = vsel %vm704_vm1, %v4643_v48, 0.0 }
 0x676   : > { %4654 = vadd.xlane.f32.xlu1 %v4653_v13  ;;  %4657 = vadd.xlane.f32.xlu0 %v4656_v41  ;;  %v6275_v41 = vld [vmem:[%s6650_s29 + $0x38] sm:$0xff]  }
 0x677   : > { %6083 = vmatprep.subr.bf16.mxu0 %v6275_v41 }
 0x678   : > { %6084 = vmatpush3.bf16.msra.mxu0 %v6275_v41 }
 0x67a   : > { %4660 = vadd.xlane.f32.xlu0 %v4659_v49  ;;  %v6276_v49 = vld [vmem:[%s6650_s29 + $0x30] sm:$0xff]  }
 0x67b   : > { %6085 = vmatprep.subr.bf16.mxu0 %v6276_v49 }
 0x67c   : > { %6086 = vmatpush3.bf16.msra.mxu0 %v6276_v49 }
 0x6a7   : > { %v6069_v52 = vpop.f32.mrf.mxu0 }
 0x6a8   : > { %v4636_v40 = vadd.f32 %v6069_v52, %v5469_v43  ;;  %v6277_v52 = vld [vmem:[%s6650_s29 + $0x28] sm:$0xff]  }
 0x6a9   : > { %v4627_v19 = vpop.f32.mrf.mxu0  ;;  %6087 = vmatprep.subr.bf16.mxu0 %v6277_v52 }
 0x6aa   : > { %v4628_v16 = vadd.f32 %v5469_v43, %v4627_v19  ;;  %v4648_v62 = vadd.f32 %v6448_v42, %v4636_v40  ;;  %v6278_v19 = vld [vmem:[%s6650_s29 + $0x20] sm:$0xff]   ;;  %6088 = vmatpush3.bf16.msra.mxu0 %v6277_v52  ;;  %v6279_v40 = vld [vmem:[%s6650_s29 + $0x18] sm:$0xff]  }
 0x6ab   : > { %v6070_v1 = vpop.f32.mrf.mxu0  ;;  %6089 = vmatprep.subr.bf16.mxu0 %v6278_v19 }
 0x6ac   : > { %v4646_v8 = vadd.f32 %v6447_v50, %v4628_v16  ;;  %v4639_v56 = vadd.f32 %v6070_v1, %v5469_v43  ;;  %v4668_v53 = vsel %vm704_vm1, %v4648_v62, 0.0 }
 0x6ad   : > { %v4630_v18 = vpop.f32.mrf.mxu0 }
 0x6ae   : > { %v4631_v58 = vadd.f32 %v5469_v43, %v4630_v18  ;;  %v4662_v27 = vsel %vm704_vm1, %v4646_v8, 0.0  ;;  %v4649_v2 = vadd.f32 %v6450_v23, %v4639_v56  ;;  %6090 = vmatpush3.bf16.msra.mxu0 %v6278_v19 }
 0x6af   : > { %4663 = vadd.xlane.f32.xlu1 %v4662_v27  ;;  %6091 = vmatprep.subr.bf16.mxu0 %v6279_v40 }
 0x6b0   : > { %v4647_v28 = vadd.f32 %v6449_v51, %v4631_v58  ;;  %v4671_v32 = vsel %vm704_vm1, %v4649_v2, 0.0 }
 0x6b2   : > { %v4665_v15 = vsel %vm704_vm1, %v4647_v28, 0.0  ;;  %6092 = vmatpush3.bf16.msra.mxu0 %v6279_v40  ;;  %v6281_v40 = vld [vmem:[%s6650_s29 + $0x8] sm:$0xff]  }
 0x6b3   : > { %4669 = vadd.xlane.f32.xlu1 %v4668_v53  ;;  %4666 = vadd.xlane.f32.xlu0 %v4665_v15  ;;  %v5476_v53 = vld [vmem:[%s8031_s16] ss:$0 sm:$0xff] }
 0x6b7   : > { %4672 = vadd.xlane.f32.xlu0 %v4671_v32 }
 0x6fb   : > { %v4652_v22 = vpop.xlane.xlu0 %4651 }
 0x6fc   : > { %v4675_v38 = vmul.f32 0.03125, %v4652_v22 }
 0x6fe   : > { %v7749_v5 = vsub.f32 %v4642_v29, %v4675_v38 }
 0x6ff   : > { %v4655_v36 = vpop.xlane.xlu1 %4654  ;;  %v4658_v46 = vpop.xlane.xlu0 %4657 }
 0x700   : > { %v4676_v47 = vmul.f32 0.03125, %v4655_v36  ;;  %v4677_v63 = vmul.f32 0.03125, %v4658_v46  ;;  %v4691_v24 = vmul.f32 %v7749_v5, %v7749_v5  ;;  %v5477_v46 = vld [vmem:[%s8032_s21] ss:$0 sm:$0xff] }
 0x702   : > { %v7753_v30 = vsub.f32 %v4643_v48, %v4676_v47  ;;  %v7755_v20 = vsub.f32 %v4644_v25, %v4677_v63  ;;  %v4699_v60 = vsel %vm704_vm1, %v4691_v24, 0.0 }
 0x703   : > { %4700 = vadd.xlane.f32.xlu1 %v4699_v60  ;;  %v4661_v6 = vpop.xlane.xlu0 %4660 }
 0x704   : > { %v4678_v45 = vmul.f32 0.03125, %v4661_v6  ;;  %v4692_v61 = vmul.f32 %v7753_v30, %v7753_v30  ;;  %v4693_v4 = vmul.f32 %v7755_v20, %v7755_v20 }
 0x706   : > { %v7762_v9 = vsub.f32 %v4645_v21, %v4678_v45  ;;  %v4702_v35 = vsel %vm704_vm1, %v4692_v61, 0.0  ;;  %v4705_v59 = vsel %vm704_vm1, %v4693_v4, 0.0 }
 0x707   : > { %4703 = vadd.xlane.f32.xlu0 %v4702_v35  ;;  %4706 = vadd.xlane.f32.xlu1 %v4705_v59 }
 0x708   : > { %v4694_v33 = vmul.f32 %v7762_v9, %v7762_v9 }
 0x70a   : > { %v4708_v54 = vsel %vm704_vm1, %v4694_v33, 0.0 }
 0x70b   : > { %4709 = vadd.xlane.f32.xlu0 %v4708_v54 }
 0x738   : > { %v4664_v17 = vpop.xlane.xlu1 %4663 }
 0x739   : > { %v4679_v11 = vmul.f32 0.03125, %v4664_v17 }
 0x73b   : > { %v7771_v43 = vsub.f32 %v4646_v8, %v4679_v11 }
 0x73c   : > { %v4670_v39 = vpop.xlane.xlu1 %4669  ;;  %v4667_v10 = vpop.xlane.xlu0 %4666 }
 0x73d   : > { %v4681_v0 = vmul.f32 0.03125, %v4670_v39  ;;  %v4680_v14 = vmul.f32 0.03125, %v4667_v10  ;;  %v4695_v57 = vmul.f32 %v7771_v43, %v7771_v43 }
 0x73f   : > { %v7775_v29 = vsub.f32 %v4648_v62, %v4681_v0  ;;  %v7777_v3 = vsub.f32 %v4647_v28, %v4680_v14  ;;  %v4711_v37 = vsel %vm704_vm1, %v4695_v57, 0.0 }
 0x740   : > { %4712 = vadd.xlane.f32.xlu1 %v4711_v37  ;;  %v4673_v25 = vpop.xlane.xlu0 %4672 }
 0x741   : > { %v4682_v7 = vmul.f32 0.03125, %v4673_v25  ;;  %v4697_v12 = vmul.f32 %v7775_v29, %v7775_v29  ;;  %v4696_v55 = vmul.f32 %v7777_v3, %v7777_v3 }
 0x743   : > { %v7784_v31 = vsub.f32 %v4649_v2, %v4682_v7  ;;  %v4717_v48 = vsel %vm704_vm1, %v4697_v12, 0.0  ;;  %v4714_v26 = vsel %vm704_vm1, %v4696_v55, 0.0 }
 0x744   : > { %4718 = vadd.xlane.f32.xlu1 %v4717_v48  ;;  %4715 = vadd.xlane.f32.xlu0 %v4714_v26 }
 0x745   : > { %v4698_v21 = vmul.f32 %v7784_v31, %v7784_v31 }
 0x747   : > { %v4720_v13 = vsel %vm704_vm1, %v4698_v21, 0.0 }
 0x748   : > { %4721 = vadd.xlane.f32.xlu0 %v4720_v13 }
 0x78c   : > { %v4701_v16 = vpop.xlane.xlu1 %4700 }
 0x78d   : > { %v4723_v1 = vmul.f32 0.03125, %v4701_v16  ;;  %v6282_v16 = vld [vmem:[%s6650_s29] sm:$0xff]  }
 0x78f   : > { %v4731_v50 = vadd.f32 1e-05, %v4723_v1 }
 0x790   : > { %v4707_v8 = vpop.xlane.xlu1 %4706  ;;  %v4704_v18 = vpop.xlane.xlu0 %4703 }
 0x791   : > { %6411 = vrsqrt.f32 %v4731_v50  ;;  %v4725_v42 = vmul.f32 0.03125, %v4707_v8  ;;  %v4724_v62 = vmul.f32 0.03125, %v4704_v18  ;;  %v5478_v8 = vld [vmem:[%s623_s3] ss:$0 sm:$0xff] }
 0x793   : > { %v4733_v56 = vadd.f32 1e-05, %v4725_v42  ;;  %v4732_v58 = vadd.f32 1e-05, %v4724_v62 }
 0x794   : > { %v4710_v27 = vpop.xlane.xlu0 %4709 }
 0x795   : > { %6413 = vrsqrt.f32 %v4733_v56  ;;  %v4726_v51 = vmul.f32 0.03125, %v4710_v27 }
 0x796   : > { %6415 = vrsqrt.f32 %v4732_v58 }
 0x797   : > { %v4734_v28 = vadd.f32 1e-05, %v4726_v51 }
 0x799   : > { %6417 = vrsqrt.f32 %v4734_v28 }
 0x79e   : > { %v6412_v23 = vpop.eup %6411 }
 0x79f   : > { %v4747_v2 = vmul.f32 %v6412_v23, %v7749_v5 }
 0x7a1   : > { %v4762_v36 = vmul.f32 %v5476_v53, %v4747_v2 }
 0x7a2   : > { %v6414_v15 = vpop.eup %6413 }
 0x7a3   : > { %v6416_v32 = vpop.eup %6415  ;;  %v4749_v22 = vmul.f32 %v6414_v15, %v7755_v20  ;;  %v7810_v60 = vadd.f32 %v5477_v46, %v4762_v36 }
 0x7a4   : > { %v4748_v38 = vmul.f32 %v6416_v32, %v7753_v30 }
 0x7a5   : > { %v4764_v5 = vmul.f32 %v5476_v53, %v4749_v22 }
 0x7a6   : > { %v6418_v47 = vpop.eup %6417  ;;  %v4763_v63 = vmul.f32 %v5476_v53, %v4748_v38 }
 0x7a7   : > { %v4750_v24 = vmul.f32 %v6418_v47, %v7762_v9  ;;  %v7816_v30 = vadd.f32 %v5477_v46, %v4764_v5 }
 0x7a8   : > { %v7812_v6 = vadd.f32 %v5477_v46, %v4763_v63 }
 0x7a9   : > { %v4765_v45 = vmul.f32 %v5476_v53, %v4750_v24 }
 0x7aa   : > { %v4785_v20 = vpack.c.bf16 %v7812_v6, %v7810_v60 }
 0x7ab   : > { %v7818_v61 = vadd.f32 %v5477_v46, %v4765_v45 }
 0x7ac   : > { %6075 = vmatprep.mubr.msk.bf16.mxu1 %vm704_vm1, %v4785_v20 }
 0x7ad   : > { %v4786_v4 = vpack.c.bf16 %v7818_v61, %v7816_v30 }
 0x7af   : > { %6076 = vmatmul.mubr.msk.bf16.vlgmr.msra.gmra.mxu1 %vm704_vm1, %v4786_v4 }
 0x7c9   : > { %v4713_v9 = vpop.xlane.xlu1 %4712 }
 0x7ca   : > { %v4727_v35 = vmul.f32 0.03125, %v4713_v9 }
 0x7cc   : > { %v4735_v59 = vadd.f32 1e-05, %v4727_v35 }
 0x7cd   : > { %v4719_v33 = vpop.xlane.xlu1 %4718  ;;  %v4716_v54 = vpop.xlane.xlu0 %4715 }
 0x7ce   : > { %6419 = vrsqrt.f32 %v4735_v59  ;;  %v4729_v34 = vmul.f32 0.03125, %v4719_v33  ;;  %v4728_v44 = vmul.f32 0.03125, %v4716_v54  ;;  %v5485_v59 = vld [vmem:[%s631_s15] ss:$0 sm:$0xff] }
 0x7d0   : > { %v4737_v17 = vadd.f32 1e-05, %v4729_v34  ;;  %v4736_v11 = vadd.f32 1e-05, %v4728_v44 }
 0x7d1   : > { %v4722_v39 = vpop.xlane.xlu0 %4721 }
 0x7d2   : > { %6421 = vrsqrt.f32 %v4737_v17  ;;  %v4730_v10 = vmul.f32 0.03125, %v4722_v39 }
 0x7d3   : > { %6423 = vrsqrt.f32 %v4736_v11 }
 0x7d4   : > { %v4738_v0 = vadd.f32 1e-05, %v4730_v10 }
 0x7d6   : > { %6425 = vrsqrt.f32 %v4738_v0 }
 0x7db   : > { %v6420_v14 = vpop.eup %6419 }
 0x7dc   : > { %v4751_v57 = vmul.f32 %v6420_v14, %v7771_v43 }
 0x7de   : > { %v4766_v55 = vmul.f32 %v5476_v53, %v4751_v57 }
 0x7df   : > { %v6422_v37 = vpop.eup %6421 }
 0x7e0   : > { %v6424_v25 = vpop.eup %6423  ;;  %v4753_v7 = vmul.f32 %v6422_v37, %v7775_v29  ;;  %v7830_v49 = vadd.f32 %v5477_v46, %v4766_v55 }
 0x7e1   : > { %v4752_v12 = vmul.f32 %v6424_v25, %v7777_v3 }
 0x7e2   : > { %v4768_v48 = vmul.f32 %v5476_v53, %v4753_v7 }
 0x7e3   : > { %v6426_v26 = vpop.eup %6425  ;;  %v4767_v21 = vmul.f32 %v5476_v53, %v4752_v12 }
 0x7e4   : > { %v4754_v13 = vmul.f32 %v6426_v26, %v7784_v31  ;;  %v7828_v41 = vadd.f32 %v5477_v46, %v4768_v48  ;;  %v6280_v31 = vld [vmem:[%s6650_s29 + $0x10] sm:$0xff]  }
 0x7e5   : > { %v7832_v43 = vadd.f32 %v5477_v46, %v4767_v21  ;;  %6093 = vmatprep.subr.bf16.mxu0 %v6280_v31 }
 0x7e6   : > { %v4769_v52 = vmul.f32 %v5476_v53, %v4754_v13  ;;  %6094 = vmatpush3.bf16.msra.mxu0 %v6280_v31 }
 0x7e7   : > { %v4787_v29 = vpack.c.bf16 %v7832_v43, %v7830_v49  ;;  %6095 = vmatprep.subr.bf16.mxu0 %v6281_v40 }
 0x7e8   : > { %v7836_v3 = vadd.f32 %v5477_v46, %v4769_v52 }
 0x7e9   : > { %6079 = vmatprep.mubr.msk.bf16.mxu1 %vm704_vm1, %v4787_v29 }
 0x7ea   : > { %v4788_v19 = vpack.c.bf16 %v7836_v3, %v7828_v41  ;;  %6096 = vmatpush3.bf16.msra.mxu0 %v6281_v40 }
 0x7eb   : > { %6097 = vmatprep.subr.bf16.mxu0 %v6282_v16 }
 0x7ec   : > { %6080 = vmatmul.mubr.msk.bf16.gmra.mxu1 %vm704_vm1, %v4788_v19 }
 0x7ee   : > { %6098 = vmatpush3.bf16.msra.mxu0 %v6282_v16 }
 0x86f   : > { %v6077_v1 = vpop.f32.mrf.mxu1 }
 0x870   : > { %v4867_v56 = vadd.f32 %v6077_v1, %v5478_v8 }
 0x871   : > { %v4858_v50 = vpop.f32.mrf.mxu1 }
 0x872   : > { %v4859_v42 = vadd.f32 %v5478_v8, %v4858_v50  ;;  %v4891_v2 = vmax.f32 %v4867_v56, 0.0 }
 0x873   : > { %v6078_v18 = vpop.f32.mrf.mxu1 }
 0x874   : > { %v4870_v62 = vadd.f32 %v6078_v18, %v5478_v8  ;;  %v4889_v28 = vmax.f32 %v4859_v42, 0.0 }
 0x875   : > { %v4861_v58 = vpop.f32.mrf.mxu1 }
 0x876   : > { %v4862_v27 = vadd.f32 %v5478_v8, %v4861_v58  ;;  %v4892_v51 = vmax.f32 %v4870_v62, 0.0 }
 0x878   : > { %v4890_v23 = vmax.f32 %v4862_v27, 0.0  ;;  %v4898_v15 = vpack.c.bf16 %v4892_v51, %v4891_v2 }
 0x87a   : > { %v4897_v53 = vpack.c.bf16 %v4890_v23, %v4889_v28 }
 0x87c   : > { %6099 = vmatprep.mubr.bf16.mxu0 %v4897_v53 }
 0x87d   : > { %6100 = vmatmul.mubr.bf16.vlgmr.msra.gmra.mxu0 %v4898_v15 }
 0x8ac   : > { %v6081_v32 = vpop.f32.mrf.mxu1 }
 0x8ad   : > { %v4883_v47 = vadd.f32 %v6081_v32, %v5478_v8 }
 0x8ae   : > { %v4874_v22 = vpop.f32.mrf.mxu1 }
 0x8af   : > { %v4875_v36 = vadd.f32 %v5478_v8, %v4874_v22  ;;  %v4895_v4 = vmax.f32 %v4883_v47, 0.0 }
 0x8b0   : > { %v6082_v38 = vpop.f32.mrf.mxu1 }
 0x8b1   : > { %v4886_v46 = vadd.f32 %v6082_v38, %v5478_v8  ;;  %v4893_v45 = vmax.f32 %v4875_v36, 0.0 }
 0x8b2   : > { %v4877_v63 = vpop.f32.mrf.mxu1 }
 0x8b3   : > { %v4878_v5 = vadd.f32 %v5478_v8, %v4877_v63  ;;  %v4896_v24 = vmax.f32 %v4886_v46, 0.0 }
 0x8b5   : > { %v4894_v20 = vmax.f32 %v4878_v5, 0.0  ;;  %v4900_v35 = vpack.c.bf16 %v4896_v24, %v4895_v4 }
 0x8b7   : > { %v4899_v9 = vpack.c.bf16 %v4894_v20, %v4893_v45 }
 0x8b9   : > { %6103 = vmatprep.mubr.bf16.mxu0 %v4899_v9 }
 0x8ba   : > { %6104 = vmatmul.mubr.bf16.gmra.mxu0 %v4900_v35 }
 0x93d   : > { %v6101_v33 = vpop.f32.mrf.mxu0 }
 0x93e   : > { %v5015_v54 = vadd.f32 %v6101_v33, %v5485_v59 }
 0x93f   : > { %v5006_v34 = vpop.f32.mrf.mxu0 }
 0x940   : > { %v5039_v44 = vadd.f32 %v5015_v54, %v7816_v30  ;;  %v5007_v17 = vadd.f32 %v5485_v59, %v5006_v34 }
 0x941   : > { %v6102_v11 = vpop.f32.mrf.mxu0 }
 0x942   : > { %v5037_v39 = vadd.f32 %v5007_v17, %v7810_v60  ;;  %v5018_v10 = vadd.f32 %v6102_v11, %v5485_v59  ;;  %v5051_v0 = vsel %vm704_vm1, %v5039_v44, 0.0 }
 0x943   : > { %5052 = vadd.xlane.f32.xlu1 %v5051_v0  ;;  %v5009_v14 = vpop.f32.mrf.mxu0 }
 0x944   : > { %v5040_v57 = vadd.f32 %v5018_v10, %v7818_v61  ;;  %v5010_v37 = vadd.f32 %v5485_v59, %v5009_v14  ;;  %v5045_v12 = vsel %vm704_vm1, %v5037_v39, 0.0 }
 0x946   : > { %v5038_v25 = vadd.f32 %v5010_v37, %v7812_v6  ;;  %v5054_v7 = vsel %vm704_vm1, %v5040_v57, 0.0 }
 0x947   : > { %5055 = vadd.xlane.f32.xlu0 %v5054_v7  ;;  %5046 = vadd.xlane.f32.xlu1 %v5045_v12 }
 0x948   : > { %v5048_v30 = vsel %vm704_vm1, %v5038_v25, 0.0 }
 0x94b   : > { %5049 = vadd.xlane.f32.xlu0 %v5048_v30 }
 0x97a   : > { %v6105_v60 = vpop.f32.mrf.mxu0 }
 0x97b   : > { %v5031_v48 = vadd.f32 %v6105_v60, %v5485_v59 }
 0x97c   : > { %v5022_v55 = vpop.f32.mrf.mxu0 }
 0x97d   : > { %v5023_v26 = vadd.f32 %v5485_v59, %v5022_v55  ;;  %v5043_v52 = vadd.f32 %v5031_v48, %v7828_v41 }
 0x97e   : > { %v6106_v21 = vpop.f32.mrf.mxu0 }
 0x97f   : > { %v5041_v13 = vadd.f32 %v5023_v26, %v7830_v49  ;;  %v5034_v6 = vadd.f32 %v6106_v21, %v5485_v59  ;;  %v5063_v1 = vsel %vm704_vm1, %v5043_v52, 0.0 }
 0x980   : > { %v5025_v61 = vpop.f32.mrf.mxu0 }
 0x981   : > { %v5026_v29 = vadd.f32 %v5485_v59, %v5025_v61  ;;  %v5057_v19 = vsel %vm704_vm1, %v5041_v13, 0.0  ;;  %v5044_v40 = vadd.f32 %v5034_v6, %v7836_v3 }
 0x982   : > { %5058 = vadd.xlane.f32.xlu1 %v5057_v19 }
 0x983   : > { %v5042_v31 = vadd.f32 %v5026_v29, %v7832_v43  ;;  %v5066_v49 = vsel %vm704_vm1, %v5044_v40, 0.0 }
 0x985   : > { %v5060_v16 = vsel %vm704_vm1, %v5042_v31, 0.0 }
 0x986   : > { %5061 = vadd.xlane.f32.xlu0 %v5060_v16  ;;  %5064 = vadd.xlane.f32.xlu1 %v5063_v1 }
 0x98a   : > { %5067 = vadd.xlane.f32.xlu0 %v5066_v49 }
 0x9cc   : > { %v5053_v50 = vpop.xlane.xlu1 %5052 }
 0x9cd   : > { %v5071_v41 = vmul.f32 0.03125, %v5053_v50 }
 0x9cf   : > { %v7871_v8 = vsub.f32 %v5039_v44, %v5071_v41 }
 0x9d0   : > { %v5047_v18 = vpop.xlane.xlu1 %5046  ;;  %v5056_v42 = vpop.xlane.xlu0 %5055 }
 0x9d1   : > { %v5069_v62 = vmul.f32 0.03125, %v5047_v18  ;;  %v5072_v56 = vmul.f32 0.03125, %v5056_v42  ;;  %v5087_v43 = vmul.f32 %v7871_v8, %v7871_v8 }
 0x9d3   : > { %v7875_v3 = vsub.f32 %v5037_v39, %v5069_v62  ;;  %v7877_v58 = vsub.f32 %v5040_v57, %v5072_v56  ;;  %v5099_v27 = vsel %vm704_vm1, %v5087_v43, 0.0 }
 0x9d4   : > { %5100 = vadd.xlane.f32.xlu1 %v5099_v27  ;;  %v5050_v51 = vpop.xlane.xlu0 %5049 }
 0x9d5   : > { %v5070_v28 = vmul.f32 0.03125, %v5050_v51  ;;  %v5085_v23 = vmul.f32 %v7875_v3, %v7875_v3  ;;  %v5088_v2 = vmul.f32 %v7877_v58, %v7877_v58 }
 0x9d7   : > { %v7884_v53 = vsub.f32 %v5038_v25, %v5070_v28  ;;  %v5093_v15 = vsel %vm704_vm1, %v5085_v23, 0.0  ;;  %v5102_v32 = vsel %vm704_vm1, %v5088_v2, 0.0 }
 0x9d8   : > { %5094 = vadd.xlane.f32.xlu1 %v5093_v15  ;;  %5103 = vadd.xlane.f32.xlu0 %v5102_v32 }
 0x9d9   : > { %v5086_v22 = vmul.f32 %v7884_v53, %v7884_v53 }
 0x9db   : > { %v5096_v38 = vsel %vm704_vm1, %v5086_v22, 0.0 }
 0x9dc   : > { %5097 = vadd.xlane.f32.xlu0 %v5096_v38 }
 0xa0b   : > { %v5059_v36 = vpop.xlane.xlu1 %5058 }
 0xa0c   : > { %v5073_v46 = vmul.f32 0.03125, %v5059_v36 }
 0xa0e   : > { %v7891_v47 = vsub.f32 %v5041_v13, %v5073_v46  ;;  %v5494_v13 = vld [vmem:[%s634_s18] ss:$0 sm:$0xff] }
 0xa0f   : > { %v5065_v63 = vpop.xlane.xlu1 %5064  ;;  %v5062_v5 = vpop.xlane.xlu0 %5061 }
 0xa10   : > { %v5075_v24 = vmul.f32 0.03125, %v5065_v63  ;;  %v5074_v45 = vmul.f32 0.03125, %v5062_v5  ;;  %v5089_v20 = vmul.f32 %v7891_v47, %v7891_v47 }
 0xa12   : > { %v7895_v4 = vsub.f32 %v5043_v52, %v5075_v24  ;;  %v7897_v9 = vsub.f32 %v5042_v31, %v5074_v45  ;;  %v5105_v35 = vsel %vm704_vm1, %v5089_v20, 0.0  ;;  %v5495_v52 = vld [vmem:[%s637_s27] ss:$0 sm:$0xff] }
 0xa13   : > { %5106 = vadd.xlane.f32.xlu1 %v5105_v35  ;;  %v5068_v59 = vpop.xlane.xlu0 %5067 }
 0xa14   : > { %v5076_v33 = vmul.f32 0.03125, %v5068_v59  ;;  %v5091_v54 = vmul.f32 %v7895_v4, %v7895_v4  ;;  %v5090_v34 = vmul.f32 %v7897_v9, %v7897_v9 }
 0xa16   : > { %v7904_v44 = vsub.f32 %v5044_v40, %v5076_v33  ;;  %v5111_v17 = vsel %vm704_vm1, %v5091_v54, 0.0  ;;  %v5108_v11 = vsel %vm704_vm1, %v5090_v34, 0.0 }
 0xa17   : > { %5112 = vadd.xlane.f32.xlu1 %v5111_v17  ;;  %5109 = vadd.xlane.f32.xlu0 %v5108_v11 }
 0xa18   : > { %v5092_v39 = vmul.f32 %v7904_v44, %v7904_v44 }
 0xa1a   : > { %v5114_v10 = vsel %vm704_vm1, %v5092_v39, 0.0 }
 0xa1b   : > { %5115 = vadd.xlane.f32.xlu0 %v5114_v10 }
 0xa5d   : > { %v5101_v0 = vpop.xlane.xlu1 %5100 }
 0xa5e   : > { %v5119_v14 = vmul.f32 0.03125, %v5101_v0 }
 0xa60   : > { %v5127_v57 = vadd.f32 1e-05, %v5119_v14 }
 0xa61   : > { %v5095_v37 = vpop.xlane.xlu1 %5094  ;;  %v5104_v25 = vpop.xlane.xlu0 %5103 }
 0xa62   : > { %6427 = vrsqrt.f32 %v5127_v57  ;;  %v5117_v7 = vmul.f32 0.03125, %v5095_v37  ;;  %v5120_v12 = vmul.f32 0.03125, %v5104_v25 }
 0xa64   : > { %v5125_v30 = vadd.f32 1e-05, %v5117_v7  ;;  %v5128_v60 = vadd.f32 1e-05, %v5120_v12 }
 0xa65   : > { %v5098_v55 = vpop.xlane.xlu0 %5097 }
 0xa66   : > { %6429 = vrsqrt.f32 %v5125_v30  ;;  %v5118_v48 = vmul.f32 0.03125, %v5098_v55 }
 0xa67   : > { %6431 = vrsqrt.f32 %v5128_v60 }
 0xa68   : > { %v5126_v26 = vadd.f32 1e-05, %v5118_v48 }
 0xa6a   : > { %6433 = vrsqrt.f32 %v5126_v26 }
 0xa6f   : > { %v6428_v21 = vpop.eup %6427 }
 0xa70   : > { %v5143_v61 = vmul.f32 %v6428_v21, %v7871_v8 }
 0xa72   : > { %v5158_v6 = vmul.f32 %v5494_v13, %v5143_v61 }
 0xa73   : > { %v6430_v29 = vpop.eup %6429 }
 0xa74   : > { %v6432_v19 = vpop.eup %6431  ;;  %v5173_v31 = vadd.f32 %v5495_v52, %v5158_v6  ;;  %v5141_v40 = vmul.f32 %v6430_v29, %v7875_v3 }
 0xa75   : > { %v5144_v16 = vmul.f32 %v6432_v19, %v7877_v58 }
 0xa76   : > { %5181 = vst.msk [vmem:[#allocation2 + $0x10] sm:$0xff] %vm704_vm1, %v5173_v31  ;;  %v5156_v1 = vmul.f32 %v5494_v13, %v5141_v40 }
 0xa77   : > { %v6434_v49 = vpop.eup %6433  ;;  %v5159_v50 = vmul.f32 %v5494_v13, %v5144_v16 }
 0xa78   : > { %v5171_v41 = vadd.f32 %v5495_v52, %v5156_v1  ;;  %v5142_v8 = vmul.f32 %v6434_v49, %v7884_v53 }
 0xa79   : > { %v5174_v18 = vadd.f32 %v5495_v52, %v5159_v50 }
 0xa7a   : > { %5179 = vst.msk [vmem:[#allocation2] sm:$0xff] %vm704_vm1, %v5171_v41  ;;  %v5157_v42 = vmul.f32 %v5494_v13, %v5142_v8 }
 0xa7b   : > { %5182 = vst.msk [vmem:[#allocation2 + $0x18] sm:$0xff] %vm704_vm1, %v5174_v18 }
 0xa7c   : > { %v5172_v62 = vadd.f32 %v5495_v52, %v5157_v42 }
 0xa7e   : > { %5180 = vst.msk [vmem:[#allocation2 + $0x8] sm:$0xff] %vm704_vm1, %v5172_v62 }
 0xa9c   : > { %v5107_v56 = vpop.xlane.xlu1 %5106 }
 0xa9d   : > { %v5121_v43 = vmul.f32 0.03125, %v5107_v56 }
 0xa9f   : > { %v5129_v3 = vadd.f32 1e-05, %v5121_v43 }
 0xaa0   : > { %v5113_v58 = vpop.xlane.xlu1 %5112  ;;  %v5110_v27 = vpop.xlane.xlu0 %5109 }
 0xaa1   : > { %6435 = vrsqrt.f32 %v5129_v3  ;;  %v5123_v51 = vmul.f32 0.03125, %v5113_v58  ;;  %v5122_v28 = vmul.f32 0.03125, %v5110_v27 }
 0xaa3   : > { %v5131_v23 = vadd.f32 1e-05, %v5123_v51  ;;  %v5130_v2 = vadd.f32 1e-05, %v5122_v28 }
 0xaa4   : > { %v5116_v53 = vpop.xlane.xlu0 %5115 }
 0xaa5   : > { %6437 = vrsqrt.f32 %v5131_v23  ;;  %v5124_v15 = vmul.f32 0.03125, %v5116_v53 }
 0xaa6   : > { %6439 = vrsqrt.f32 %v5130_v2 }
 0xaa7   : > { %v5132_v32 = vadd.f32 1e-05, %v5124_v15 }
 0xaa9   : > { %6441 = vrsqrt.f32 %v5132_v32 }
 0xaae   : > { %v6436_v22 = vpop.eup %6435 }
 0xaaf   : > { %v5145_v38 = vmul.f32 %v6436_v22, %v7891_v47 }
 0xab1   : > { %v5160_v36 = vmul.f32 %v5494_v13, %v5145_v38 }
 0xab2   : > { %v6438_v46 = vpop.eup %6437 }
 0xab3   : > { %v6440_v63 = vpop.eup %6439  ;;  %v5175_v5 = vadd.f32 %v5495_v52, %v5160_v36  ;;  %v5147_v24 = vmul.f32 %v6438_v46, %v7895_v4 }
 0xab4   : > { %v5146_v45 = vmul.f32 %v6440_v63, %v7897_v9 }
 0xab5   : > { %5183 = vst.msk [vmem:[#allocation2 + $0x20] sm:$0xff] %vm704_vm1, %v5175_v5  ;;  %v5162_v20 = vmul.f32 %v5494_v13, %v5147_v24 }
 0xab6   : > { %v6442_v35 = vpop.eup %6441  ;;  %v5161_v59 = vmul.f32 %v5494_v13, %v5146_v45 }
 0xab7   : > { %v5177_v33 = vadd.f32 %v5495_v52, %v5162_v20  ;;  %v5148_v54 = vmul.f32 %v6442_v35, %v7904_v44 }
 0xab8   : > { %v5176_v34 = vadd.f32 %v5495_v52, %v5161_v59 }
 0xab9   : > { %5185 = vst.msk [vmem:[#allocation2 + $0x30] sm:$0xff] %vm704_vm1, %v5177_v33  ;;  %v5163_v47 = vmul.f32 %v5494_v13, %v5148_v54  ;;  %5190 = sbr.rel (%p5496_p6) target bundleno = 2754 (0xac2), region = 80 }
 0xaba   : > { %5184 = vst.msk [vmem:[#allocation2 + $0x28] sm:$0xff] %vm704_vm1, %v5176_v34 }
 0xabb   : > { %v5178_v17 = vadd.f32 %v5495_v52, %v5163_v47 }
 0xabd   : > { %5186 = vst.msk [vmem:[#allocation2 + $0x38] sm:$0xff] %vm704_vm1, %v5178_v17 }
 0xabe   : > { %5191 = vst.msk [vmem:[#allocation3] sm:$0xff] %vm704_vm1, %v5171_v41  ;;  %5192 = vst.msk [vmem:[#allocation3 + $0x8] sm:$0xff] %vm704_vm1, %v5172_v62 }
 0xabf   : > { %5193 = vst.msk [vmem:[#allocation3 + $0x10] sm:$0xff] %vm704_vm1, %v5173_v31  ;;  %5194 = vst.msk [vmem:[#allocation3 + $0x18] sm:$0xff] %vm704_vm1, %v5174_v18 }
 0xac0   : > { %5195 = vst.msk [vmem:[#allocation3 + $0x20] sm:$0xff] %vm704_vm1, %v5175_v5  ;;  %5196 = vst.msk [vmem:[#allocation3 + $0x28] sm:$0xff] %vm704_vm1, %v5176_v34 }
 0xac1   : > { %5197 = vst.msk [vmem:[#allocation3 + $0x30] sm:$0xff] %vm704_vm1, %v5177_v33  ;;  %5198 = vst.msk [vmem:[#allocation3 + $0x38] sm:$0xff] %vm704_vm1, %v5178_v17 }
 0xac2 PF: > { %s8033_s27 = sld [smem:[#allocation7_spill]]  ;;  %s6513_s18 = smov [#allocation3]  }
 0xac3   : > { %s5208_s17 = sshll.u32 %s6513_s18, 4  ;;  %s5209_s17 = int_to_ptr.vmem [resolvable:$true] %s5208_s17 }
 0xac4   : > { %s6451_s1 = scalar_lea.vmem %s5209_s17, 1024  ;;  %p6458_p11 = scmp.lt.s32.totalorder %s5209_s17, %s5209_s17 }
 0xac5   : > { %p6452_p8 = scmp.ne.s32.totalorder %s5209_s17, %s6451_s1  ;;  %p6459_p12 = scmp.lt.s32.totalorder %s6451_s1, %s6451_s1 }
 0xac7   : > { %p6460_p13 = por %p6459_p12, %p6458_p11 }
 0xac8   : > { %s8034_s25 = sadd.s32 4294967295, %s8033_s27  }
 0xac9   : > { %p7948_p7 = scmp.eq.s32.totalorder %s8034_s25, 1 }
 0xacb   : > { %p6453_p9 = pnand %p6452_p8, %p7948_p7 }
 0xacd   : > { %p6454_p10 = pneg %p6453_p9 }
 0xacf   : > { %p6461_p0 = pnand %p6460_p13, %p6454_p10 }
 0xad1   : > { %6464 = shalt.err (!%p6461_p0)
}
 0xad2   : > { %s6514_s26 = smov 128   ;;  %s8036_s19 = sld [smem:[#allocation24_spill]] }
 0xad8   : > { %6108 = dma.vmem_to_hbm [thread:$0]  (%p7948_p7), %s5209_s17, 1024, %s8036_s19, [#allocation4], %s6514_s26, %s6514_s26, %s6510_s22  }
 0xad9   : > { %6488 = dma.done.wait (%p7948_p7), [#allocation4], 1024  }
 0xada   : > { %6490 = vsyncadd (%p7948_p7), [#allocation4], 4294966272 }
 0xadb PF: > { %s8037_s21 = sld [smem:[#allocation7_spill]] }
 0xadc   : > { %s8038_s25 = sld [smem:[#allocation6_spill]] }
 0xadd   : > { %s8039_s26 = sld [smem:[#allocation8_spill]] }
 0xae1   : > { %s24_s27 = sadd.s32 1, %s8037_s21  }
 0xae2   : > { %p21_p1 = scmp.ge.s32.totalorder %s24_s27, 4  }
 0xae4   :  { %23 = sbr.rel (!%p21_p1) target bundleno = 6 (0x6), region = 144 }
 0xae9   :  { %5224 = vsyncpa [#allocation4], 1 }
 0xaea   :  { %5226 = vsyncpa [#allocation4 + $0x1], 1 }

</bundles_post_ra>
